<compile_context>
chip_gen: v7x
topology: tpu7x:2x2x1
jax: 0.10.0
libtpu: 0.0.40
codegen_flags: <defaults>
</compile_context>

<pallas_src>
import functools

import jax
import jax.numpy as jnp
from jax.experimental import pallas as pl
from jax.experimental.pallas import tpu as pltpu


def _round_up(x, m):
    return (x + m - 1) // m * m


_M_TARGET = 512          # target MXU M rows per step (>=256 for v6e/v7x, >=128 for v5e)
_VMEM_LIMIT = 32 * 1024 * 1024


# ---------------- Pallas kernel A: conv matmul + per-image stats -------------

def _conv_stats_kernel(cols_ref, w_ref, y_ref, stats_ref):
    # cols:  (B, TM, Kp)  bf16   -- B images x TM im2col rows (row tile)
    # w:     (Kp, Cp)     bf16
    # y:     (B, TM, Cp)  bf16   -- pre-norm conv activation (written per tile)
    # stats: (1, 2, B, Cp) f32   -- [sum, sumsq] per image/channel, accumulated
    #                               across the row-tile grid axis (resident block)
    m = pl.program_id(1)
    B, TM, Kp = cols_ref.shape

    # Pack the B images into one (B*TM, Kp) matmul so the MXU M dim is large
    # even when HW per image is tiny.  TM is a multiple of 8, so the merge is
    # sublane-tile aligned (no relayout).
    x = cols_ref[...].reshape(B * TM, Kp)
    y = jnp.dot(x, w_ref[...], preferred_element_type=jnp.float32)   # (B*TM, Cp)
    y = y.reshape(B, TM, -1)                                          # (B, TM, Cp)
    y_ref[...] = y.astype(y_ref.dtype)

    @pl.when(m == 0)
    def _():
        stats_ref[...] = jnp.zeros_like(stats_ref)

    stats_ref[0, 0] += jnp.sum(y, axis=1)        # per-image sum       (B, Cp)
    stats_ref[0, 1] += jnp.sum(y * y, axis=1)    # per-image sum of sq (B, Cp)


# ---------------- Pallas kernel B: InstanceNorm + ReLU -----------------------

def _norm_relu_kernel(y_ref, stats_ref, o_ref, *, inv_hw):
    # y:     (B, TM, Cp)  bf16
    # stats: (1, 2, B, Cp) f32
    # o:     (B, TM, Cp)
    y = y_ref[...].astype(jnp.float32)
    mean = stats_ref[0, 0] * inv_hw                                    # (B, Cp)
    var = jnp.maximum(stats_ref[0, 1] * inv_hw - mean * mean, 0.0)     # biased var
    scale = jax.lax.rsqrt(var + 1e-5)
    shift = -mean * scale
    out = jnp.maximum(y * scale[:, None, :] + shift[:, None, :], 0.0)
    o_ref[...] = out.astype(o_ref.dtype)


# ---------------- im2col (plain-JAX, NHWC, channels fastest within K) --------

def _im2col_nhwc(x, k, stride, pad):
    # x: (N, H, W, C) -> cols: (N, Ho*Wo, k*k*C), K index = (kh*k + kw)*C + c
    N, H, W, C = x.shape
    xp = jnp.pad(x, ((0, 0), (pad, pad), (pad, pad), (0, 0)))
    Ho = (H + 2 * pad - k) // stride + 1
    Wo = (W + 2 * pad - k) // stride + 1
    patches = []
    for i in range(k):
        for j in range(k):
            patches.append(
                xp[:, i:i + stride * Ho:stride, j:j + stride * Wo:stride, :])
    cols = jnp.stack(patches, axis=3)            # (N, Ho, Wo, k*k, C)
    return cols.reshape(N, Ho * Wo, k * k * C), Ho, Wo


# ---------------- tiling selection --------------------------------------------

def _tiling(N, HW):
    """Rows per step = B images x TM rows; keep B*TM near _M_TARGET."""
    if HW >= _M_TARGET:
        B, TM = 1, _M_TARGET
        HWp = _round_up(HW, TM)
    else:
        HWp = _round_up(HW, 8)       # sublane-aligned row tile
        TM = HWp
        B = min(N, max(1, _M_TARGET // HWp))
    Np = _round_up(N, B)             # zero-image padding (sliced off later)
    return B, TM, HWp, Np


# ---------------- one stage: Conv2d + InstanceNorm2d + ReLU -------------------

def conv_in_relu(x_nhwc, w, *, stride, pad, out_dtype):
    """Returns (N, Ho, Wo, Cp) with Cp = round_up(Cout, 128); channels beyond
    Cout are exactly zero (lane-dense stores).  Bias is intentionally absent:
    it is cancelled by the InstanceNorm mean subtraction."""
    N = x_nhwc.shape[0]
    cout, cin, k, _ = w.shape
    if x_nhwc.shape[-1] > cin:
        # Drop the previous stage's zero lane-padding channels *before* the
        # im2col so they never enter the contraction.
        x_nhwc = x_nhwc[..., :cin]

    cols, Ho, Wo = _im2col_nhwc(x_nhwc.astype(jnp.bfloat16), k, stride, pad)
    HW = Ho * Wo
    K = k * k * cin
    Kp = _round_up(K, 128)
    Cp = _round_up(cout, 128)

    B, TM, HWp, Np = _tiling(N, HW)
    G, Gm = Np // B, HWp // TM

    # Zero padding: K pad -> zero contraction columns; row/image pad -> zero
    # conv outputs that contribute nothing to the (bias-free) statistics.
    cols = jnp.pad(cols, ((0, Np - N), (0, HWp - HW), (0, Kp - K)))
    wt = jnp.transpose(w, (2, 3, 1, 0)).reshape(K, cout)     # matches im2col K order
    wt = jnp.pad(wt, ((0, Kp - K), (0, Cp - cout))).astype(jnp.bfloat16)

    cparams = pltpu.CompilerParams(
        dimension_semantics=("parallel", "arbitrary"),
        vmem_limit_bytes=_VMEM_LIMIT)

    # ---- call A: conv + per-image sum / sumsq -------------------------------
    y, stats = pl.pallas_call(
        _conv_stats_kernel,
        out_shape=(
            jax.ShapeDtypeStruct((Np, HWp, Cp), jnp.bfloat16),   # pre-norm conv
            jax.ShapeDtypeStruct((G, 2, B, Cp), jnp.float32),    # [sum, sumsq]
        ),
        grid=(G, Gm),
        in_specs=[
            pl.BlockSpec((B, TM, Kp), lambda g, m: (g, m, 0)),
            pl.BlockSpec((Kp, Cp), lambda g, m: (0, 0)),
        ],
        out_specs=(
            pl.BlockSpec((B, TM, Cp), lambda g, m: (g, m, 0)),
            pl.BlockSpec((1, 2, B, Cp), lambda g, m: (g, 0, 0, 0)),  # accumulator
        ),
        compiler_params=cparams,
    )(cols, wt)

    # ---- call B: InstanceNorm + ReLU -----------------------------------------
    out = pl.pallas_call(
        functools.partial(_norm_relu_kernel, inv_hw=1.0 / HW),
        out_shape=jax.ShapeDtypeStruct((Np, HWp, Cp), out_dtype),
        grid=(G, Gm),
        in_specs=[
            pl.BlockSpec((B, TM, Cp), lambda g, m: (g, m, 0)),
            pl.BlockSpec((1, 2, B, Cp), lambda g, m: (g, 0, 0, 0)),
        ],
        out_specs=pl.BlockSpec((B, TM, Cp), lambda g, m: (g, m, 0)),
        compiler_params=cparams,
    )(y, stats)

    out = out[:N, :HW]                       # drop image / row padding
    return out.reshape(N, Ho, Wo, Cp)


# ---------------- module forward + params ------------------------------------

def init_params(key):
    # PyTorch-style uniform(-1/sqrt(fan_in), 1/sqrt(fan_in)) init.
    ks = jax.random.split(key, 6)

    def conv_init(kw, kb, cout, cin, ksz):
        fan_in = cin * ksz * ksz
        bound = 1.0 / (fan_in ** 0.5)
        w = jax.random.uniform(kw, (cout, cin, ksz, ksz), jnp.float32, -bound, bound)
        b = jax.random.uniform(kb, (cout,), jnp.float32, -bound, bound)
        return w, b

    p = {}
    p["w1"], p["b1"] = conv_init(ks[0], ks[1], 64, 3, 7)     # Conv2d(3, 64, 7, s1, p3)
    p["w2"], p["b2"] = conv_init(ks[2], ks[3], 128, 64, 3)   # Conv2d(64, 128, 3, s2, p1)
    p["w3"], p["b3"] = conv_init(ks[4], ks[5], 256, 128, 3)  # Conv2d(128, 256, 3, s2, p1)
    return p


@jax.jit
def g_downsample(x_nchw, p):
    # NCHW -> NHWC once; every stage stays channels-last / lane-dense.
    # Biases are NOT used: InstanceNorm(affine=False) cancels them exactly.
    x = jnp.transpose(x_nchw, (0, 2, 3, 1))
    x = conv_in_relu(x, p["w1"], stride=1, pad=3, out_dtype=jnp.bfloat16)
    x = conv_in_relu(x, p["w2"], stride=2, pad=1, out_dtype=jnp.bfloat16)
    x = conv_in_relu(x, p["w3"], stride=2, pad=1, out_dtype=jnp.float32)
    x = x[..., : p["w3"].shape[0]]            # strip channel padding (no-op: 256)
    return jnp.transpose(x, (0, 3, 1, 2))     # back to NCHW like the PyTorch module


# ---------------- pure-JAX reference (with bias, like the PyTorch module) ----

@jax.jit
def reference_forward(x, p):
    def stage(x, w, b, stride, pad):
        y = jax.lax.conv_general_dilated(
            x, w, (stride, stride), ((pad, pad), (pad, pad)),
            dimension_numbers=("NCHW", "OIHW", "NCHW"),
            precision=jax.lax.Precision.HIGHEST)
        y = y + b[None, :, None, None]        # cancelled by InstanceNorm below
        mu = jnp.mean(y, axis=(2, 3), keepdims=True)
        var = jnp.mean((y - mu) ** 2, axis=(2, 3), keepdims=True)
        return jnp.maximum((y - mu) * jax.lax.rsqrt(var + 1e-5), 0.0)

    x = stage(x, p["w1"], p["b1"], 1, 3)
    x = stage(x, p["w2"], p["b2"], 2, 1)
    x = stage(x, p["w3"], p["b3"], 2, 1)
    return x


if __name__ == "__main__":
    key = jax.random.PRNGKey(0)
    kx, kp = jax.random.split(key)
    x = jax.random.normal(kx, (2, 3, 16, 16), jnp.float32)   # NCHW, like PyTorch
    params = init_params(kp)

    out = jax.block_until_ready(g_downsample(x, params))
    assert out.shape == (2, 256, 4, 4), out.shape
    assert out.dtype == jnp.float32
    assert bool(jnp.all(jnp.isfinite(out)))

    # Numerical sanity check vs a pure-JAX f32 reference (bf16 MXU inputs and
    # a bf16 pre-norm intermediate give ~1e-2 scale deviations).
    ref = jax.block_until_ready(reference_forward(x, params))
    max_err = float(jnp.max(jnp.abs(out - ref)))
    mean_err = float(jnp.mean(jnp.abs(out - ref)))
    assert max_err < 0.5 and mean_err < 0.05, (max_err, mean_err)

    print("KERNEL_OK")
</pallas_src>

<mosaic_0001>
module attributes {stable_mosaic.version = 11 : i64} {
  func.func @_conv_stats_kernel(%arg0: i32, %arg1: i32, %arg2: memref<2x256x256xbf16, #tpu.memory_space<vmem>>, %arg3: memref<256x128xbf16, #tpu.memory_space<vmem>>, %arg4: memref<2x256x128xbf16, #tpu.memory_space<vmem>>, %arg5: memref<1x2x2x128xf32, #tpu.memory_space<vmem>>) attributes {dimension_semantics = [#tpu.dimension_semantics<parallel>, #tpu.dimension_semantics<arbitrary>], iteration_bounds = array<i64: 1, 1>, scalar_prefetch = 0 : i64, scratch_operands = 0 : i64, tpu.core_type = #tpu.core_type<tc>, window_params = [{transform_indices = @transform_0, window_bounds = array<i64: 2, 256, 256>}, {pipeline_mode = #tpu.pipeline_mode<synchronous>, transform_indices = @transform_1, window_bounds = array<i64: 256, 128>}, {transform_indices = @transform_2, window_bounds = array<i64: 2, 256, 128>}, {transform_indices = @transform_3, window_bounds = array<i64: 1, 2, 2, 128>}]} {
    %c0 = arith.constant 0 : index
    %c0_0 = arith.constant 0 : index
    %c0_1 = arith.constant 0 : index
    %0 = vector.load %arg2[%c0, %c0_0, %c0_1] : memref<2x256x256xbf16, #tpu.memory_space<vmem>>, vector<2x256x256xbf16>
    %1 = vector.shape_cast %0 : vector<2x256x256xbf16> to vector<512x256xbf16>
    %c0_2 = arith.constant 0 : index
    %c0_3 = arith.constant 0 : index
    %2 = vector.load %arg3[%c0_2, %c0_3] : memref<256x128xbf16, #tpu.memory_space<vmem>>, vector<256x128xbf16>
    %cst = arith.constant dense<0.000000e+00> : vector<512x128xf32>
    %3 = tpu.matmul %1, %2, %cst {dimension_numbers = #tpu.dot_dimension_numbers<[1], [0], [0], [1], [0, 0, 1, 1], [], []>} : vector<512x256xbf16>, vector<256x128xbf16>, vector<512x128xf32> -> vector<512x128xf32>
    %4 = vector.shape_cast %3 : vector<512x128xf32> to vector<2x256x128xf32>
    %5 = arith.truncf %4 : vector<2x256x128xf32> to vector<2x256x128xbf16>
    %c0_4 = arith.constant 0 : index
    %c0_5 = arith.constant 0 : index
    %c0_6 = arith.constant 0 : index
    %6 = vector.load %arg4[%c0_4, %c0_5, %c0_6] : memref<2x256x128xbf16, #tpu.memory_space<vmem>>, vector<2x256x128xbf16>
    tpu.vector_store %arg4[%c0_4, %c0_5, %c0_6], %5 {strides = array<i32>} : memref<2x256x128xbf16, #tpu.memory_space<vmem>>, vector<2x256x128xbf16>,
    %c0_i32 = arith.constant 0 : i32
    %7 = arith.cmpi eq, %arg1, %c0_i32 : i32
    %8 = arith.extui %7 : i1 to i32
    %c0_i32_7 = arith.constant 0 : i32
    %9 = arith.cmpi ne, %8, %c0_i32_7 : i32
    scf.if %9 {
      %cst_25 = arith.constant 0.000000e+00 : f32
      %25 = vector.broadcast %cst_25 : f32 to vector<1x2x2x128xf32>
      %c0_26 = arith.constant 0 : index
      %c0_27 = arith.constant 0 : index
      %c0_28 = arith.constant 0 : index
      %c0_29 = arith.constant 0 : index
      %26 = vector.load %arg5[%c0_26, %c0_27, %c0_28, %c0_29] : memref<1x2x2x128xf32, #tpu.memory_space<vmem>>, vector<1x2x2x128xf32>
      tpu.vector_store %arg5[%c0_26, %c0_27, %c0_28, %c0_29], %25 {strides = array<i32>} : memref<1x2x2x128xf32, #tpu.memory_space<vmem>>, vector<1x2x2x128xf32>,
    } else {
    }
    %c0_8 = arith.constant 0 : index
    %c0_9 = arith.constant 0 : index
    %c0_10 = arith.constant 0 : index
    %c0_11 = arith.constant 0 : index
    %10 = vector.load %arg5[%c0_8, %c0_9, %c0_10, %c0_11] : memref<1x2x2x128xf32, #tpu.memory_space<vmem>>, vector<1x1x2x128xf32>
    %11 = vector.shape_cast %10 : vector<1x1x2x128xf32> to vector<2x128xf32>
    %cst_12 = arith.constant dense<0.000000e+00> : vector<2x128xf32>
    %12 = vector.multi_reduction <add>, %4, %cst_12 [1] : vector<2x256x128xf32> to vector<2x128xf32>
    %13 = arith.addf %11, %12 : vector<2x128xf32>
    %c0_13 = arith.constant 0 : index
    %c0_14 = arith.constant 0 : index
    %c0_15 = arith.constant 0 : index
    %c0_16 = arith.constant 0 : index
    %14 = vector.load %arg5[%c0_13, %c0_14, %c0_15, %c0_16] : memref<1x2x2x128xf32, #tpu.memory_space<vmem>>, vector<1x1x2x128xf32>
    %15 = vector.shape_cast %14 : vector<1x1x2x128xf32> to vector<2x128xf32>
    %16 = vector.shape_cast %13 : vector<2x128xf32> to vector<1x1x2x128xf32>
    tpu.vector_store %arg5[%c0_13, %c0_14, %c0_15, %c0_16], %16 {strides = array<i32>} : memref<1x2x2x128xf32, #tpu.memory_space<vmem>>, vector<1x1x2x128xf32>,
    %c0_17 = arith.constant 0 : index
    %c1 = arith.constant 1 : index
    %c0_18 = arith.constant 0 : index
    %c0_19 = arith.constant 0 : index
    %17 = vector.load %arg5[%c0_17, %c1, %c0_18, %c0_19] : memref<1x2x2x128xf32, #tpu.memory_space<vmem>>, vector<1x1x2x128xf32>
    %18 = vector.shape_cast %17 : vector<1x1x2x128xf32> to vector<2x128xf32>
    %19 = arith.mulf %4, %4 : vector<2x256x128xf32>
    %cst_20 = arith.constant dense<0.000000e+00> : vector<2x128xf32>
    %20 = vector.multi_reduction <add>, %19, %cst_20 [1] : vector<2x256x128xf32> to vector<2x128xf32>
    %21 = arith.addf %18, %20 : vector<2x128xf32>
    %c0_21 = arith.constant 0 : index
    %c1_22 = arith.constant 1 : index
    %c0_23 = arith.constant 0 : index
    %c0_24 = arith.constant 0 : index
    %22 = vector.load %arg5[%c0_21, %c1_22, %c0_23, %c0_24] : memref<1x2x2x128xf32, #tpu.memory_space<vmem>>, vector<1x1x2x128xf32>
    %23 = vector.shape_cast %22 : vector<1x1x2x128xf32> to vector<2x128xf32>
    %24 = vector.shape_cast %21 : vector<2x128xf32> to vector<1x1x2x128xf32>
    tpu.vector_store %arg5[%c0_21, %c1_22, %c0_23, %c0_24], %24 {strides = array<i32>} : memref<1x2x2x128xf32, #tpu.memory_space<vmem>>, vector<1x1x2x128xf32>,
    return
  }
  func.func @transform_0(%arg0: i32, %arg1: i32) -> (i32, i32, i32) {
    %c0_i32 = arith.constant 0 : i32
    %c0_i32_0 = arith.constant 0 : i32
    return %arg0, %arg1, %c0_i32 : i32, i32, i32
  }
  func.func @transform_1(%arg0: i32, %arg1: i32) -> (i32, i32) {
    %c0_i32 = arith.constant 0 : i32
    %c0_i32_0 = arith.constant 0 : i32
    %c0_i32_1 = arith.constant 0 : i32
    return %c0_i32, %c0_i32_0 : i32, i32
  }
  func.func @transform_2(%arg0: i32, %arg1: i32) -> (i32, i32, i32) {
    %c0_i32 = arith.constant 0 : i32
    %c0_i32_0 = arith.constant 0 : i32
    return %arg0, %arg1, %c0_i32 : i32, i32, i32
  }
  func.func @transform_3(%arg0: i32, %arg1: i32) -> (i32, i32, i32, i32) {
    %c0_i32 = arith.constant 0 : i32
    %c0_i32_0 = arith.constant 0 : i32
    %c0_i32_1 = arith.constant 0 : i32
    %c0_i32_2 = arith.constant 0 : i32
    return %arg0, %c0_i32, %c0_i32_0, %c0_i32_1 : i32, i32, i32, i32
  }
}

module attributes {stable_mosaic.version = 11 : i64} {
  func.func @_norm_relu_kernel(%arg0: i32, %arg1: i32, %arg2: memref<2x256x128xbf16, #tpu.memory_space<vmem>>, %arg3: memref<1x2x2x128xf32, #tpu.memory_space<vmem>>, %arg4: memref<2x256x128xbf16, #tpu.memory_space<vmem>>) attributes {dimension_semantics = [#tpu.dimension_semantics<parallel>, #tpu.dimension_semantics<arbitrary>], iteration_bounds = array<i64: 1, 1>, scalar_prefetch = 0 : i64, scratch_operands = 0 : i64, tpu.core_type = #tpu.core_type<tc>, window_params = [{transform_indices = @transform_0, window_bounds = array<i64: 2, 256, 128>}, {transform_indices = @transform_1, window_bounds = array<i64: 1, 2, 2, 128>}, {transform_indices = @transform_2, window_bounds = array<i64: 2, 256, 128>}]} {
    %c0 = arith.constant 0 : index
    %c0_0 = arith.constant 0 : index
    %c0_1 = arith.constant 0 : index
    %0 = vector.load %arg2[%c0, %c0_0, %c0_1] : memref<2x256x128xbf16, #tpu.memory_space<vmem>>, vector<2x256x128xbf16>
    %1 = arith.extf %0 : vector<2x256x128xbf16> to vector<2x256x128xf32>
    %c0_2 = arith.constant 0 : index
    %c0_3 = arith.constant 0 : index
    %c0_4 = arith.constant 0 : index
    %c0_5 = arith.constant 0 : index
    %2 = vector.load %arg3[%c0_2, %c0_3, %c0_4, %c0_5] : memref<1x2x2x128xf32, #tpu.memory_space<vmem>>, vector<1x1x2x128xf32>
    %3 = vector.shape_cast %2 : vector<1x1x2x128xf32> to vector<2x128xf32>
    %cst = arith.constant 3.906250e-03 : f32
    %4 = vector.broadcast %cst : f32 to vector<2x128xf32>
    %5 = arith.mulf %3, %4 : vector<2x128xf32>
    %c0_6 = arith.constant 0 : index
    %c1 = arith.constant 1 : index
    %c0_7 = arith.constant 0 : index
    %c0_8 = arith.constant 0 : index
    %6 = vector.load %arg3[%c0_6, %c1, %c0_7, %c0_8] : memref<1x2x2x128xf32, #tpu.memory_space<vmem>>, vector<1x1x2x128xf32>
    %7 = vector.shape_cast %6 : vector<1x1x2x128xf32> to vector<2x128xf32>
    %cst_9 = arith.constant 3.906250e-03 : f32
    %8 = vector.broadcast %cst_9 : f32 to vector<2x128xf32>
    %9 = arith.mulf %7, %8 : vector<2x128xf32>
    %10 = arith.mulf %5, %5 : vector<2x128xf32>
    %11 = arith.subf %9, %10 : vector<2x128xf32>
    %cst_10 = arith.constant 0.000000e+00 : f32
    %12 = vector.broadcast %cst_10 : f32 to vector<2x128xf32>
    %13 = arith.maximumf %11, %12 : vector<2x128xf32>
    %cst_11 = arith.constant 9.99999974E-6 : f32
    %14 = vector.broadcast %cst_11 : f32 to vector<2x128xf32>
    %15 = arith.addf %13, %14 : vector<2x128xf32>
    %16 = math.rsqrt %15 : vector<2x128xf32>
    %cst_12 = arith.constant 0.000000e+00 : f32
    %17 = vector.broadcast %cst_12 : f32 to vector<2x128xf32>
    %18 = arith.subf %17, %5 : vector<2x128xf32>
    %19 = arith.mulf %18, %16 : vector<2x128xf32>
    %20 = vector.shape_cast %16 : vector<2x128xf32> to vector<2x1x128xf32>
    %21 = vector.broadcast %20 : vector<2x1x128xf32> to vector<2x256x128xf32>
    %22 = arith.mulf %1, %21 : vector<2x256x128xf32>
    %23 = vector.shape_cast %19 : vector<2x128xf32> to vector<2x1x128xf32>
    %24 = vector.broadcast %23 : vector<2x1x128xf32> to vector<2x256x128xf32>
    %25 = arith.addf %22, %24 : vector<2x256x128xf32>
    %cst_13 = arith.constant 0.000000e+00 : f32
    %26 = vector.broadcast %cst_13 : f32 to vector<2x256x128xf32>
    %27 = arith.maximumf %25, %26 : vector<2x256x128xf32>
    %28 = arith.truncf %27 : vector<2x256x128xf32> to vector<2x256x128xbf16>
    %c0_14 = arith.constant 0 : index
    %c0_15 = arith.constant 0 : index
    %c0_16 = arith.constant 0 : index
    %29 = vector.load %arg4[%c0_14, %c0_15, %c0_16] : memref<2x256x128xbf16, #tpu.memory_space<vmem>>, vector<2x256x128xbf16>
    tpu.vector_store %arg4[%c0_14, %c0_15, %c0_16], %28 {strides = array<i32>} : memref<2x256x128xbf16, #tpu.memory_space<vmem>>, vector<2x256x128xbf16>,
    return
  }
  func.func @transform_0(%arg0: i32, %arg1: i32) -> (i32, i32, i32) {
    %c0_i32 = arith.constant 0 : i32
    %c0_i32_0 = arith.constant 0 : i32
    return %arg0, %arg1, %c0_i32 : i32, i32, i32
  }
  func.func @transform_1(%arg0: i32, %arg1: i32) -> (i32, i32, i32, i32) {
    %c0_i32 = arith.constant 0 : i32
    %c0_i32_0 = arith.constant 0 : i32
    %c0_i32_1 = arith.constant 0 : i32
    %c0_i32_2 = arith.constant 0 : i32
    return %arg0, %c0_i32, %c0_i32_0, %c0_i32_1 : i32, i32, i32, i32
  }
  func.func @transform_2(%arg0: i32, %arg1: i32) -> (i32, i32, i32) {
    %c0_i32 = arith.constant 0 : i32
    %c0_i32_0 = arith.constant 0 : i32
    return %arg0, %arg1, %c0_i32 : i32, i32, i32
  }
}

module attributes {stable_mosaic.version = 11 : i64} {
  func.func @_conv_stats_kernel(%arg0: i32, %arg1: i32, %arg2: memref<2x64x640xbf16, #tpu.memory_space<vmem>>, %arg3: memref<640x128xbf16, #tpu.memory_space<vmem>>, %arg4: memref<2x64x128xbf16, #tpu.memory_space<vmem>>, %arg5: memref<1x2x2x128xf32, #tpu.memory_space<vmem>>) attributes {dimension_semantics = [#tpu.dimension_semantics<parallel>, #tpu.dimension_semantics<arbitrary>], iteration_bounds = array<i64: 1, 1>, scalar_prefetch = 0 : i64, scratch_operands = 0 : i64, tpu.core_type = #tpu.core_type<tc>, window_params = [{transform_indices = @transform_0, window_bounds = array<i64: 2, 64, 640>}, {pipeline_mode = #tpu.pipeline_mode<synchronous>, transform_indices = @transform_1, window_bounds = array<i64: 640, 128>}, {transform_indices = @transform_2, window_bounds = array<i64: 2, 64, 128>}, {transform_indices = @transform_3, window_bounds = array<i64: 1, 2, 2, 128>}]} {
    %c0 = arith.constant 0 : index
    %c0_0 = arith.constant 0 : index
    %c0_1 = arith.constant 0 : index
    %0 = vector.load %arg2[%c0, %c0_0, %c0_1] : memref<2x64x640xbf16, #tpu.memory_space<vmem>>, vector<2x64x640xbf16>
    %1 = vector.shape_cast %0 : vector<2x64x640xbf16> to vector<128x640xbf16>
    %c0_2 = arith.constant 0 : index
    %c0_3 = arith.constant 0 : index
    %2 = vector.load %arg3[%c0_2, %c0_3] : memref<640x128xbf16, #tpu.memory_space<vmem>>, vector<640x128xbf16>
    %cst = arith.constant dense<0.000000e+00> : vector<128x128xf32>
    %3 = tpu.matmul %1, %2, %cst {dimension_numbers = #tpu.dot_dimension_numbers<[1], [0], [0], [1], [0, 0, 1, 1], [], []>} : vector<128x640xbf16>, vector<640x128xbf16>, vector<128x128xf32> -> vector<128x128xf32>
    %4 = vector.shape_cast %3 : vector<128x128xf32> to vector<2x64x128xf32>
    %5 = arith.truncf %4 : vector<2x64x128xf32> to vector<2x64x128xbf16>
    %c0_4 = arith.constant 0 : index
    %c0_5 = arith.constant 0 : index
    %c0_6 = arith.constant 0 : index
    %6 = vector.load %arg4[%c0_4, %c0_5, %c0_6] : memref<2x64x128xbf16, #tpu.memory_space<vmem>>, vector<2x64x128xbf16>
    tpu.vector_store %arg4[%c0_4, %c0_5, %c0_6], %5 {strides = array<i32>} : memref<2x64x128xbf16, #tpu.memory_space<vmem>>, vector<2x64x128xbf16>,
    %c0_i32 = arith.constant 0 : i32
    %7 = arith.cmpi eq, %arg1, %c0_i32 : i32
    %8 = arith.extui %7 : i1 to i32
    %c0_i32_7 = arith.constant 0 : i32
    %9 = arith.cmpi ne, %8, %c0_i32_7 : i32
    scf.if %9 {
      %cst_25 = arith.constant 0.000000e+00 : f32
      %25 = vector.broadcast %cst_25 : f32 to vector<1x2x2x128xf32>
      %c0_26 = arith.constant 0 : index
      %c0_27 = arith.constant 0 : index
      %c0_28 = arith.constant 0 : index
      %c0_29 = arith.constant 0 : index
      %26 = vector.load %arg5[%c0_26, %c0_27, %c0_28, %c0_29] : memref<1x2x2x128xf32, #tpu.memory_space<vmem>>, vector<1x2x2x128xf32>
      tpu.vector_store %arg5[%c0_26, %c0_27, %c0_28, %c0_29], %25 {strides = array<i32>} : memref<1x2x2x128xf32, #tpu.memory_space<vmem>>, vector<1x2x2x128xf32>,
    } else {
    }
    %c0_8 = arith.constant 0 : index
    %c0_9 = arith.constant 0 : index
    %c0_10 = arith.constant 0 : index
    %c0_11 = arith.constant 0 : index
    %10 = vector.load %arg5[%c0_8, %c0_9, %c0_10, %c0_11] : memref<1x2x2x128xf32, #tpu.memory_space<vmem>>, vector<1x1x2x128xf32>
    %11 = vector.shape_cast %10 : vector<1x1x2x128xf32> to vector<2x128xf32>
    %cst_12 = arith.constant dense<0.000000e+00> : vector<2x128xf32>
    %12 = vector.multi_reduction <add>, %4, %cst_12 [1] : vector<2x64x128xf32> to vector<2x128xf32>
    %13 = arith.addf %11, %12 : vector<2x128xf32>
    %c0_13 = arith.constant 0 : index
    %c0_14 = arith.constant 0 : index
    %c0_15 = arith.constant 0 : index
    %c0_16 = arith.constant 0 : index
    %14 = vector.load %arg5[%c0_13, %c0_14, %c0_15, %c0_16] : memref<1x2x2x128xf32, #tpu.memory_space<vmem>>, vector<1x1x2x128xf32>
    %15 = vector.shape_cast %14 : vector<1x1x2x128xf32> to vector<2x128xf32>
    %16 = vector.shape_cast %13 : vector<2x128xf32> to vector<1x1x2x128xf32>
    tpu.vector_store %arg5[%c0_13, %c0_14, %c0_15, %c0_16], %16 {strides = array<i32>} : memref<1x2x2x128xf32, #tpu.memory_space<vmem>>, vector<1x1x2x128xf32>,
    %c0_17 = arith.constant 0 : index
    %c1 = arith.constant 1 : index
    %c0_18 = arith.constant 0 : index
    %c0_19 = arith.constant 0 : index
    %17 = vector.load %arg5[%c0_17, %c1, %c0_18, %c0_19] : memref<1x2x2x128xf32, #tpu.memory_space<vmem>>, vector<1x1x2x128xf32>
    %18 = vector.shape_cast %17 : vector<1x1x2x128xf32> to vector<2x128xf32>
    %19 = arith.mulf %4, %4 : vector<2x64x128xf32>
    %cst_20 = arith.constant dense<0.000000e+00> : vector<2x128xf32>
    %20 = vector.multi_reduction <add>, %19, %cst_20 [1] : vector<2x64x128xf32> to vector<2x128xf32>
    %21 = arith.addf %18, %20 : vector<2x128xf32>
    %c0_21 = arith.constant 0 : index
    %c1_22 = arith.constant 1 : index
    %c0_23 = arith.constant 0 : index
    %c0_24 = arith.constant 0 : index
    %22 = vector.load %arg5[%c0_21, %c1_22, %c0_23, %c0_24] : memref<1x2x2x128xf32, #tpu.memory_space<vmem>>, vector<1x1x2x128xf32>
    %23 = vector.shape_cast %22 : vector<1x1x2x128xf32> to vector<2x128xf32>
    %24 = vector.shape_cast %21 : vector<2x128xf32> to vector<1x1x2x128xf32>
    tpu.vector_store %arg5[%c0_21, %c1_22, %c0_23, %c0_24], %24 {strides = array<i32>} : memref<1x2x2x128xf32, #tpu.memory_space<vmem>>, vector<1x1x2x128xf32>,
    return
  }
  func.func @transform_0(%arg0: i32, %arg1: i32) -> (i32, i32, i32) {
    %c0_i32 = arith.constant 0 : i32
    %c0_i32_0 = arith.constant 0 : i32
    return %arg0, %arg1, %c0_i32 : i32, i32, i32
  }
  func.func @transform_1(%arg0: i32, %arg1: i32) -> (i32, i32) {
    %c0_i32 = arith.constant 0 : i32
    %c0_i32_0 = arith.constant 0 : i32
    %c0_i32_1 = arith.constant 0 : i32
    return %c0_i32, %c0_i32_0 : i32, i32
  }
  func.func @transform_2(%arg0: i32, %arg1: i32) -> (i32, i32, i32) {
    %c0_i32 = arith.constant 0 : i32
    %c0_i32_0 = arith.constant 0 : i32
    return %arg0, %arg1, %c0_i32 : i32, i32, i32
  }
  func.func @transform_3(%arg0: i32, %arg1: i32) -> (i32, i32, i32, i32) {
    %c0_i32 = arith.constant 0 : i32
    %c0_i32_0 = arith.constant 0 : i32
    %c0_i32_1 = arith.constant 0 : i32
    %c0_i32_2 = arith.constant 0 : i32
    return %arg0, %c0_i32, %c0_i32_0, %c0_i32_1 : i32, i32, i32, i32
  }
}

module attributes {stable_mosaic.version = 11 : i64} {
  func.func @_norm_relu_kernel(%arg0: i32, %arg1: i32, %arg2: memref<2x64x128xbf16, #tpu.memory_space<vmem>>, %arg3: memref<1x2x2x128xf32, #tpu.memory_space<vmem>>, %arg4: memref<2x64x128xbf16, #tpu.memory_space<vmem>>) attributes {dimension_semantics = [#tpu.dimension_semantics<parallel>, #tpu.dimension_semantics<arbitrary>], iteration_bounds = array<i64: 1, 1>, scalar_prefetch = 0 : i64, scratch_operands = 0 : i64, tpu.core_type = #tpu.core_type<tc>, window_params = [{transform_indices = @transform_0, window_bounds = array<i64: 2, 64, 128>}, {transform_indices = @transform_1, window_bounds = array<i64: 1, 2, 2, 128>}, {transform_indices = @transform_2, window_bounds = array<i64: 2, 64, 128>}]} {
    %c0 = arith.constant 0 : index
    %c0_0 = arith.constant 0 : index
    %c0_1 = arith.constant 0 : index
    %0 = vector.load %arg2[%c0, %c0_0, %c0_1] : memref<2x64x128xbf16, #tpu.memory_space<vmem>>, vector<2x64x128xbf16>
    %1 = arith.extf %0 : vector<2x64x128xbf16> to vector<2x64x128xf32>
    %c0_2 = arith.constant 0 : index
    %c0_3 = arith.constant 0 : index
    %c0_4 = arith.constant 0 : index
    %c0_5 = arith.constant 0 : index
    %2 = vector.load %arg3[%c0_2, %c0_3, %c0_4, %c0_5] : memref<1x2x2x128xf32, #tpu.memory_space<vmem>>, vector<1x1x2x128xf32>
    %3 = vector.shape_cast %2 : vector<1x1x2x128xf32> to vector<2x128xf32>
    %cst = arith.constant 1.562500e-02 : f32
    %4 = vector.broadcast %cst : f32 to vector<2x128xf32>
    %5 = arith.mulf %3, %4 : vector<2x128xf32>
    %c0_6 = arith.constant 0 : index
    %c1 = arith.constant 1 : index
    %c0_7 = arith.constant 0 : index
    %c0_8 = arith.constant 0 : index
    %6 = vector.load %arg3[%c0_6, %c1, %c0_7, %c0_8] : memref<1x2x2x128xf32, #tpu.memory_space<vmem>>, vector<1x1x2x128xf32>
    %7 = vector.shape_cast %6 : vector<1x1x2x128xf32> to vector<2x128xf32>
    %cst_9 = arith.constant 1.562500e-02 : f32
    %8 = vector.broadcast %cst_9 : f32 to vector<2x128xf32>
    %9 = arith.mulf %7, %8 : vector<2x128xf32>
    %10 = arith.mulf %5, %5 : vector<2x128xf32>
    %11 = arith.subf %9, %10 : vector<2x128xf32>
    %cst_10 = arith.constant 0.000000e+00 : f32
    %12 = vector.broadcast %cst_10 : f32 to vector<2x128xf32>
    %13 = arith.maximumf %11, %12 : vector<2x128xf32>
    %cst_11 = arith.constant 9.99999974E-6 : f32
    %14 = vector.broadcast %cst_11 : f32 to vector<2x128xf32>
    %15 = arith.addf %13, %14 : vector<2x128xf32>
    %16 = math.rsqrt %15 : vector<2x128xf32>
    %cst_12 = arith.constant 0.000000e+00 : f32
    %17 = vector.broadcast %cst_12 : f32 to vector<2x128xf32>
    %18 = arith.subf %17, %5 : vector<2x128xf32>
    %19 = arith.mulf %18, %16 : vector<2x128xf32>
    %20 = vector.shape_cast %16 : vector<2x128xf32> to vector<2x1x128xf32>
    %21 = vector.broadcast %20 : vector<2x1x128xf32> to vector<2x64x128xf32>
    %22 = arith.mulf %1, %21 : vector<2x64x128xf32>
    %23 = vector.shape_cast %19 : vector<2x128xf32> to vector<2x1x128xf32>
    %24 = vector.broadcast %23 : vector<2x1x128xf32> to vector<2x64x128xf32>
    %25 = arith.addf %22, %24 : vector<2x64x128xf32>
    %cst_13 = arith.constant 0.000000e+00 : f32
    %26 = vector.broadcast %cst_13 : f32 to vector<2x64x128xf32>
    %27 = arith.maximumf %25, %26 : vector<2x64x128xf32>
    %28 = arith.truncf %27 : vector<2x64x128xf32> to vector<2x64x128xbf16>
    %c0_14 = arith.constant 0 : index
    %c0_15 = arith.constant 0 : index
    %c0_16 = arith.constant 0 : index
    %29 = vector.load %arg4[%c0_14, %c0_15, %c0_16] : memref<2x64x128xbf16, #tpu.memory_space<vmem>>, vector<2x64x128xbf16>
    tpu.vector_store %arg4[%c0_14, %c0_15, %c0_16], %28 {strides = array<i32>} : memref<2x64x128xbf16, #tpu.memory_space<vmem>>, vector<2x64x128xbf16>,
    return
  }
  func.func @transform_0(%arg0: i32, %arg1: i32) -> (i32, i32, i32) {
    %c0_i32 = arith.constant 0 : i32
    %c0_i32_0 = arith.constant 0 : i32
    return %arg0, %arg1, %c0_i32 : i32, i32, i32
  }
  func.func @transform_1(%arg0: i32, %arg1: i32) -> (i32, i32, i32, i32) {
    %c0_i32 = arith.constant 0 : i32
    %c0_i32_0 = arith.constant 0 : i32
    %c0_i32_1 = arith.constant 0 : i32
    %c0_i32_2 = arith.constant 0 : i32
    return %arg0, %c0_i32, %c0_i32_0, %c0_i32_1 : i32, i32, i32, i32
  }
  func.func @transform_2(%arg0: i32, %arg1: i32) -> (i32, i32, i32) {
    %c0_i32 = arith.constant 0 : i32
    %c0_i32_0 = arith.constant 0 : i32
    return %arg0, %arg1, %c0_i32 : i32, i32, i32
  }
}

module attributes {stable_mosaic.version = 11 : i64} {
  func.func @_conv_stats_kernel(%arg0: i32, %arg1: i32, %arg2: memref<2x16x1152xbf16, #tpu.memory_space<vmem>>, %arg3: memref<1152x256xbf16, #tpu.memory_space<vmem>>, %arg4: memref<2x16x256xbf16, #tpu.memory_space<vmem>>, %arg5: memref<1x2x2x256xf32, #tpu.memory_space<vmem>>) attributes {dimension_semantics = [#tpu.dimension_semantics<parallel>, #tpu.dimension_semantics<arbitrary>], iteration_bounds = array<i64: 1, 1>, scalar_prefetch = 0 : i64, scratch_operands = 0 : i64, tpu.core_type = #tpu.core_type<tc>, window_params = [{transform_indices = @transform_0, window_bounds = array<i64: 2, 16, 1152>}, {pipeline_mode = #tpu.pipeline_mode<synchronous>, transform_indices = @transform_1, window_bounds = array<i64: 1152, 256>}, {transform_indices = @transform_2, window_bounds = array<i64: 2, 16, 256>}, {transform_indices = @transform_3, window_bounds = array<i64: 1, 2, 2, 256>}]} {
    %c0 = arith.constant 0 : index
    %c0_0 = arith.constant 0 : index
    %c0_1 = arith.constant 0 : index
    %0 = vector.load %arg2[%c0, %c0_0, %c0_1] : memref<2x16x1152xbf16, #tpu.memory_space<vmem>>, vector<2x16x1152xbf16>
    %1 = vector.shape_cast %0 : vector<2x16x1152xbf16> to vector<32x1152xbf16>
    %c0_2 = arith.constant 0 : index
    %c0_3 = arith.constant 0 : index
    %2 = vector.load %arg3[%c0_2, %c0_3] : memref<1152x256xbf16, #tpu.memory_space<vmem>>, vector<1152x256xbf16>
    %cst = arith.constant dense<0.000000e+00> : vector<32x256xf32>
    %3 = tpu.matmul %1, %2, %cst {dimension_numbers = #tpu.dot_dimension_numbers<[1], [0], [0], [1], [0, 0, 1, 1], [], []>} : vector<32x1152xbf16>, vector<1152x256xbf16>, vector<32x256xf32> -> vector<32x256xf32>
    %4 = vector.shape_cast %3 : vector<32x256xf32> to vector<2x16x256xf32>
    %5 = arith.truncf %4 : vector<2x16x256xf32> to vector<2x16x256xbf16>
    %c0_4 = arith.constant 0 : index
    %c0_5 = arith.constant 0 : index
    %c0_6 = arith.constant 0 : index
    %6 = vector.load %arg4[%c0_4, %c0_5, %c0_6] : memref<2x16x256xbf16, #tpu.memory_space<vmem>>, vector<2x16x256xbf16>
    tpu.vector_store %arg4[%c0_4, %c0_5, %c0_6], %5 {strides = array<i32>} : memref<2x16x256xbf16, #tpu.memory_space<vmem>>, vector<2x16x256xbf16>,
    %c0_i32 = arith.constant 0 : i32
    %7 = arith.cmpi eq, %arg1, %c0_i32 : i32
    %8 = arith.extui %7 : i1 to i32
    %c0_i32_7 = arith.constant 0 : i32
    %9 = arith.cmpi ne, %8, %c0_i32_7 : i32
    scf.if %9 {
      %cst_25 = arith.constant 0.000000e+00 : f32
      %25 = vector.broadcast %cst_25 : f32 to vector<1x2x2x256xf32>
      %c0_26 = arith.constant 0 : index
      %c0_27 = arith.constant 0 : index
      %c0_28 = arith.constant 0 : index
      %c0_29 = arith.constant 0 : index
      %26 = vector.load %arg5[%c0_26, %c0_27, %c0_28, %c0_29] : memref<1x2x2x256xf32, #tpu.memory_space<vmem>>, vector<1x2x2x256xf32>
      tpu.vector_store %arg5[%c0_26, %c0_27, %c0_28, %c0_29], %25 {strides = array<i32>} : memref<1x2x2x256xf32, #tpu.memory_space<vmem>>, vector<1x2x2x256xf32>,
    } else {
    }
    %c0_8 = arith.constant 0 : index
    %c0_9 = arith.constant 0 : index
    %c0_10 = arith.constant 0 : index
    %c0_11 = arith.constant 0 : index
    %10 = vector.load %arg5[%c0_8, %c0_9, %c0_10, %c0_11] : memref<1x2x2x256xf32, #tpu.memory_space<vmem>>, vector<1x1x2x256xf32>
    %11 = vector.shape_cast %10 : vector<1x1x2x256xf32> to vector<2x256xf32>
    %cst_12 = arith.constant dense<0.000000e+00> : vector<2x256xf32>
    %12 = vector.multi_reduction <add>, %4, %cst_12 [1] : vector<2x16x256xf32> to vector<2x256xf32>
    %13 = arith.addf %11, %12 : vector<2x256xf32>
    %c0_13 = arith.constant 0 : index
    %c0_14 = arith.constant 0 : index
    %c0_15 = arith.constant 0 : index
    %c0_16 = arith.constant 0 : index
    %14 = vector.load %arg5[%c0_13, %c0_14, %c0_15, %c0_16] : memref<1x2x2x256xf32, #tpu.memory_space<vmem>>, vector<1x1x2x256xf32>
    %15 = vector.shape_cast %14 : vector<1x1x2x256xf32> to vector<2x256xf32>
    %16 = vector.shape_cast %13 : vector<2x256xf32> to vector<1x1x2x256xf32>
    tpu.vector_store %arg5[%c0_13, %c0_14, %c0_15, %c0_16], %16 {strides = array<i32>} : memref<1x2x2x256xf32, #tpu.memory_space<vmem>>, vector<1x1x2x256xf32>,
    %c0_17 = arith.constant 0 : index
    %c1 = arith.constant 1 : index
    %c0_18 = arith.constant 0 : index
    %c0_19 = arith.constant 0 : index
    %17 = vector.load %arg5[%c0_17, %c1, %c0_18, %c0_19] : memref<1x2x2x256xf32, #tpu.memory_space<vmem>>, vector<1x1x2x256xf32>
    %18 = vector.shape_cast %17 : vector<1x1x2x256xf32> to vector<2x256xf32>
    %19 = arith.mulf %4, %4 : vector<2x16x256xf32>
    %cst_20 = arith.constant dense<0.000000e+00> : vector<2x256xf32>
    %20 = vector.multi_reduction <add>, %19, %cst_20 [1] : vector<2x16x256xf32> to vector<2x256xf32>
    %21 = arith.addf %18, %20 : vector<2x256xf32>
    %c0_21 = arith.constant 0 : index
    %c1_22 = arith.constant 1 : index
    %c0_23 = arith.constant 0 : index
    %c0_24 = arith.constant 0 : index
    %22 = vector.load %arg5[%c0_21, %c1_22, %c0_23, %c0_24] : memref<1x2x2x256xf32, #tpu.memory_space<vmem>>, vector<1x1x2x256xf32>
    %23 = vector.shape_cast %22 : vector<1x1x2x256xf32> to vector<2x256xf32>
    %24 = vector.shape_cast %21 : vector<2x256xf32> to vector<1x1x2x256xf32>
    tpu.vector_store %arg5[%c0_21, %c1_22, %c0_23, %c0_24], %24 {strides = array<i32>} : memref<1x2x2x256xf32, #tpu.memory_space<vmem>>, vector<1x1x2x256xf32>,
    return
  }
  func.func @transform_0(%arg0: i32, %arg1: i32) -> (i32, i32, i32) {
    %c0_i32 = arith.constant 0 : i32
    %c0_i32_0 = arith.constant 0 : i32
    return %arg0, %arg1, %c0_i32 : i32, i32, i32
  }
  func.func @transform_1(%arg0: i32, %arg1: i32) -> (i32, i32) {
    %c0_i32 = arith.constant 0 : i32
    %c0_i32_0 = arith.constant 0 : i32
    %c0_i32_1 = arith.constant 0 : i32
    return %c0_i32, %c0_i32_0 : i32, i32
  }
  func.func @transform_2(%arg0: i32, %arg1: i32) -> (i32, i32, i32) {
    %c0_i32 = arith.constant 0 : i32
    %c0_i32_0 = arith.constant 0 : i32
    return %arg0, %arg1, %c0_i32 : i32, i32, i32
  }
  func.func @transform_3(%arg0: i32, %arg1: i32) -> (i32, i32, i32, i32) {
    %c0_i32 = arith.constant 0 : i32
    %c0_i32_0 = arith.constant 0 : i32
    %c0_i32_1 = arith.constant 0 : i32
    %c0_i32_2 = arith.constant 0 : i32
    return %arg0, %c0_i32, %c0_i32_0, %c0_i32_1 : i32, i32, i32, i32
  }
}

module attributes {stable_mosaic.version = 11 : i64} {
  func.func @_norm_relu_kernel(%arg0: i32, %arg1: i32, %arg2: memref<2x16x256xbf16, #tpu.memory_space<vmem>>, %arg3: memref<1x2x2x256xf32, #tpu.memory_space<vmem>>, %arg4: memref<2x16x256xf32, #tpu.memory_space<vmem>>) attributes {dimension_semantics = [#tpu.dimension_semantics<parallel>, #tpu.dimension_semantics<arbitrary>], iteration_bounds = array<i64: 1, 1>, scalar_prefetch = 0 : i64, scratch_operands = 0 : i64, tpu.core_type = #tpu.core_type<tc>, window_params = [{transform_indices = @transform_0, window_bounds = array<i64: 2, 16, 256>}, {transform_indices = @transform_1, window_bounds = array<i64: 1, 2, 2, 256>}, {transform_indices = @transform_2, window_bounds = array<i64: 2, 16, 256>}]} {
    %c0 = arith.constant 0 : index
    %c0_0 = arith.constant 0 : index
    %c0_1 = arith.constant 0 : index
    %0 = vector.load %arg2[%c0, %c0_0, %c0_1] : memref<2x16x256xbf16, #tpu.memory_space<vmem>>, vector<2x16x256xbf16>
    %1 = arith.extf %0 : vector<2x16x256xbf16> to vector<2x16x256xf32>
    %c0_2 = arith.constant 0 : index
    %c0_3 = arith.constant 0 : index
    %c0_4 = arith.constant 0 : index
    %c0_5 = arith.constant 0 : index
    %2 = vector.load %arg3[%c0_2, %c0_3, %c0_4, %c0_5] : memref<1x2x2x256xf32, #tpu.memory_space<vmem>>, vector<1x1x2x256xf32>
    %3 = vector.shape_cast %2 : vector<1x1x2x256xf32> to vector<2x256xf32>
    %cst = arith.constant 6.250000e-02 : f32
    %4 = vector.broadcast %cst : f32 to vector<2x256xf32>
    %5 = arith.mulf %3, %4 : vector<2x256xf32>
    %c0_6 = arith.constant 0 : index
    %c1 = arith.constant 1 : index
    %c0_7 = arith.constant 0 : index
    %c0_8 = arith.constant 0 : index
    %6 = vector.load %arg3[%c0_6, %c1, %c0_7, %c0_8] : memref<1x2x2x256xf32, #tpu.memory_space<vmem>>, vector<1x1x2x256xf32>
    %7 = vector.shape_cast %6 : vector<1x1x2x256xf32> to vector<2x256xf32>
    %cst_9 = arith.constant 6.250000e-02 : f32
    %8 = vector.broadcast %cst_9 : f32 to vector<2x256xf32>
    %9 = arith.mulf %7, %8 : vector<2x256xf32>
    %10 = arith.mulf %5, %5 : vector<2x256xf32>
    %11 = arith.subf %9, %10 : vector<2x256xf32>
    %cst_10 = arith.constant 0.000000e+00 : f32
    %12 = vector.broadcast %cst_10 : f32 to vector<2x256xf32>
    %13 = arith.maximumf %11, %12 : vector<2x256xf32>
    %cst_11 = arith.constant 9.99999974E-6 : f32
    %14 = vector.broadcast %cst_11 : f32 to vector<2x256xf32>
    %15 = arith.addf %13, %14 : vector<2x256xf32>
    %16 = math.rsqrt %15 : vector<2x256xf32>
    %cst_12 = arith.constant 0.000000e+00 : f32
    %17 = vector.broadcast %cst_12 : f32 to vector<2x256xf32>
    %18 = arith.subf %17, %5 : vector<2x256xf32>
    %19 = arith.mulf %18, %16 : vector<2x256xf32>
    %20 = vector.shape_cast %16 : vector<2x256xf32> to vector<2x1x256xf32>
    %21 = vector.broadcast %20 : vector<2x1x256xf32> to vector<2x16x256xf32>
    %22 = arith.mulf %1, %21 : vector<2x16x256xf32>
    %23 = vector.shape_cast %19 : vector<2x256xf32> to vector<2x1x256xf32>
    %24 = vector.broadcast %23 : vector<2x1x256xf32> to vector<2x16x256xf32>
    %25 = arith.addf %22, %24 : vector<2x16x256xf32>
    %cst_13 = arith.constant 0.000000e+00 : f32
    %26 = vector.broadcast %cst_13 : f32 to vector<2x16x256xf32>
    %27 = arith.maximumf %25, %26 : vector<2x16x256xf32>
    %c0_14 = arith.constant 0 : index
    %c0_15 = arith.constant 0 : index
    %c0_16 = arith.constant 0 : index
    %28 = vector.load %arg4[%c0_14, %c0_15, %c0_16] : memref<2x16x256xf32, #tpu.memory_space<vmem>>, vector<2x16x256xf32>
    tpu.vector_store %arg4[%c0_14, %c0_15, %c0_16], %27 {strides = array<i32>} : memref<2x16x256xf32, #tpu.memory_space<vmem>>, vector<2x16x256xf32>,
    return
  }
  func.func @transform_0(%arg0: i32, %arg1: i32) -> (i32, i32, i32) {
    %c0_i32 = arith.constant 0 : i32
    %c0_i32_0 = arith.constant 0 : i32
    return %arg0, %arg1, %c0_i32 : i32, i32, i32
  }
  func.func @transform_1(%arg0: i32, %arg1: i32) -> (i32, i32, i32, i32) {
    %c0_i32 = arith.constant 0 : i32
    %c0_i32_0 = arith.constant 0 : i32
    %c0_i32_1 = arith.constant 0 : i32
    %c0_i32_2 = arith.constant 0 : i32
    return %arg0, %c0_i32, %c0_i32_0, %c0_i32_1 : i32, i32, i32, i32
  }
  func.func @transform_2(%arg0: i32, %arg1: i32) -> (i32, i32, i32) {
    %c0_i32 = arith.constant 0 : i32
    %c0_i32_0 = arith.constant 0 : i32
    return %arg0, %arg1, %c0_i32 : i32, i32, i32
  }
}

</mosaic_0001>

<bundles_post_ra>
// kernel: g_downsample.7
= control target key start
LH: loop header
LB: loop body
LE: loop exit
PB: predicated region body
PF: predicated region fallthrough
CT: control target
= control target key end

     0   :  { %v1215_v4 = vmov 1966171168   ;;  %v155_v6 = vlaneseq  ;;  %s1853_s1 = inlined_call_operand.vmem [shape: f32[1,2,2,128], index: 1, kind: input, shape index: {}]   ;;  %s1854_s0 = inlined_call_operand.vmem [shape: bf16[2,256,128], index: 0, kind: input, shape index: {}]   ;;  %s1855_s2 = inlined_call_operand.vmem [shape: bf16[2,256,128], index: 2, kind: output, shape index: {}]  }
   0x1   :  { %v139_v0 = vld [vmem:[%s1853_s1] sm:$0x3]  ;;  %v733_v1 = vld [vmem:[%s1853_s1 + $0x2] sm:$0x3]  ;;  %v153_v5 = vunpack.c.l.s4 %v1215_v4  ;;  %v1249_v12 = vld [vmem:[%s1854_s0 + $0x8] sm:$0xff]  }
   0x2   :  { %v1237_v2 = vmul.f32 0.00390625, %v139_v0  ;;  %v143_v3 = vmul.f32 0.00390625, %v733_v1  ;;  %v1244_v8 = vld [vmem:[%s1854_s0] sm:$0xff]   ;;  %v156_v11 = vshrl.u32 %v155_v6, 7  ;;  %v1254_v14 = vld [vmem:[%s1854_s0 + $0x10] sm:$0xff]   ;;  %v1261_v17 = vld [vmem:[%s1854_s0 + $0x18] sm:$0xff]   ;;  %v868_v21 = vunpack.c.l.bf16 %v1249_v12 }
   0x3   :  { %v154_v10 = vunpack.c.0.s8 %v153_v5  ;;  %v864_v15 = vunpack.c.l.bf16 %v1244_v8  ;;  %v865_v16 = vunpack.c.h.bf16 %v1244_v8  ;;  %v1266_v18 = vld [vmem:[%s1854_s0 + $0x20] sm:$0xff]   ;;  %v869_v22 = vunpack.c.h.bf16 %v1249_v12  ;;  %v1274_v23 = vld [vmem:[%s1854_s0 + $0x28] sm:$0xff]   ;;  %v1279_v24 = vld [vmem:[%s1854_s0 + $0x30] sm:$0xff]  }
   0x4   :  { %v144_v7 = vmul.f32 %v1237_v2, %v1237_v2  ;;  %v149_v20 = vsub.f32 0.0, %v1237_v2  ;;  %v1283_v26 = vsub.s32 0, %v156_v11  ;;  %v872_v27 = vunpack.c.l.bf16 %v1254_v14  ;;  %v1290_v29 = vld [vmem:[%s1854_s0 + $0x38] sm:$0xff]   ;;  %v1295_v30 = vld [vmem:[%s1854_s0 + $0x40] sm:$0xff]   ;;  %v1303_v34 = vld [vmem:[%s1854_s0 + $0x48] sm:$0xff]  }
   0x5   :  { %v1281_v25 = vsub.s32 %v154_v10, %v156_v11  ;;  %v873_v28 = vunpack.c.h.bf16 %v1254_v14  ;;  %v876_v31 = vunpack.c.l.bf16 %v1261_v17  ;;  %v877_v32 = vunpack.c.h.bf16 %v1261_v17  ;;  %v1308_v35 = vld [vmem:[%s1854_s0 + $0x50] sm:$0xff]   ;;  %v1317_v40 = vld [vmem:[%s1854_s0 + $0x58] sm:$0xff]   ;;  %v1322_v41 = vld [vmem:[%s1854_s0 + $0x60] sm:$0xff]  }
   0x6   :  { %v145_v9 = vsub.f32 %v143_v3, %v144_v7  ;;  %v880_v33 = vunpack.c.l.bf16 %v1266_v18  ;;  %v881_v36 = vunpack.c.h.bf16 %v1266_v18  ;;  %v884_v37 = vunpack.c.l.bf16 %v1274_v23  ;;  %v1331_v46 = vld [vmem:[%s1854_s0 + $0x68] sm:$0xff]   ;;  %v1336_v47 = vld [vmem:[%s1854_s0 + $0x70] sm:$0xff]   ;;  %v1345_v52 = vld [vmem:[%s1854_s0 + $0x78] sm:$0xff]  }
   0x7   :  { %v885_v38 = vunpack.c.h.bf16 %v1274_v23  ;;  %v888_v39 = vunpack.c.l.bf16 %v1279_v24  ;;  %v889_v42 = vunpack.c.h.bf16 %v1279_v24  ;;  %v892_v43 = vunpack.c.l.bf16 %v1290_v29  ;;  %v1350_v53 = vld [vmem:[%s1854_s0 + $0x80] sm:$0xff]   ;;  %v1359_v58 = vld [vmem:[%s1854_s0 + $0x88] sm:$0xff]   ;;  %v1364_v59 = vld [vmem:[%s1854_s0 + $0x90] sm:$0xff]  }
   0x8   :  { %v146_v13 = vmax.f32 %v145_v9, 0.0  ;;  %v1373_v0 = vld [vmem:[%s1854_s0 + $0x98] sm:$0xff]   ;;  %v1378_v1 = vld [vmem:[%s1854_s0 + $0xa0] sm:$0xff]   ;;  %v1387_v7 = vld [vmem:[%s1854_s0 + $0xa8] sm:$0xff]  }
   0x9   :  { %v1392_v9 = vld [vmem:[%s1854_s0 + $0xb0] sm:$0xff]   ;;  %v1401_v6 = vld [vmem:[%s1854_s0 + $0xb8] sm:$0xff]   ;;  %v1406_v5 = vld [vmem:[%s1854_s0 + $0xc0] sm:$0xff]  }
   0xa   :  { %v147_v19 = vadd.f32 1e-05, %v146_v13  ;;  %v1424_v10 = vld [vmem:[%s1854_s0 + $0xd0] sm:$0xff]   ;;  %v1429_v13 = vld [vmem:[%s1854_s0 + $0xd8] sm:$0xff]   ;;  %v1443_v55 = vld [vmem:[%s1854_s0 + $0xe0] sm:$0xff]  }
   0xb   :  { %v1448_v63 = vld [vmem:[%s1854_s0 + $0xe8] sm:$0xff]   ;;  %v1457_v56 = vld [vmem:[%s1854_s0 + $0xf0] sm:$0xff]   ;;  %v1467_v2 = vld [vmem:[%s1854_s0 + $0xf8] sm:$0xff]  }
   0xc   :  { %1213 = vrsqrt.f32 %v147_v19  ;;  %v1415_v19 = vld [vmem:[%s1854_s0 + $0xc8] sm:$0xff]  }
  0x16   :  { %v1214_v11 = vpop.eup %1213 }
  0x17   :  { %v150_v61 = vmul.f32 %v1214_v11, %v149_v20  ;;  %v158_v60 = vrot.slane %v1214_v11, %v1281_v25 }
  0x19   :  { %v166_v57 = vrot.slane %v158_v60, %v1281_v25  ;;  %v1461_v3 = vrot.slane %v150_v61, %v1281_v25  ;;  %v159_v4 = vcombine.high %v158_v60, %v158_v60 }
  0x1b   :  { %v1474_v50 = vrot.slane %v166_v57, %v1283_v26  ;;  %v263_v60 = vrot.slane %v1461_v3, %v1281_v25  ;;  %v1481_v49 = vrot.slane %v159_v4, %v1281_v25 }
  0x1d   :  { %v184_v57 = vmul.f32 %v864_v15, %v1474_v50  ;;  %v185_v61 = vmul.f32 %v865_v16, %v1474_v50  ;;  %v1494_v54 = vrot.slane %v263_v60, %v1283_v26  ;;  %v186_v4 = vmul.f32 %v868_v21, %v1474_v50 }
  0x1e   :  { %v187_v62 = vmul.f32 %v869_v22, %v1474_v50  ;;  %v188_v51 = vmul.f32 %v872_v27, %v1474_v50  ;;  %v189_v8 = vmul.f32 %v873_v28, %v1474_v50  ;;  %v190_v15 = vmul.f32 %v876_v31, %v1474_v50 }
  0x1f   :  { %v281_v16 = vadd.f32 %v1494_v54, %v184_v57  ;;  %v282_v21 = vadd.f32 %v1494_v54, %v185_v61  ;;  %v283_v60 = vadd.f32 %v1494_v54, %v186_v4  ;;  %v191_v12 = vmul.f32 %v877_v32, %v1474_v50 }
  0x20   :  { %v284_v22 = vadd.f32 %v1494_v54, %v187_v62  ;;  %v285_v27 = vadd.f32 %v1494_v54, %v188_v51  ;;  %v286_v14 = vadd.f32 %v1494_v54, %v189_v8  ;;  %v287_v28 = vadd.f32 %v1494_v54, %v190_v15 }
  0x21   :  { %v345_v11 = vmax.f32 %v281_v16, 0.0  ;;  %v346_v31 = vmax.f32 %v282_v21, 0.0  ;;  %v347_v20 = vmax.f32 %v283_v60, 0.0  ;;  %v288_v57 = vadd.f32 %v1494_v54, %v191_v12 }
  0x22   :  { %v348_v61 = vmax.f32 %v284_v22, 0.0  ;;  %v349_v48 = vmax.f32 %v285_v27, 0.0  ;;  %v350_v4 = vmax.f32 %v286_v14, 0.0  ;;  %v351_v45 = vmax.f32 %v287_v28, 0.0 }
  0x23   :  { %v993_v44 = vpack.c.bf16 %v346_v31, %v345_v11  ;;  %v352_v17 = vmax.f32 %v288_v57, 0.0  ;;  %v192_v32 = vmul.f32 %v880_v33, %v1474_v50  ;;  %v193_v51 = vmul.f32 %v881_v36, %v1474_v50 }
  0x24   :  { %v998_v62 = vpack.c.bf16 %v348_v61, %v347_v20  ;;  %v1003_v8 = vpack.c.bf16 %v350_v4, %v349_v48  ;;  %v194_v15 = vmul.f32 %v884_v37, %v1474_v50  ;;  %v195_v16 = vmul.f32 %v885_v38, %v1474_v50 }
  0x25   :  { %994 = vst [vmem:[%s1855_s2] sm:$0xff] %v993_v44   ;;  %v1008_v11 = vpack.c.bf16 %v352_v17, %v351_v45  ;;  %v289_v33 = vadd.f32 %v1494_v54, %v192_v32  ;;  %v290_v18 = vadd.f32 %v1494_v54, %v193_v51  ;;  %v196_v36 = vmul.f32 %v888_v39, %v1474_v50 }
  0x26   :  { %1181 = vst [vmem:[%s1855_s2 + $0x8] sm:$0xff] %v998_v62   ;;  %1182 = vst [vmem:[%s1855_s2 + $0x10] sm:$0xff] %v1003_v8   ;;  %v291_v23 = vadd.f32 %v1494_v54, %v194_v15  ;;  %v292_v37 = vadd.f32 %v1494_v54, %v195_v16  ;;  %v197_v38 = vmul.f32 %v889_v42, %v1474_v50  ;;  %v1856_v20 = vunpack.c.h.bf16 %v1290_v29 }
  0x27   :  { %v198_v39 = vmul.f32 %v892_v43, %v1474_v50  ;;  %1183 = vst [vmem:[%s1855_s2 + $0x18] sm:$0xff] %v1008_v11   ;;  %v353_v44 = vmax.f32 %v289_v33, 0.0  ;;  %v354_v45 = vmax.f32 %v290_v18, 0.0  ;;  %v293_v48 = vadd.f32 %v1494_v54, %v196_v36 }
  0x28   :  { %v199_v21 = vmul.f32 %v1856_v20, %v1474_v50  ;;  %v355_v60 = vmax.f32 %v291_v23, 0.0  ;;  %v356_v12 = vmax.f32 %v292_v37, 0.0  ;;  %v294_v24 = vadd.f32 %v1494_v54, %v197_v38 }
  0x29   :  { %v295_v42 = vadd.f32 %v1494_v54, %v198_v39  ;;  %v1013_v22 = vpack.c.bf16 %v354_v45, %v353_v44  ;;  %v357_v43 = vmax.f32 %v293_v48, 0.0  ;;  %v1857_v14 = vunpack.c.l.bf16 %v1295_v30 }
  0x2a   :  { %v296_v27 = vadd.f32 %v1494_v54, %v199_v21  ;;  %v1018_v31 = vpack.c.bf16 %v356_v12, %v355_v60  ;;  %v358_v57 = vmax.f32 %v294_v24, 0.0  ;;  %v1858_v29 = vunpack.c.h.bf16 %v1295_v30 }
  0x2b   :  { %v200_v28 = vmul.f32 %v1857_v14, %v1474_v50  ;;  %v359_v61 = vmax.f32 %v295_v42, 0.0  ;;  %1184 = vst [vmem:[%s1855_s2 + $0x20] sm:$0xff] %v1013_v22   ;;  %v1859_v51 = vunpack.c.l.bf16 %v1303_v34  ;;  %v1860_v8 = vunpack.c.h.bf16 %v1303_v34 }
  0x2c   :  { %v201_v4 = vmul.f32 %v1858_v29, %v1474_v50  ;;  %v360_v17 = vmax.f32 %v296_v27, 0.0  ;;  %1185 = vst [vmem:[%s1855_s2 + $0x28] sm:$0xff] %v1018_v31   ;;  %v1023_v30 = vpack.c.bf16 %v358_v57, %v357_v43  ;;  %v1861_v11 = vunpack.c.l.bf16 %v1308_v35 }
  0x2d   :  { %v297_v32 = vadd.f32 %v1494_v54, %v200_v28  ;;  %v202_v62 = vmul.f32 %v1859_v51, %v1474_v50  ;;  %v203_v15 = vmul.f32 %v1860_v8, %v1474_v50  ;;  %v1862_v18 = vunpack.c.h.bf16 %v1308_v35 }
  0x2e   :  { %v298_v16 = vadd.f32 %v1494_v54, %v201_v4  ;;  %v204_v33 = vmul.f32 %v1861_v11, %v1474_v50  ;;  %v1028_v23 = vpack.c.bf16 %v360_v17, %v359_v61  ;;  %1186 = vst [vmem:[%s1855_s2 + $0x30] sm:$0xff] %v1023_v30   ;;  %v1863_v48 = vunpack.c.l.bf16 %v1317_v40 }
  0x2f   :  { %v205_v36 = vmul.f32 %v1862_v18, %v1474_v50  ;;  %v361_v37 = vmax.f32 %v297_v32, 0.0  ;;  %v299_v34 = vadd.f32 %v1494_v54, %v202_v62  ;;  %v300_v38 = vadd.f32 %v1494_v54, %v203_v15 }
  0x30   :  { %v362_v39 = vmax.f32 %v298_v16, 0.0  ;;  %v301_v44 = vadd.f32 %v1494_v54, %v204_v33  ;;  %v206_v35 = vmul.f32 %v1863_v48, %v1474_v50  ;;  %1187 = vst [vmem:[%s1855_s2 + $0x38] sm:$0xff] %v1028_v23   ;;  %v1864_v60 = vunpack.c.h.bf16 %v1317_v40 }
  0x31   :  { %v302_v45 = vadd.f32 %v1494_v54, %v205_v36  ;;  %v363_v20 = vmax.f32 %v299_v34, 0.0  ;;  %v364_v21 = vmax.f32 %v300_v38, 0.0  ;;  %v1865_v24 = vunpack.c.l.bf16 %v1322_v41 }
  0x32   :  { %v207_v12 = vmul.f32 %v1864_v60, %v1474_v50  ;;  %v1033_v22 = vpack.c.bf16 %v362_v39, %v361_v37  ;;  %v365_v43 = vmax.f32 %v301_v44, 0.0  ;;  %v303_v14 = vadd.f32 %v1494_v54, %v206_v35 }
  0x33   :  { %v208_v42 = vmul.f32 %v1865_v24, %v1474_v50  ;;  %v366_v27 = vmax.f32 %v302_v45, 0.0  ;;  %v1038_v28 = vpack.c.bf16 %v364_v21, %v363_v20  ;;  %v1866_v57 = vunpack.c.h.bf16 %v1322_v41 }
  0x34   :  { %v304_v31 = vadd.f32 %v1494_v54, %v207_v12  ;;  %1188 = vst [vmem:[%s1855_s2 + $0x40] sm:$0xff] %v1033_v22   ;;  %v367_v4 = vmax.f32 %v303_v14, 0.0  ;;  %v1867_v17 = vunpack.c.l.bf16 %v1331_v46  ;;  %v1868_v51 = vunpack.c.h.bf16 %v1331_v46 }
  0x35   :  { %v209_v61 = vmul.f32 %v1866_v57, %v1474_v50  ;;  %v305_v29 = vadd.f32 %v1494_v54, %v208_v42  ;;  %v1043_v40 = vpack.c.bf16 %v366_v27, %v365_v43  ;;  %1189 = vst [vmem:[%s1855_s2 + $0x48] sm:$0xff] %v1038_v28   ;;  %v1869_v30 = vunpack.c.l.bf16 %v1336_v47 }
  0x36   :  { %v210_v32 = vmul.f32 %v1867_v17, %v1474_v50  ;;  %v211_v62 = vmul.f32 %v1868_v51, %v1474_v50  ;;  %v368_v41 = vmax.f32 %v304_v31, 0.0  ;;  %v1870_v33 = vunpack.c.h.bf16 %v1336_v47 }
  0x37   :  { %v306_v8 = vadd.f32 %v1494_v54, %v209_v61  ;;  %v369_v15 = vmax.f32 %v305_v29, 0.0  ;;  %v212_v16 = vmul.f32 %v1869_v30, %v1474_v50  ;;  %1190 = vst [vmem:[%s1855_s2 + $0x50] sm:$0xff] %v1043_v40   ;;  %v1871_v36 = vunpack.c.l.bf16 %v1345_v52 }
  0x38   :  { %v307_v11 = vadd.f32 %v1494_v54, %v210_v32  ;;  %v308_v46 = vadd.f32 %v1494_v54, %v211_v62  ;;  %v213_v18 = vmul.f32 %v1870_v33, %v1474_v50  ;;  %v1048_v37 = vpack.c.bf16 %v368_v41, %v367_v4 }
  0x39   :  { %v214_v23 = vmul.f32 %v1871_v36, %v1474_v50  ;;  %v370_v34 = vmax.f32 %v306_v8, 0.0  ;;  %v309_v38 = vadd.f32 %v1494_v54, %v212_v16  ;;  %v1872_v39 = vunpack.c.h.bf16 %v1345_v52 }
  0x3a   :  { %v371_v45 = vmax.f32 %v307_v11, 0.0  ;;  %v372_v48 = vmax.f32 %v308_v46, 0.0  ;;  %v310_v35 = vadd.f32 %v1494_v54, %v213_v18  ;;  %1191 = vst [vmem:[%s1855_s2 + $0x58] sm:$0xff] %v1048_v37   ;;  %v1656_v12 = vrot.slane %v1481_v49, %v1283_v26 }
  0x3b   :  { %v215_v44 = vmul.f32 %v1872_v39, %v1474_v50  ;;  %v311_v20 = vadd.f32 %v1494_v54, %v214_v23  ;;  %v1053_v47 = vpack.c.bf16 %v370_v34, %v369_v15  ;;  %v373_v21 = vmax.f32 %v309_v38, 0.0 }
  0x3c   :  { %v1058_v52 = vpack.c.bf16 %v372_v48, %v371_v45  ;;  %v374_v50 = vmax.f32 %v310_v35, 0.0  ;;  %v1873_v42 = vcombine.high %v1461_v3, %v1461_v3  ;;  %v1875_v49 = vunpack.c.h.bf16 %v1350_v53 }
  0x3d   :  { %v312_v60 = vadd.f32 %v1494_v54, %v215_v44  ;;  %v375_v24 = vmax.f32 %v311_v20, 0.0  ;;  %1192 = vst [vmem:[%s1855_s2 + $0x60] sm:$0xff] %v1053_v47   ;;  %v1874_v54 = vunpack.c.l.bf16 %v1350_v53  ;;  %v1876_v28 = vunpack.c.l.bf16 %v1359_v58 }
  0x3e   :  { %v270_v22 = vrot.slane %v1873_v42, %v1281_v25  ;;  %v217_v14 = vmul.f32 %v1875_v49, %v1656_v12  ;;  %1193 = vst [vmem:[%s1855_s2 + $0x68] sm:$0xff] %v1058_v52   ;;  %v1063_v25 = vpack.c.bf16 %v374_v50, %v373_v21  ;;  %v1877_v57 = vunpack.c.h.bf16 %v1359_v58 }
  0x3f   :  { %v376_v43 = vmax.f32 %v312_v60, 0.0  ;;  %v216_v27 = vmul.f32 %v1874_v54, %v1656_v12  ;;  %v218_v31 = vmul.f32 %v1876_v28, %v1656_v12  ;;  %v1878_v53 = vunpack.c.l.bf16 %v1364_v59 }
  0x40   :  { %v1678_v3 = vrot.slane %v270_v22, %v1283_v26  ;;  %v219_v61 = vmul.f32 %v1877_v57, %v1656_v12  ;;  %v1879_v4 = vunpack.c.h.bf16 %v1364_v59  ;;  %v1880_v32 = vunpack.c.l.bf16 %v1373_v0  ;;  %1194 = vst [vmem:[%s1855_s2 + $0x70] sm:$0xff] %v1063_v25  }
  0x41   :  { %v220_v29 = vmul.f32 %v1878_v53, %v1656_v12  ;;  %v1068_v40 = vpack.c.bf16 %v376_v43, %v375_v24  ;;  %v1881_v26 = vunpack.c.h.bf16 %v1373_v0  ;;  %v1882_v44 = vunpack.c.l.bf16 %v1378_v1 }
  0x42   :  { %v221_v17 = vmul.f32 %v1879_v4, %v1656_v12  ;;  %v222_v51 = vmul.f32 %v1880_v32, %v1656_v12  ;;  %v313_v58 = vadd.f32 %v1678_v3, %v216_v27  ;;  %v314_v41 = vadd.f32 %v1678_v3, %v217_v14 }
  0x43   :  { %v223_v62 = vmul.f32 %v1881_v26, %v1656_v12  ;;  %v315_v8 = vadd.f32 %v1678_v3, %v218_v31  ;;  %v316_v59 = vadd.f32 %v1678_v3, %v219_v61  ;;  %1195 = vst [vmem:[%s1855_s2 + $0x78] sm:$0xff] %v1068_v40   ;;  %v317_v15 = vadd.f32 %v1678_v3, %v220_v29 }
  0x44   :  { %v318_v0 = vadd.f32 %v1678_v3, %v221_v17  ;;  %v319_v30 = vadd.f32 %v1678_v3, %v222_v51  ;;  %v377_v11 = vmax.f32 %v313_v58, 0.0  ;;  %v378_v46 = vmax.f32 %v314_v41, 0.0 }
  0x45   :  { %v320_v16 = vadd.f32 %v1678_v3, %v223_v62  ;;  %v379_v33 = vmax.f32 %v315_v8, 0.0  ;;  %v380_v18 = vmax.f32 %v316_v59, 0.0  ;;  %v381_v36 = vmax.f32 %v317_v15, 0.0 }
  0x46   :  { %v382_v23 = vmax.f32 %v318_v0, 0.0  ;;  %v383_v37 = vmax.f32 %v319_v30, 0.0  ;;  %v1073_v38 = vpack.c.bf16 %v378_v46, %v377_v11  ;;  %v224_v45 = vmul.f32 %v1882_v44, %v1656_v12 }
  0x47   :  { %v384_v34 = vmax.f32 %v320_v16, 0.0  ;;  %v1078_v39 = vpack.c.bf16 %v380_v18, %v379_v33  ;;  %v1883_v48 = vunpack.c.h.bf16 %v1378_v1  ;;  %v1884_v21 = vunpack.c.l.bf16 %v1387_v7 }
  0x48   :  { %v1083_v20 = vpack.c.bf16 %v382_v23, %v381_v36  ;;  %v1885_v52 = vunpack.c.h.bf16 %v1387_v7  ;;  %1196 = vst [vmem:[%s1855_s2 + $0x80] sm:$0xff] %v1073_v38   ;;  %v321_v1 = vadd.f32 %v1678_v3, %v224_v45  ;;  %v1886_v42 = vunpack.c.l.bf16 %v1392_v9 }
  0x49   :  { %v225_v35 = vmul.f32 %v1883_v48, %v1656_v12  ;;  %v1088_v47 = vpack.c.bf16 %v384_v34, %v383_v37  ;;  %v226_v60 = vmul.f32 %v1884_v21, %v1656_v12  ;;  %1197 = vst [vmem:[%s1855_s2 + $0x88] sm:$0xff] %v1078_v39   ;;  %v1887_v7 = vunpack.c.h.bf16 %v1392_v9 }
  0x4a   :  { %v227_v50 = vmul.f32 %v1885_v52, %v1656_v12  ;;  %v228_v22 = vmul.f32 %v1886_v42, %v1656_v12  ;;  %1198 = vst [vmem:[%s1855_s2 + $0x90] sm:$0xff] %v1083_v20   ;;  %v1888_v49 = vunpack.c.l.bf16 %v1401_v6  ;;  %v1889_v9 = vunpack.c.h.bf16 %v1401_v6 }
  0x4b   :  { %v322_v24 = vadd.f32 %v1678_v3, %v225_v35  ;;  %v229_v43 = vmul.f32 %v1887_v7, %v1656_v12  ;;  %1199 = vst [vmem:[%s1855_s2 + $0x98] sm:$0xff] %v1088_v47   ;;  %v323_v54 = vadd.f32 %v1678_v3, %v226_v60  ;;  %v385_v31 = vmax.f32 %v321_v1, 0.0 }
  0x4c   :  { %v324_v27 = vadd.f32 %v1678_v3, %v227_v50  ;;  %v230_v14 = vmul.f32 %v1888_v49, %v1656_v12  ;;  %v231_v28 = vmul.f32 %v1889_v9, %v1656_v12  ;;  %v325_v57 = vadd.f32 %v1678_v3, %v228_v22 }
  0x4d   :  { %v386_v25 = vmax.f32 %v322_v24, 0.0  ;;  %v326_v61 = vadd.f32 %v1678_v3, %v229_v43  ;;  %v387_v53 = vmax.f32 %v323_v54, 0.0  ;;  %v1890_v26 = vunpack.c.l.bf16 %v1406_v5 }
  0x4e   :  { %v388_v29 = vmax.f32 %v324_v27, 0.0  ;;  %v327_v40 = vadd.f32 %v1678_v3, %v230_v14  ;;  %v328_v4 = vadd.f32 %v1678_v3, %v231_v28  ;;  %v389_v32 = vmax.f32 %v325_v57, 0.0 }
  0x4f   :  { %v1093_v17 = vpack.c.bf16 %v386_v25, %v385_v31  ;;  %v390_v51 = vmax.f32 %v326_v61, 0.0  ;;  %v232_v6 = vmul.f32 %v1890_v26, %v1656_v12  ;;  %v1891_v8 = vunpack.c.h.bf16 %v1406_v5 }
  0x50   :  { %v1098_v62 = vpack.c.bf16 %v388_v29, %v387_v53  ;;  %v391_v58 = vmax.f32 %v327_v40, 0.0  ;;  %v392_v41 = vmax.f32 %v328_v4, 0.0  ;;  %v1892_v30 = vunpack.c.l.bf16 %v1415_v19 }
  0x51   :  { %v233_v59 = vmul.f32 %v1891_v8, %v1656_v12  ;;  %1200 = vst [vmem:[%s1855_s2 + $0xa0] sm:$0xff] %v1093_v17   ;;  %v1103_v15 = vpack.c.bf16 %v390_v51, %v389_v32  ;;  %v329_v0 = vadd.f32 %v1678_v3, %v232_v6  ;;  %v1893_v11 = vunpack.c.h.bf16 %v1415_v19 }
  0x52   :  { %v234_v16 = vmul.f32 %v1892_v30, %v1656_v12  ;;  %1201 = vst [vmem:[%s1855_s2 + $0xa8] sm:$0xff] %v1098_v62   ;;  %v1108_v5 = vpack.c.bf16 %v392_v41, %v391_v58  ;;  %v1894_v18 = vunpack.c.l.bf16 %v1424_v10  ;;  %v1895_v23 = vunpack.c.h.bf16 %v1424_v10 }
  0x53   :  { %v235_v46 = vmul.f32 %v1893_v11, %v1656_v12  ;;  %v330_v33 = vadd.f32 %v1678_v3, %v233_v59  ;;  %1202 = vst [vmem:[%s1855_s2 + $0xb0] sm:$0xff] %v1103_v15   ;;  %v393_v19 = vmax.f32 %v329_v0, 0.0  ;;  %v1896_v39 = vunpack.c.l.bf16 %v1429_v13 }
  0x54   :  { %v236_v36 = vmul.f32 %v1894_v18, %v1656_v12  ;;  %v237_v37 = vmul.f32 %v1895_v23, %v1656_v12  ;;  %v331_v34 = vadd.f32 %v1678_v3, %v234_v16  ;;  %1203 = vst [vmem:[%s1855_s2 + $0xb8] sm:$0xff] %v1108_v5   ;;  %v1897_v35 = vunpack.c.h.bf16 %v1429_v13 }
  0x55   :  { %v332_v38 = vadd.f32 %v1678_v3, %v235_v46  ;;  %v238_v44 = vmul.f32 %v1896_v39, %v1656_v12  ;;  %v394_v45 = vmax.f32 %v330_v33, 0.0  ;;  %v1898_v52 = vunpack.c.l.bf16 %v1443_v55 }
  0x56   :  { %v333_v10 = vadd.f32 %v1678_v3, %v236_v36  ;;  %v334_v48 = vadd.f32 %v1678_v3, %v237_v37  ;;  %v239_v20 = vmul.f32 %v1897_v35, %v1656_v12  ;;  %v395_v47 = vmax.f32 %v331_v34, 0.0 }
  0x57   :  { %v396_v21 = vmax.f32 %v332_v38, 0.0  ;;  %v335_v60 = vadd.f32 %v1678_v3, %v238_v44  ;;  %v240_v50 = vmul.f32 %v1898_v52, %v1656_v12  ;;  %v1113_v1 = vpack.c.bf16 %v394_v45, %v393_v19 }
  0x58   :  { %v397_v24 = vmax.f32 %v333_v10, 0.0  ;;  %v398_v42 = vmax.f32 %v334_v48, 0.0  ;;  %v336_v22 = vadd.f32 %v1678_v3, %v239_v20  ;;  %v1899_v54 = vunpack.c.h.bf16 %v1443_v55 }
  0x59   :  { %v1118_v7 = vpack.c.bf16 %v396_v21, %v395_v47  ;;  %v399_v43 = vmax.f32 %v335_v60, 0.0  ;;  %v337_v27 = vadd.f32 %v1678_v3, %v240_v50  ;;  %1204 = vst [vmem:[%s1855_s2 + $0xc0] sm:$0xff] %v1113_v1   ;;  %v1900_v9 = vunpack.c.l.bf16 %v1448_v63 }
  0x5a   :  { %v241_v13 = vmul.f32 %v1899_v54, %v1656_v12  ;;  %v1123_v49 = vpack.c.bf16 %v398_v42, %v397_v24  ;;  %v400_v14 = vmax.f32 %v336_v22, 0.0  ;;  %v1901_v31 = vunpack.c.h.bf16 %v1448_v63 }
  0x5b   :  { %v242_v28 = vmul.f32 %v1900_v9, %v1656_v12  ;;  %1205 = vst [vmem:[%s1855_s2 + $0xc8] sm:$0xff] %v1118_v7   ;;  %v401_v57 = vmax.f32 %v337_v27, 0.0  ;;  %v1902_v61 = vunpack.c.l.bf16 %v1457_v56  ;;  %v1903_v29 = vunpack.c.h.bf16 %v1457_v56 }
  0x5c   :  { %v243_v25 = vmul.f32 %v1901_v31, %v1656_v12  ;;  %v338_v55 = vadd.f32 %v1678_v3, %v241_v13  ;;  %1206 = vst [vmem:[%s1855_s2 + $0xd0] sm:$0xff] %v1123_v49   ;;  %v1128_v63 = vpack.c.bf16 %v400_v14, %v399_v43  ;;  %v1904_v32 = vunpack.c.l.bf16 %v1467_v2 }
  0x5d   :  { %v244_v53 = vmul.f32 %v1902_v61, %v1656_v12  ;;  %v245_v40 = vmul.f32 %v1903_v29, %v1656_v12  ;;  %v339_v4 = vadd.f32 %v1678_v3, %v242_v28  ;;  %v1905_v56 = vunpack.c.h.bf16 %v1467_v2 }
  0x5e   :  { %v340_v17 = vadd.f32 %v1678_v3, %v243_v25  ;;  %v246_v51 = vmul.f32 %v1904_v32, %v1656_v12  ;;  %v402_v26 = vmax.f32 %v338_v55, 0.0  ;;  %1207 = vst [vmem:[%s1855_s2 + $0xd8] sm:$0xff] %v1128_v63  }
  0x5f   :  { %v341_v6 = vadd.f32 %v1678_v3, %v244_v53  ;;  %v342_v62 = vadd.f32 %v1678_v3, %v245_v40  ;;  %v247_v58 = vmul.f32 %v1905_v56, %v1656_v12  ;;  %v403_v41 = vmax.f32 %v339_v4, 0.0 }
  0x60   :  { %v404_v8 = vmax.f32 %v340_v17, 0.0  ;;  %v343_v59 = vadd.f32 %v1678_v3, %v246_v51  ;;  %v1133_v15 = vpack.c.bf16 %v402_v26, %v401_v57 }
  0x61   :  { %v405_v0 = vmax.f32 %v341_v6, 0.0  ;;  %v406_v30 = vmax.f32 %v342_v62, 0.0  ;;  %v344_v16 = vadd.f32 %v1678_v3, %v247_v58 }
  0x62   :  { %v1138_v11 = vpack.c.bf16 %v404_v8, %v403_v41  ;;  %v407_v46 = vmax.f32 %v343_v59, 0.0  ;;  %1208 = vst [vmem:[%s1855_s2 + $0xe0] sm:$0xff] %v1133_v15  }
  0x63   :  { %v1143_v2 = vpack.c.bf16 %v406_v30, %v405_v0  ;;  %v408_v12 = vmax.f32 %v344_v16, 0.0 }
  0x64   :  { %1209 = vst [vmem:[%s1855_s2 + $0xe8] sm:$0xff] %v1138_v11  }
  0x65   :  { %1210 = vst [vmem:[%s1855_s2 + $0xf0] sm:$0xff] %v1143_v2   ;;  %v1148_v5 = vpack.c.bf16 %v408_v12, %v407_v46 }
  0x67   :  { %1211 = vst [vmem:[%s1855_s2 + $0xf8] sm:$0xff] %v1148_v5  }

// kernel: g_downsample.6
= control target key start
LH: loop header
LB: loop body
LE: loop exit
PB: predicated region body
PF: predicated region fallthrough
CT: control target
= control target key end

     0   :  { %v1924_v0 = vmov 0   ;;  %vm1218_vm0 = vcmask 1041409   ;;  %s2332_s1 = inlined_call_operand.vmem [shape: bf16[256,128], index: 1, kind: input, shape index: {}]   ;;  %s2333_s0 = inlined_call_operand.vmem [shape: bf16[2,256,256], index: 0, kind: input, shape index: {}]   ;;  %s2334_s2 = inlined_call_operand.vmem [shape: bf16[2,256,128], index: 2, kind: output, shape index: {0}]   ;;  %s2335_s3 = inlined_call_operand.vmem [shape: f32[1,2,2,128], index: 3, kind: output, shape index: {1}]  }
   0x1   :  { %526 = vmatprep.subr.bf16.mxu0 %v1924_v0  ;;  %1778 = vmatprep.subr.bf16.mxu1 %v1924_v0  ;;  %v1812_v1 = vld [vmem:[%s2332_s1] sm:$0xff]   ;;  %v1813_v2 = vld [vmem:[%s2332_s1 + $0x8] sm:$0xff]   ;;  %v1814_v3 = vld [vmem:[%s2332_s1 + $0x10] sm:$0xff]  }
   0x2   :  { %527 = vmatpush1.bf16.msra.mxu0 %v1812_v1  ;;  %1794 = vmatpush1.bf16.msra.mxu1 %v1812_v1  ;;  %v1815_v4 = vld [vmem:[%s2332_s1 + $0x18] sm:$0xff]   ;;  %v1816_v5 = vld [vmem:[%s2332_s1 + $0x20] sm:$0xff]   ;;  %v1817_v7 = vld [vmem:[%s2332_s1 + $0x28] sm:$0xff]  }
   0x3   :  { %528 = vmatprep.subr.bf16.mxu0 %v1924_v0  ;;  %1779 = vmatprep.subr.bf16.mxu1 %v1924_v0  ;;  %v1830_v6 = vld [vmem:[%s2333_s0 + $0x4] ss:$8 sps:$4 sm:$0xff]   ;;  %v1818_v9 = vld [vmem:[%s2332_s1 + $0x30] sm:$0xff]   ;;  %v1819_v10 = vld [vmem:[%s2332_s1 + $0x38] sm:$0xff]  }
   0x4   :  { %v1833_v8 = vld [vmem:[%s2333_s0 + $0x104] ss:$8 sps:$4 sm:$0xff]   ;;  %558 = vmatprep.mubr.bf16.mxu0 %v1830_v6  ;;  %v1822_v13 = vld [vmem:[%s2332_s1 + $0x50] sm:$0xff]   ;;  %v1823_v14 = vld [vmem:[%s2332_s1 + $0x58] sm:$0xff]  }
   0x5   :  { %686 = vmatprep.mubr.bf16.mxu1 %v1833_v8  ;;  %v1820_v11 = vld [vmem:[%s2332_s1 + $0x40] sm:$0xff]   ;;  %v1821_v12 = vld [vmem:[%s2332_s1 + $0x48] sm:$0xff]   ;;  %v1826_v17 = vld [vmem:[%s2332_s1 + $0x70] sm:$0xff]  }
   0x6   :  { %529 = vmatpush1.bf16.msra.mxu0 %v1813_v2  ;;  %1795 = vmatpush1.bf16.msra.mxu1 %v1813_v2  ;;  %v1824_v15 = vld [vmem:[%s2332_s1 + $0x60] sm:$0xff]   ;;  %v1825_v16 = vld [vmem:[%s2332_s1 + $0x68] sm:$0xff]   ;;  %v1827_v18 = vld [vmem:[%s2332_s1 + $0x78] sm:$0xff]  }
   0x7   :  { %530 = vmatprep.subr.bf16.mxu0 %v1924_v0  ;;  %1780 = vmatprep.subr.bf16.mxu1 %v1924_v0  ;;  %v1828_v19 = vld [vmem:[%s2333_s0] ss:$8 sps:$4 sm:$0xff]   ;;  %v1834_v21 = vld [vmem:[%s2333_s0 + $0x14] ss:$8 sps:$4 sm:$0xff]   ;;  %v1838_v23 = vld [vmem:[%s2333_s0 + $0x10] ss:$8 sps:$4 sm:$0xff]  }
   0x8   :  { %v1831_v20 = vld [vmem:[%s2333_s0 + $0x100] ss:$8 sps:$4 sm:$0xff]   ;;  %v1836_v22 = vld [vmem:[%s2333_s0 + $0x114] ss:$8 sps:$4 sm:$0xff]   ;;  %v1839_v24 = vld [vmem:[%s2333_s0 + $0x110] ss:$8 sps:$4 sm:$0xff]  }
   0x9   :  { %v1840_v25 = vld [vmem:[%s2333_s0 + $0x24] ss:$8 sps:$4 sm:$0xff]   ;;  %v1844_v27 = vld [vmem:[%s2333_s0 + $0x20] ss:$8 sps:$4 sm:$0xff]   ;;  %v1846_v29 = vld [vmem:[%s2333_s0 + $0x34] ss:$8 sps:$4 sm:$0xff]  }
   0xa   :  { %531 = vmatpush1.bf16.msra.mxu0 %v1814_v3  ;;  %1796 = vmatpush1.bf16.msra.mxu1 %v1814_v3  ;;  %v1842_v26 = vld [vmem:[%s2333_s0 + $0x124] ss:$8 sps:$4 sm:$0xff]   ;;  %v1845_v28 = vld [vmem:[%s2333_s0 + $0x120] ss:$8 sps:$4 sm:$0xff]   ;;  %v1848_v30 = vld [vmem:[%s2333_s0 + $0x134] ss:$8 sps:$4 sm:$0xff]  }
   0xb   :  { %532 = vmatprep.subr.bf16.mxu0 %v1924_v0  ;;  %1781 = vmatprep.subr.bf16.mxu1 %v1924_v0  ;;  %v1850_v31 = vld [vmem:[%s2333_s0 + $0x30] ss:$8 sps:$4 sm:$0xff]   ;;  %v1852_v33 = vld [vmem:[%s2333_s0 + $0x44] ss:$8 sps:$4 sm:$0xff]   ;;  %v1856_v35 = vld [vmem:[%s2333_s0 + $0x40] ss:$8 sps:$4 sm:$0xff]  }
   0xc   :  { %v1851_v32 = vld [vmem:[%s2333_s0 + $0x130] ss:$8 sps:$4 sm:$0xff]   ;;  %v1854_v34 = vld [vmem:[%s2333_s0 + $0x144] ss:$8 sps:$4 sm:$0xff]   ;;  %v1857_v36 = vld [vmem:[%s2333_s0 + $0x140] ss:$8 sps:$4 sm:$0xff]  }
   0xd   :  { %v1858_v37 = vld [vmem:[%s2333_s0 + $0x54] ss:$8 sps:$4 sm:$0xff]   ;;  %v1862_v39 = vld [vmem:[%s2333_s0 + $0x50] ss:$8 sps:$4 sm:$0xff]   ;;  %v1864_v41 = vld [vmem:[%s2333_s0 + $0x64] ss:$8 sps:$4 sm:$0xff]  }
   0xe   :  { %533 = vmatpush1.bf16.msra.mxu0 %v1815_v4  ;;  %1797 = vmatpush1.bf16.msra.mxu1 %v1815_v4  ;;  %v1860_v38 = vld [vmem:[%s2333_s0 + $0x154] ss:$8 sps:$4 sm:$0xff]   ;;  %v1863_v40 = vld [vmem:[%s2333_s0 + $0x150] ss:$8 sps:$4 sm:$0xff]   ;;  %v1866_v42 = vld [vmem:[%s2333_s0 + $0x164] ss:$8 sps:$4 sm:$0xff]  }
   0xf   :  { %534 = vmatprep.subr.bf16.mxu0 %v1924_v0  ;;  %1782 = vmatprep.subr.bf16.mxu1 %v1924_v0  ;;  %v1868_v43 = vld [vmem:[%s2333_s0 + $0x60] ss:$8 sps:$4 sm:$0xff]   ;;  %v1870_v45 = vld [vmem:[%s2333_s0 + $0x74] ss:$8 sps:$4 sm:$0xff]   ;;  %v1874_v47 = vld [vmem:[%s2333_s0 + $0x70] ss:$8 sps:$4 sm:$0xff]  }
  0x10   :  { %v1869_v44 = vld [vmem:[%s2333_s0 + $0x160] ss:$8 sps:$4 sm:$0xff]   ;;  %v1872_v46 = vld [vmem:[%s2333_s0 + $0x174] ss:$8 sps:$4 sm:$0xff]   ;;  %v1875_v48 = vld [vmem:[%s2333_s0 + $0x170] ss:$8 sps:$4 sm:$0xff]  }
  0x11   :  { %v1876_v49 = vld [vmem:[%s2333_s0 + $0x84] ss:$8 sps:$4 sm:$0xff]   ;;  %v1880_v51 = vld [vmem:[%s2333_s0 + $0x80] ss:$8 sps:$4 sm:$0xff]   ;;  %v1882_v53 = vld [vmem:[%s2333_s0 + $0x94] ss:$8 sps:$4 sm:$0xff]  }
  0x12   :  { %535 = vmatpush1.bf16.msra.mxu0 %v1816_v5  ;;  %1798 = vmatpush1.bf16.msra.mxu1 %v1816_v5  ;;  %v1878_v50 = vld [vmem:[%s2333_s0 + $0x184] ss:$8 sps:$4 sm:$0xff]   ;;  %v1881_v52 = vld [vmem:[%s2333_s0 + $0x180] ss:$8 sps:$4 sm:$0xff]   ;;  %v1884_v54 = vld [vmem:[%s2333_s0 + $0x194] ss:$8 sps:$4 sm:$0xff]  }
  0x13   :  { %536 = vmatprep.subr.bf16.mxu0 %v1924_v0  ;;  %1783 = vmatprep.subr.bf16.mxu1 %v1924_v0  ;;  %v1886_v55 = vld [vmem:[%s2333_s0 + $0x90] ss:$8 sps:$4 sm:$0xff]   ;;  %v1888_v57 = vld [vmem:[%s2333_s0 + $0xa4] ss:$8 sps:$4 sm:$0xff]   ;;  %v1892_v59 = vld [vmem:[%s2333_s0 + $0xa0] ss:$8 sps:$4 sm:$0xff]  }
  0x14   :  { %v1887_v56 = vld [vmem:[%s2333_s0 + $0x190] ss:$8 sps:$4 sm:$0xff]   ;;  %v1890_v58 = vld [vmem:[%s2333_s0 + $0x1a4] ss:$8 sps:$4 sm:$0xff]   ;;  %v1893_v60 = vld [vmem:[%s2333_s0 + $0x1a0] ss:$8 sps:$4 sm:$0xff]  }
  0x15   :  { %v1894_v61 = vld [vmem:[%s2333_s0 + $0xb4] ss:$8 sps:$4 sm:$0xff]   ;;  %v1898_v63 = vld [vmem:[%s2333_s0 + $0xb0] ss:$8 sps:$4 sm:$0xff]   ;;  %v1900_v1 = vld [vmem:[%s2333_s0 + $0xc4] ss:$8 sps:$4 sm:$0xff]  }
  0x16   :  { %537 = vmatpush1.bf16.msra.mxu0 %v1817_v7  ;;  %1799 = vmatpush1.bf16.msra.mxu1 %v1817_v7  ;;  %v1896_v62 = vld [vmem:[%s2333_s0 + $0x1b4] ss:$8 sps:$4 sm:$0xff]   ;;  %v1902_v2 = vld [vmem:[%s2333_s0 + $0x1c4] ss:$8 sps:$4 sm:$0xff]   ;;  %v1904_v3 = vld [vmem:[%s2333_s0 + $0xc0] ss:$8 sps:$4 sm:$0xff]  }
  0x17   :  { %538 = vmatprep.subr.bf16.mxu0 %v1924_v0  ;;  %1784 = vmatprep.subr.bf16.mxu1 %v1924_v0  ;;  %v1905_v4 = vld [vmem:[%s2333_s0 + $0x1c0] ss:$8 sps:$4 sm:$0xff]   ;;  %v1906_v5 = vld [vmem:[%s2333_s0 + $0xd4] ss:$8 sps:$4 sm:$0xff]   ;;  %v1910_v7 = vld [vmem:[%s2333_s0 + $0xd0] ss:$8 sps:$4 sm:$0xff]  }
  0x18   :  { %v1908_v6 = vld [vmem:[%s2333_s0 + $0x1d4] ss:$8 sps:$4 sm:$0xff]   ;;  %v1911_v8 = vld [vmem:[%s2333_s0 + $0x1d0] ss:$8 sps:$4 sm:$0xff]  }
  0x1a   :  { %539 = vmatpush1.bf16.msra.mxu0 %v1818_v9  ;;  %1800 = vmatpush1.bf16.msra.mxu1 %v1818_v9  ;;  %v1912_v9 = vld [vmem:[%s2333_s0 + $0xe4] ss:$8 sps:$4 sm:$0xff]  }
  0x1b   :  { %540 = vmatprep.subr.bf16.mxu0 %v1924_v0  ;;  %1785 = vmatprep.subr.bf16.mxu1 %v1924_v0 }
  0x1e   :  { %541 = vmatpush1.bf16.msra.mxu0 %v1819_v10  ;;  %1801 = vmatpush1.bf16.msra.mxu1 %v1819_v10  ;;  %v1914_v10 = vld [vmem:[%s2333_s0 + $0x1e4] ss:$8 sps:$4 sm:$0xff]  }
  0x1f   :  { %542 = vmatprep.subr.bf16.mxu0 %v1924_v0  ;;  %1786 = vmatprep.subr.bf16.mxu1 %v1924_v0 }
  0x22   :  { %543 = vmatpush1.bf16.msra.mxu0 %v1820_v11  ;;  %1802 = vmatpush1.bf16.msra.mxu1 %v1820_v11  ;;  %v1916_v11 = vld [vmem:[%s2333_s0 + $0xe0] ss:$8 sps:$4 sm:$0xff]  }
  0x23   :  { %544 = vmatprep.subr.bf16.mxu0 %v1924_v0  ;;  %1787 = vmatprep.subr.bf16.mxu1 %v1924_v0 }
  0x26   :  { %545 = vmatpush1.bf16.msra.mxu0 %v1821_v12  ;;  %1803 = vmatpush1.bf16.msra.mxu1 %v1821_v12  ;;  %v1917_v12 = vld [vmem:[%s2333_s0 + $0x1e0] ss:$8 sps:$4 sm:$0xff]  }
  0x27   :  { %546 = vmatprep.subr.bf16.mxu0 %v1924_v0  ;;  %1788 = vmatprep.subr.bf16.mxu1 %v1924_v0 }
  0x2a   :  { %547 = vmatpush1.bf16.msra.mxu0 %v1822_v13  ;;  %1804 = vmatpush1.bf16.msra.mxu1 %v1822_v13  ;;  %v1918_v13 = vld [vmem:[%s2333_s0 + $0xf4] ss:$8 sps:$4 sm:$0xff]  }
  0x2b   :  { %548 = vmatprep.subr.bf16.mxu0 %v1924_v0  ;;  %1789 = vmatprep.subr.bf16.mxu1 %v1924_v0 }
  0x2e   :  { %549 = vmatpush1.bf16.msra.mxu0 %v1823_v14  ;;  %1805 = vmatpush1.bf16.msra.mxu1 %v1823_v14  ;;  %v1920_v14 = vld [vmem:[%s2333_s0 + $0x1f4] ss:$8 sps:$4 sm:$0xff]  }
  0x2f   :  { %550 = vmatprep.subr.bf16.mxu0 %v1924_v0  ;;  %1790 = vmatprep.subr.bf16.mxu1 %v1924_v0 }
  0x32   :  { %551 = vmatpush1.bf16.msra.mxu0 %v1824_v15  ;;  %1806 = vmatpush1.bf16.msra.mxu1 %v1824_v15  ;;  %v1922_v15 = vld [vmem:[%s2333_s0 + $0xf0] ss:$8 sps:$4 sm:$0xff]  }
  0x33   :  { %552 = vmatprep.subr.bf16.mxu0 %v1924_v0  ;;  %1791 = vmatprep.subr.bf16.mxu1 %v1924_v0 }
  0x36   :  { %553 = vmatpush1.bf16.msra.mxu0 %v1825_v16  ;;  %1807 = vmatpush1.bf16.msra.mxu1 %v1825_v16  ;;  %v1923_v16 = vld [vmem:[%s2333_s0 + $0x1f0] ss:$8 sps:$4 sm:$0xff]  }
  0x37   :  { %554 = vmatprep.subr.bf16.mxu0 %v1924_v0  ;;  %1792 = vmatprep.subr.bf16.mxu1 %v1924_v0 }
  0x3a   :  { %555 = vmatpush1.bf16.msra.mxu0 %v1826_v17  ;;  %1808 = vmatpush1.bf16.msra.mxu1 %v1826_v17 }
  0x3b   :  { %556 = vmatprep.subr.bf16.mxu0 %v1924_v0  ;;  %1793 = vmatprep.subr.bf16.mxu1 %v1924_v0  ;;  %v1899_v0 = vld [vmem:[%s2333_s0 + $0x1b0] ss:$8 sps:$4 sm:$0xff]  }
  0x3e   :  { %557 = vmatpush1.bf16.msra.mxu0 %v1827_v18  ;;  %1809 = vmatpush1.bf16.msra.mxu1 %v1827_v18 }
  0x41   :  { %559 = vmatmul.mubr.bf16.vlgmr.msra.gmra.mrb[0].mxu0 %v1828_v19  ;;  %687 = vmatmul.mubr.bf16.vlgmr.msra.gmra.mrb[0].mxu1 %v1831_v20 }
  0x42   :  { %566 = vmatprep.mubr.bf16.mxu0 %v1834_v21  ;;  %694 = vmatprep.mubr.bf16.mxu1 %v1836_v22 }
  0x49   :  { %567 = vmatmul.mubr.bf16.gmra.mrb[4].mxu0 %v1838_v23  ;;  %695 = vmatmul.mubr.bf16.gmra.mrb[4].mxu1 %v1839_v24 }
  0x4a   :  { %574 = vmatprep.mubr.bf16.mxu0 %v1840_v25  ;;  %702 = vmatprep.mubr.bf16.mxu1 %v1842_v26 }
  0x51   :  { %575 = vmatmul.mubr.bf16.gmra.mrb[8].mxu0 %v1844_v27  ;;  %703 = vmatmul.mubr.bf16.gmra.mrb[8].mxu1 %v1845_v28 }
  0x52   :  { %582 = vmatprep.mubr.bf16.mxu0 %v1846_v29  ;;  %710 = vmatprep.mubr.bf16.mxu1 %v1848_v30  ;;  %v1925_v30 = vmov 0.0  }
  0x53   :  { %1139 = vst [vmem:[%s2335_s3] sm:$0x3] %v1925_v30  ;;  %1140 = vst [vmem:[%s2335_s3 + $0x2] sm:$0x3] %v1925_v30 }
  0x59   :  { %583 = vmatmul.mubr.bf16.gmra.mrb[12].mxu0 %v1850_v31  ;;  %711 = vmatmul.mubr.bf16.gmra.mrb[12].mxu1 %v1851_v32 }
  0x5a   :  { %590 = vmatprep.mubr.bf16.mxu0 %v1852_v33  ;;  %718 = vmatprep.mubr.bf16.mxu1 %v1854_v34 }
  0x61   :  { %591 = vmatmul.mubr.bf16.gmra.mrb[16].mxu0 %v1856_v35  ;;  %719 = vmatmul.mubr.bf16.gmra.mrb[16].mxu1 %v1857_v36 }
  0x62   :  { %598 = vmatprep.mubr.bf16.mxu0 %v1858_v37  ;;  %726 = vmatprep.mubr.bf16.mxu1 %v1860_v38 }
  0x69   :  { %599 = vmatmul.mubr.bf16.gmra.mrb[20].mxu0 %v1862_v39  ;;  %727 = vmatmul.mubr.bf16.gmra.mrb[20].mxu1 %v1863_v40 }
  0x6a   :  { %606 = vmatprep.mubr.bf16.mxu0 %v1864_v41  ;;  %734 = vmatprep.mubr.bf16.mxu1 %v1866_v42 }
  0x71   :  { %607 = vmatmul.mubr.bf16.gmra.mrb[24].mxu0 %v1868_v43  ;;  %735 = vmatmul.mubr.bf16.gmra.mrb[24].mxu1 %v1869_v44 }
  0x72   :  { %614 = vmatprep.mubr.bf16.mxu0 %v1870_v45  ;;  %742 = vmatprep.mubr.bf16.mxu1 %v1872_v46 }
  0x79   :  { %615 = vmatmul.mubr.bf16.gmra.mrb[28].mxu0 %v1874_v47  ;;  %743 = vmatmul.mubr.bf16.gmra.mrb[28].mxu1 %v1875_v48 }
  0x7a   :  { %622 = vmatprep.mubr.bf16.mxu0 %v1876_v49  ;;  %750 = vmatprep.mubr.bf16.mxu1 %v1878_v50 }
  0x81   :  { %623 = vmatmul.mubr.bf16.gmra.mrb[32].mxu0 %v1880_v51  ;;  %751 = vmatmul.mubr.bf16.gmra.mrb[32].mxu1 %v1881_v52 }
  0x82   :  { %630 = vmatprep.mubr.bf16.mxu0 %v1882_v53  ;;  %758 = vmatprep.mubr.bf16.mxu1 %v1884_v54 }
  0x89   :  { %631 = vmatmul.mubr.bf16.gmra.mrb[36].mxu0 %v1886_v55  ;;  %759 = vmatmul.mubr.bf16.gmra.mrb[36].mxu1 %v1887_v56 }
  0x8a   :  { %638 = vmatprep.mubr.bf16.mxu0 %v1888_v57  ;;  %766 = vmatprep.mubr.bf16.mxu1 %v1890_v58 }
  0x91   :  { %639 = vmatmul.mubr.bf16.gmra.mrb[40].mxu0 %v1892_v59  ;;  %767 = vmatmul.mubr.bf16.gmra.mrb[40].mxu1 %v1893_v60 }
  0x92   :  { %646 = vmatprep.mubr.bf16.mxu0 %v1894_v61  ;;  %774 = vmatprep.mubr.bf16.mxu1 %v1896_v62 }
  0x99   :  { %647 = vmatmul.mubr.bf16.gmra.mrb[44].mxu0 %v1898_v63  ;;  %775 = vmatmul.mubr.bf16.gmra.mrb[44].mxu1 %v1899_v0 }
  0x9a   :  { %654 = vmatprep.mubr.bf16.mxu0 %v1900_v1  ;;  %782 = vmatprep.mubr.bf16.mxu1 %v1902_v2 }
  0xa1   :  { %655 = vmatmul.mubr.bf16.gmra.mrb[48].mxu0 %v1904_v3  ;;  %783 = vmatmul.mubr.bf16.gmra.mrb[48].mxu1 %v1905_v4 }
  0xa2   :  { %662 = vmatprep.mubr.bf16.mxu0 %v1906_v5  ;;  %790 = vmatprep.mubr.bf16.mxu1 %v1908_v6 }
  0xa9   :  { %663 = vmatmul.mubr.bf16.gmra.mrb[52].mxu0 %v1910_v7  ;;  %791 = vmatmul.mubr.bf16.gmra.mrb[52].mxu1 %v1911_v8 }
  0xaa   :  { %670 = vmatprep.mubr.bf16.mxu0 %v1912_v9  ;;  %798 = vmatprep.mubr.bf16.mxu1 %v1914_v10 }
  0xb1   :  { %671 = vmatmul.mubr.bf16.gmra.mrb[56].mxu0 %v1916_v11  ;;  %799 = vmatmul.mubr.bf16.gmra.mrb[56].mxu1 %v1917_v12 }
  0xb2   :  { %678 = vmatprep.mubr.bf16.mxu0 %v1918_v13  ;;  %806 = vmatprep.mubr.bf16.mxu1 %v1920_v14 }
  0xb9   :  { %679 = vmatmul.mubr.bf16.gmra.mrb[60].mxu0 %v1922_v15  ;;  %807 = vmatmul.mubr.bf16.gmra.mrb[60].mxu1 %v1923_v16 }
 0x114   :  { %v560_v17 = vpop.f32.mrb[0].mxu0  ;;  %v688_v18 = vpop.f32.mrb[0].mxu1 }
 0x115   :  { %v562_v19 = vpop.f32.mrb[1].mxu0  ;;  %v690_v20 = vpop.f32.mrb[1].mxu1  ;;  %v1225_v21 = vmul.f32 %v560_v17, %v560_v17  ;;  %v1257_v31 = vmul.f32 %v688_v18, %v688_v18 }
 0x116   :  { %v563_v22 = vpop.f32.mrb[2].mxu0  ;;  %v691_v23 = vpop.f32.mrb[2].mxu1 }
 0x117   :  { %v1590_v24 = vpack.c.bf16 %v563_v22, %v560_v17  ;;  %v1142_v25 = vadd.f32 %v563_v22, %v560_v17  ;;  %v1226_v26 = vmul.f32 %v563_v22, %v563_v22  ;;  %v1670_v27 = vpack.c.bf16 %v691_v23, %v688_v18  ;;  %v565_v28 = vpop.f32.mrb[3].mxu0  ;;  %v693_v29 = vpop.f32.mrb[3].mxu1 }
 0x118   :  { %v1179_v32 = vadd.f32 %v691_v23, %v688_v18  ;;  %v1258_v33 = vmul.f32 %v691_v23, %v691_v23 }
 0x119   :  { %1591 = vst [vmem:[%s2334_s2] sm:$0xff] %v1590_v24   ;;  %v1289_v34 = vadd.f32 %v1226_v26, %v1225_v21  ;;  %1762 = vst [vmem:[%s2334_s2 + $0x80] sm:$0xff] %v1670_v27  }
 0x11a   :  { %v1326_v35 = vadd.f32 %v1258_v33, %v1257_v31 }
 0x11c   :  { %v568_v36 = vpop.f32.mrb[4].mxu0  ;;  %v696_v37 = vpop.f32.mrb[4].mxu1 }
 0x11d   :  { %v1143_v38 = vadd.f32 %v1142_v25, %v568_v36  ;;  %v1227_v39 = vmul.f32 %v568_v36, %v568_v36  ;;  %v1180_v40 = vadd.f32 %v1179_v32, %v696_v37  ;;  %v1259_v41 = vmul.f32 %v696_v37, %v696_v37  ;;  %v570_v42 = vpop.f32.mrb[5].mxu0  ;;  %v698_v43 = vpop.f32.mrb[5].mxu1 }
 0x11e   :  { %v571_v44 = vpop.f32.mrb[6].mxu0  ;;  %v699_v45 = vpop.f32.mrb[6].mxu1 }
 0x11f   :  { %v1290_v46 = vadd.f32 %v1289_v34, %v1227_v39  ;;  %v1327_v47 = vadd.f32 %v1326_v35, %v1259_v41  ;;  %v1595_v48 = vpack.c.bf16 %v571_v44, %v568_v36  ;;  %v1144_v49 = vadd.f32 %v1143_v38, %v571_v44  ;;  %v573_v50 = vpop.f32.mrb[7].mxu0  ;;  %v701_v51 = vpop.f32.mrb[7].mxu1 }
 0x120   :  { %v1228_v52 = vmul.f32 %v571_v44, %v571_v44  ;;  %v1675_v53 = vpack.c.bf16 %v699_v45, %v696_v37  ;;  %v1181_v54 = vadd.f32 %v1180_v40, %v699_v45  ;;  %v1260_v55 = vmul.f32 %v699_v45, %v699_v45 }
 0x121   :  { %1747 = vst [vmem:[%s2334_s2 + $0x8] sm:$0xff] %v1595_v48  }
 0x122   :  { %v1291_v56 = vadd.f32 %v1290_v46, %v1228_v52  ;;  %1763 = vst [vmem:[%s2334_s2 + $0x88] sm:$0xff] %v1675_v53   ;;  %v1328_v57 = vadd.f32 %v1327_v47, %v1260_v55 }
 0x124   :  { %v576_v58 = vpop.f32.mrb[8].mxu0  ;;  %v704_v59 = vpop.f32.mrb[8].mxu1 }
 0x125   :  { %v1145_v60 = vadd.f32 %v1144_v49, %v576_v58  ;;  %v1229_v61 = vmul.f32 %v576_v58, %v576_v58  ;;  %v1182_v62 = vadd.f32 %v1181_v54, %v704_v59  ;;  %v1261_v63 = vmul.f32 %v704_v59, %v704_v59  ;;  %v578_v0 = vpop.f32.mrb[9].mxu0  ;;  %v706_v1 = vpop.f32.mrb[9].mxu1 }
 0x126   :  { %v579_v2 = vpop.f32.mrb[10].mxu0  ;;  %v707_v3 = vpop.f32.mrb[10].mxu1 }
 0x127   :  { %v1292_v4 = vadd.f32 %v1291_v56, %v1229_v61  ;;  %v1329_v5 = vadd.f32 %v1328_v57, %v1261_v63  ;;  %v1600_v6 = vpack.c.bf16 %v579_v2, %v576_v58  ;;  %v1146_v7 = vadd.f32 %v1145_v60, %v579_v2  ;;  %v581_v8 = vpop.f32.mrb[11].mxu0  ;;  %v709_v9 = vpop.f32.mrb[11].mxu1 }
 0x128   :  { %v1230_v10 = vmul.f32 %v579_v2, %v579_v2  ;;  %v1680_v11 = vpack.c.bf16 %v707_v3, %v704_v59  ;;  %v1183_v12 = vadd.f32 %v1182_v62, %v707_v3  ;;  %v1262_v13 = vmul.f32 %v707_v3, %v707_v3 }
 0x129   :  { %1748 = vst [vmem:[%s2334_s2 + $0x10] sm:$0xff] %v1600_v6  }
 0x12a   :  { %v1293_v14 = vadd.f32 %v1292_v4, %v1230_v10  ;;  %1764 = vst [vmem:[%s2334_s2 + $0x90] sm:$0xff] %v1680_v11   ;;  %v1330_v15 = vadd.f32 %v1329_v5, %v1262_v13 }
 0x12c   :  { %v584_v16 = vpop.f32.mrb[12].mxu0  ;;  %v712_v17 = vpop.f32.mrb[12].mxu1 }
 0x12d   :  { %v1147_v18 = vadd.f32 %v1146_v7, %v584_v16  ;;  %v1231_v19 = vmul.f32 %v584_v16, %v584_v16  ;;  %v1184_v20 = vadd.f32 %v1183_v12, %v712_v17  ;;  %v1263_v21 = vmul.f32 %v712_v17, %v712_v17  ;;  %v586_v22 = vpop.f32.mrb[13].mxu0  ;;  %v714_v23 = vpop.f32.mrb[13].mxu1 }
 0x12e   :  { %v587_v24 = vpop.f32.mrb[14].mxu0  ;;  %v715_v25 = vpop.f32.mrb[14].mxu1 }
 0x12f   :  { %v1294_v26 = vadd.f32 %v1293_v14, %v1231_v19  ;;  %v1331_v27 = vadd.f32 %v1330_v15, %v1263_v21  ;;  %v1605_v28 = vpack.c.bf16 %v587_v24, %v584_v16  ;;  %v1148_v29 = vadd.f32 %v1147_v18, %v587_v24  ;;  %v589_v30 = vpop.f32.mrb[15].mxu0  ;;  %v717_v31 = vpop.f32.mrb[15].mxu1 }
 0x130   :  { %v1232_v32 = vmul.f32 %v587_v24, %v587_v24  ;;  %v1685_v33 = vpack.c.bf16 %v715_v25, %v712_v17  ;;  %v1185_v34 = vadd.f32 %v1184_v20, %v715_v25  ;;  %v1264_v35 = vmul.f32 %v715_v25, %v715_v25 }
 0x131   :  { %1749 = vst [vmem:[%s2334_s2 + $0x18] sm:$0xff] %v1605_v28  }
 0x132   :  { %v1295_v36 = vadd.f32 %v1294_v26, %v1232_v32  ;;  %1765 = vst [vmem:[%s2334_s2 + $0x98] sm:$0xff] %v1685_v33   ;;  %v1332_v37 = vadd.f32 %v1331_v27, %v1264_v35 }
 0x134   :  { %v592_v38 = vpop.f32.mrb[16].mxu0  ;;  %v720_v39 = vpop.f32.mrb[16].mxu1 }
 0x135   :  { %v1149_v40 = vadd.f32 %v1148_v29, %v592_v38  ;;  %v1233_v41 = vmul.f32 %v592_v38, %v592_v38  ;;  %v1186_v42 = vadd.f32 %v1185_v34, %v720_v39  ;;  %v1265_v43 = vmul.f32 %v720_v39, %v720_v39  ;;  %v594_v44 = vpop.f32.mrb[17].mxu0  ;;  %v722_v45 = vpop.f32.mrb[17].mxu1 }
 0x136   :  { %v595_v46 = vpop.f32.mrb[18].mxu0  ;;  %v723_v47 = vpop.f32.mrb[18].mxu1 }
 0x137   :  { %v1296_v48 = vadd.f32 %v1295_v36, %v1233_v41  ;;  %v1333_v49 = vadd.f32 %v1332_v37, %v1265_v43  ;;  %v1610_v50 = vpack.c.bf16 %v595_v46, %v592_v38  ;;  %v1150_v51 = vadd.f32 %v1149_v40, %v595_v46  ;;  %v597_v52 = vpop.f32.mrb[19].mxu0  ;;  %v725_v53 = vpop.f32.mrb[19].mxu1 }
 0x138   :  { %v1234_v54 = vmul.f32 %v595_v46, %v595_v46  ;;  %v1690_v55 = vpack.c.bf16 %v723_v47, %v720_v39  ;;  %v1187_v56 = vadd.f32 %v1186_v42, %v723_v47  ;;  %v1266_v57 = vmul.f32 %v723_v47, %v723_v47 }
 0x139   :  { %1750 = vst [vmem:[%s2334_s2 + $0x20] sm:$0xff] %v1610_v50  }
 0x13a   :  { %v1297_v58 = vadd.f32 %v1296_v48, %v1234_v54  ;;  %1766 = vst [vmem:[%s2334_s2 + $0xa0] sm:$0xff] %v1690_v55   ;;  %v1334_v59 = vadd.f32 %v1333_v49, %v1266_v57 }
 0x13c   :  { %v600_v60 = vpop.f32.mrb[20].mxu0  ;;  %v728_v61 = vpop.f32.mrb[20].mxu1 }
 0x13d   :  { %v1151_v62 = vadd.f32 %v1150_v51, %v600_v60  ;;  %v1235_v63 = vmul.f32 %v600_v60, %v600_v60  ;;  %v1188_v0 = vadd.f32 %v1187_v56, %v728_v61  ;;  %v1267_v1 = vmul.f32 %v728_v61, %v728_v61  ;;  %v602_v2 = vpop.f32.mrb[21].mxu0  ;;  %v730_v3 = vpop.f32.mrb[21].mxu1 }
 0x13e   :  { %v603_v4 = vpop.f32.mrb[22].mxu0  ;;  %v731_v5 = vpop.f32.mrb[22].mxu1 }
 0x13f   :  { %v1298_v6 = vadd.f32 %v1297_v58, %v1235_v63  ;;  %v1335_v7 = vadd.f32 %v1334_v59, %v1267_v1  ;;  %v1615_v8 = vpack.c.bf16 %v603_v4, %v600_v60  ;;  %v1152_v9 = vadd.f32 %v1151_v62, %v603_v4  ;;  %v605_v10 = vpop.f32.mrb[23].mxu0  ;;  %v733_v11 = vpop.f32.mrb[23].mxu1 }
 0x140   :  { %v1236_v12 = vmul.f32 %v603_v4, %v603_v4  ;;  %v1695_v13 = vpack.c.bf16 %v731_v5, %v728_v61  ;;  %v1189_v14 = vadd.f32 %v1188_v0, %v731_v5  ;;  %v1268_v15 = vmul.f32 %v731_v5, %v731_v5 }
 0x141   :  { %1751 = vst [vmem:[%s2334_s2 + $0x28] sm:$0xff] %v1615_v8  }
 0x142   :  { %v1299_v16 = vadd.f32 %v1298_v6, %v1236_v12  ;;  %1767 = vst [vmem:[%s2334_s2 + $0xa8] sm:$0xff] %v1695_v13   ;;  %v1336_v17 = vadd.f32 %v1335_v7, %v1268_v15 }
 0x144   :  { %v608_v18 = vpop.f32.mrb[24].mxu0  ;;  %v736_v19 = vpop.f32.mrb[24].mxu1 }
 0x145   :  { %v1153_v20 = vadd.f32 %v1152_v9, %v608_v18  ;;  %v1237_v21 = vmul.f32 %v608_v18, %v608_v18  ;;  %v1190_v22 = vadd.f32 %v1189_v14, %v736_v19  ;;  %v1269_v23 = vmul.f32 %v736_v19, %v736_v19  ;;  %v610_v24 = vpop.f32.mrb[25].mxu0  ;;  %v738_v25 = vpop.f32.mrb[25].mxu1 }
 0x146   :  { %v611_v26 = vpop.f32.mrb[26].mxu0  ;;  %v739_v27 = vpop.f32.mrb[26].mxu1 }
 0x147   :  { %v1300_v28 = vadd.f32 %v1299_v16, %v1237_v21  ;;  %v1337_v29 = vadd.f32 %v1336_v17, %v1269_v23  ;;  %v1620_v30 = vpack.c.bf16 %v611_v26, %v608_v18  ;;  %v1154_v31 = vadd.f32 %v1153_v20, %v611_v26  ;;  %v613_v32 = vpop.f32.mrb[27].mxu0  ;;  %v741_v33 = vpop.f32.mrb[27].mxu1 }
 0x148   :  { %v1238_v34 = vmul.f32 %v611_v26, %v611_v26  ;;  %v1700_v35 = vpack.c.bf16 %v739_v27, %v736_v19  ;;  %v1191_v36 = vadd.f32 %v1190_v22, %v739_v27  ;;  %v1270_v37 = vmul.f32 %v739_v27, %v739_v27 }
 0x149   :  { %1752 = vst [vmem:[%s2334_s2 + $0x30] sm:$0xff] %v1620_v30  }
 0x14a   :  { %v1301_v38 = vadd.f32 %v1300_v28, %v1238_v34  ;;  %1768 = vst [vmem:[%s2334_s2 + $0xb0] sm:$0xff] %v1700_v35   ;;  %v1338_v39 = vadd.f32 %v1337_v29, %v1270_v37 }
 0x14c   :  { %v616_v40 = vpop.f32.mrb[28].mxu0  ;;  %v744_v41 = vpop.f32.mrb[28].mxu1 }
 0x14d   :  { %v1155_v42 = vadd.f32 %v1154_v31, %v616_v40  ;;  %v1239_v43 = vmul.f32 %v616_v40, %v616_v40  ;;  %v1192_v44 = vadd.f32 %v1191_v36, %v744_v41  ;;  %v1271_v45 = vmul.f32 %v744_v41, %v744_v41  ;;  %v618_v46 = vpop.f32.mrb[29].mxu0  ;;  %v746_v47 = vpop.f32.mrb[29].mxu1 }
 0x14e   :  { %v619_v48 = vpop.f32.mrb[30].mxu0  ;;  %v747_v49 = vpop.f32.mrb[30].mxu1 }
 0x14f   :  { %v1302_v50 = vadd.f32 %v1301_v38, %v1239_v43  ;;  %v1339_v51 = vadd.f32 %v1338_v39, %v1271_v45  ;;  %v1625_v52 = vpack.c.bf16 %v619_v48, %v616_v40  ;;  %v1156_v53 = vadd.f32 %v1155_v42, %v619_v48  ;;  %v621_v54 = vpop.f32.mrb[31].mxu0  ;;  %v749_v55 = vpop.f32.mrb[31].mxu1 }
 0x150   :  { %v1240_v56 = vmul.f32 %v619_v48, %v619_v48  ;;  %v1705_v57 = vpack.c.bf16 %v747_v49, %v744_v41  ;;  %v1193_v58 = vadd.f32 %v1192_v44, %v747_v49  ;;  %v1272_v59 = vmul.f32 %v747_v49, %v747_v49 }
 0x151   :  { %1753 = vst [vmem:[%s2334_s2 + $0x38] sm:$0xff] %v1625_v52  }
 0x152   :  { %v1303_v60 = vadd.f32 %v1302_v50, %v1240_v56  ;;  %1769 = vst [vmem:[%s2334_s2 + $0xb8] sm:$0xff] %v1705_v57   ;;  %v1340_v61 = vadd.f32 %v1339_v51, %v1272_v59 }
 0x154   :  { %v624_v62 = vpop.f32.mrb[32].mxu0  ;;  %v752_v63 = vpop.f32.mrb[32].mxu1 }
 0x155   :  { %v1157_v0 = vadd.f32 %v1156_v53, %v624_v62  ;;  %v1241_v1 = vmul.f32 %v624_v62, %v624_v62  ;;  %v1194_v2 = vadd.f32 %v1193_v58, %v752_v63  ;;  %v1273_v3 = vmul.f32 %v752_v63, %v752_v63  ;;  %v626_v4 = vpop.f32.mrb[33].mxu0  ;;  %v754_v5 = vpop.f32.mrb[33].mxu1 }
 0x156   :  { %v627_v6 = vpop.f32.mrb[34].mxu0  ;;  %v755_v7 = vpop.f32.mrb[34].mxu1 }
 0x157   :  { %v1304_v8 = vadd.f32 %v1303_v60, %v1241_v1  ;;  %v1341_v9 = vadd.f32 %v1340_v61, %v1273_v3  ;;  %v1630_v10 = vpack.c.bf16 %v627_v6, %v624_v62  ;;  %v1158_v11 = vadd.f32 %v1157_v0, %v627_v6  ;;  %v629_v12 = vpop.f32.mrb[35].mxu0  ;;  %v757_v13 = vpop.f32.mrb[35].mxu1 }
 0x158   :  { %v1242_v14 = vmul.f32 %v627_v6, %v627_v6  ;;  %v1710_v15 = vpack.c.bf16 %v755_v7, %v752_v63  ;;  %v1195_v16 = vadd.f32 %v1194_v2, %v755_v7  ;;  %v1274_v17 = vmul.f32 %v755_v7, %v755_v7 }
 0x159   :  { %1754 = vst [vmem:[%s2334_s2 + $0x40] sm:$0xff] %v1630_v10  }
 0x15a   :  { %v1305_v18 = vadd.f32 %v1304_v8, %v1242_v14  ;;  %1770 = vst [vmem:[%s2334_s2 + $0xc0] sm:$0xff] %v1710_v15   ;;  %v1342_v19 = vadd.f32 %v1341_v9, %v1274_v17 }
 0x15c   :  { %v632_v20 = vpop.f32.mrb[36].mxu0  ;;  %v760_v21 = vpop.f32.mrb[36].mxu1 }
 0x15d   :  { %v1159_v22 = vadd.f32 %v1158_v11, %v632_v20  ;;  %v1243_v23 = vmul.f32 %v632_v20, %v632_v20  ;;  %v1196_v24 = vadd.f32 %v1195_v16, %v760_v21  ;;  %v1275_v25 = vmul.f32 %v760_v21, %v760_v21  ;;  %v634_v26 = vpop.f32.mrb[37].mxu0  ;;  %v762_v27 = vpop.f32.mrb[37].mxu1 }
 0x15e   :  { %v635_v28 = vpop.f32.mrb[38].mxu0  ;;  %v763_v29 = vpop.f32.mrb[38].mxu1 }
 0x15f   :  { %v1306_v30 = vadd.f32 %v1305_v18, %v1243_v23  ;;  %v1343_v31 = vadd.f32 %v1342_v19, %v1275_v25  ;;  %v1635_v32 = vpack.c.bf16 %v635_v28, %v632_v20  ;;  %v1160_v33 = vadd.f32 %v1159_v22, %v635_v28  ;;  %v637_v34 = vpop.f32.mrb[39].mxu0  ;;  %v765_v35 = vpop.f32.mrb[39].mxu1 }
 0x160   :  { %v1244_v36 = vmul.f32 %v635_v28, %v635_v28  ;;  %v1715_v37 = vpack.c.bf16 %v763_v29, %v760_v21  ;;  %v1197_v38 = vadd.f32 %v1196_v24, %v763_v29  ;;  %v1276_v39 = vmul.f32 %v763_v29, %v763_v29 }
 0x161   :  { %1755 = vst [vmem:[%s2334_s2 + $0x48] sm:$0xff] %v1635_v32  }
 0x162   :  { %v1307_v40 = vadd.f32 %v1306_v30, %v1244_v36  ;;  %1771 = vst [vmem:[%s2334_s2 + $0xc8] sm:$0xff] %v1715_v37   ;;  %v1344_v41 = vadd.f32 %v1343_v31, %v1276_v39 }
 0x164   :  { %v640_v42 = vpop.f32.mrb[40].mxu0  ;;  %v768_v43 = vpop.f32.mrb[40].mxu1 }
 0x165   :  { %v1161_v44 = vadd.f32 %v1160_v33, %v640_v42  ;;  %v1245_v45 = vmul.f32 %v640_v42, %v640_v42  ;;  %v1198_v46 = vadd.f32 %v1197_v38, %v768_v43  ;;  %v1277_v47 = vmul.f32 %v768_v43, %v768_v43  ;;  %v642_v48 = vpop.f32.mrb[41].mxu0  ;;  %v770_v49 = vpop.f32.mrb[41].mxu1 }
 0x166   :  { %v643_v50 = vpop.f32.mrb[42].mxu0  ;;  %v771_v51 = vpop.f32.mrb[42].mxu1 }
 0x167   :  { %v1308_v52 = vadd.f32 %v1307_v40, %v1245_v45  ;;  %v1345_v53 = vadd.f32 %v1344_v41, %v1277_v47  ;;  %v1640_v54 = vpack.c.bf16 %v643_v50, %v640_v42  ;;  %v1162_v55 = vadd.f32 %v1161_v44, %v643_v50  ;;  %v645_v56 = vpop.f32.mrb[43].mxu0  ;;  %v773_v57 = vpop.f32.mrb[43].mxu1 }
 0x168   :  { %v1246_v58 = vmul.f32 %v643_v50, %v643_v50  ;;  %v1720_v59 = vpack.c.bf16 %v771_v51, %v768_v43  ;;  %v1199_v60 = vadd.f32 %v1198_v46, %v771_v51  ;;  %v1278_v61 = vmul.f32 %v771_v51, %v771_v51 }
 0x169   :  { %1756 = vst [vmem:[%s2334_s2 + $0x50] sm:$0xff] %v1640_v54  }
 0x16a   :  { %v1309_v62 = vadd.f32 %v1308_v52, %v1246_v58  ;;  %1772 = vst [vmem:[%s2334_s2 + $0xd0] sm:$0xff] %v1720_v59   ;;  %v1346_v63 = vadd.f32 %v1345_v53, %v1278_v61 }
 0x16c   :  { %v648_v0 = vpop.f32.mrb[44].mxu0  ;;  %v776_v1 = vpop.f32.mrb[44].mxu1 }
 0x16d   :  { %v1163_v2 = vadd.f32 %v1162_v55, %v648_v0  ;;  %v1247_v3 = vmul.f32 %v648_v0, %v648_v0  ;;  %v1200_v4 = vadd.f32 %v1199_v60, %v776_v1  ;;  %v1279_v5 = vmul.f32 %v776_v1, %v776_v1  ;;  %v650_v6 = vpop.f32.mrb[45].mxu0  ;;  %v778_v7 = vpop.f32.mrb[45].mxu1 }
 0x16e   :  { %v651_v8 = vpop.f32.mrb[46].mxu0  ;;  %v779_v9 = vpop.f32.mrb[46].mxu1 }
 0x16f   :  { %v1310_v10 = vadd.f32 %v1309_v62, %v1247_v3  ;;  %v1347_v11 = vadd.f32 %v1346_v63, %v1279_v5  ;;  %v1645_v12 = vpack.c.bf16 %v651_v8, %v648_v0  ;;  %v1164_v13 = vadd.f32 %v1163_v2, %v651_v8  ;;  %v653_v14 = vpop.f32.mrb[47].mxu0  ;;  %v781_v15 = vpop.f32.mrb[47].mxu1 }
 0x170   :  { %v1248_v16 = vmul.f32 %v651_v8, %v651_v8  ;;  %v1725_v17 = vpack.c.bf16 %v779_v9, %v776_v1  ;;  %v1201_v18 = vadd.f32 %v1200_v4, %v779_v9  ;;  %v1280_v19 = vmul.f32 %v779_v9, %v779_v9 }
 0x171   :  { %1757 = vst [vmem:[%s2334_s2 + $0x58] sm:$0xff] %v1645_v12  }
 0x172   :  { %v1311_v20 = vadd.f32 %v1310_v10, %v1248_v16  ;;  %1773 = vst [vmem:[%s2334_s2 + $0xd8] sm:$0xff] %v1725_v17   ;;  %v1348_v21 = vadd.f32 %v1347_v11, %v1280_v19 }
 0x174   :  { %v656_v22 = vpop.f32.mrb[48].mxu0  ;;  %v784_v23 = vpop.f32.mrb[48].mxu1 }
 0x175   :  { %v1165_v24 = vadd.f32 %v1164_v13, %v656_v22  ;;  %v1249_v25 = vmul.f32 %v656_v22, %v656_v22  ;;  %v1202_v26 = vadd.f32 %v1201_v18, %v784_v23  ;;  %v1281_v27 = vmul.f32 %v784_v23, %v784_v23  ;;  %v658_v28 = vpop.f32.mrb[49].mxu0  ;;  %v786_v29 = vpop.f32.mrb[49].mxu1 }
 0x176   :  { %v659_v30 = vpop.f32.mrb[50].mxu0  ;;  %v787_v31 = vpop.f32.mrb[50].mxu1 }
 0x177   :  { %v1312_v32 = vadd.f32 %v1311_v20, %v1249_v25  ;;  %v1349_v33 = vadd.f32 %v1348_v21, %v1281_v27  ;;  %v1650_v34 = vpack.c.bf16 %v659_v30, %v656_v22  ;;  %v1166_v35 = vadd.f32 %v1165_v24, %v659_v30  ;;  %v661_v36 = vpop.f32.mrb[51].mxu0  ;;  %v789_v37 = vpop.f32.mrb[51].mxu1 }
 0x178   :  { %v1250_v38 = vmul.f32 %v659_v30, %v659_v30  ;;  %v1730_v39 = vpack.c.bf16 %v787_v31, %v784_v23  ;;  %v1203_v40 = vadd.f32 %v1202_v26, %v787_v31  ;;  %v1282_v41 = vmul.f32 %v787_v31, %v787_v31 }
 0x179   :  { %1758 = vst [vmem:[%s2334_s2 + $0x60] sm:$0xff] %v1650_v34  }
 0x17a   :  { %v1313_v42 = vadd.f32 %v1312_v32, %v1250_v38  ;;  %1774 = vst [vmem:[%s2334_s2 + $0xe0] sm:$0xff] %v1730_v39   ;;  %v1350_v43 = vadd.f32 %v1349_v33, %v1282_v41 }
 0x17c   :  { %v664_v44 = vpop.f32.mrb[52].mxu0  ;;  %v792_v45 = vpop.f32.mrb[52].mxu1 }
 0x17d   :  { %v1167_v46 = vadd.f32 %v1166_v35, %v664_v44  ;;  %v1251_v47 = vmul.f32 %v664_v44, %v664_v44  ;;  %v1204_v48 = vadd.f32 %v1203_v40, %v792_v45  ;;  %v1283_v49 = vmul.f32 %v792_v45, %v792_v45  ;;  %v666_v50 = vpop.f32.mrb[53].mxu0  ;;  %v794_v51 = vpop.f32.mrb[53].mxu1 }
 0x17e   :  { %v667_v52 = vpop.f32.mrb[54].mxu0  ;;  %v795_v53 = vpop.f32.mrb[54].mxu1 }
 0x17f   :  { %v1314_v54 = vadd.f32 %v1313_v42, %v1251_v47  ;;  %v1351_v55 = vadd.f32 %v1350_v43, %v1283_v49  ;;  %v1655_v56 = vpack.c.bf16 %v667_v52, %v664_v44  ;;  %v1168_v57 = vadd.f32 %v1167_v46, %v667_v52  ;;  %v669_v58 = vpop.f32.mrb[55].mxu0  ;;  %v797_v59 = vpop.f32.mrb[55].mxu1 }
 0x180   :  { %v1252_v60 = vmul.f32 %v667_v52, %v667_v52  ;;  %v1735_v61 = vpack.c.bf16 %v795_v53, %v792_v45  ;;  %v1205_v62 = vadd.f32 %v1204_v48, %v795_v53  ;;  %v1284_v63 = vmul.f32 %v795_v53, %v795_v53 }
 0x181   :  { %1759 = vst [vmem:[%s2334_s2 + $0x68] sm:$0xff] %v1655_v56  }
 0x182   :  { %v1315_v0 = vadd.f32 %v1314_v54, %v1252_v60  ;;  %1775 = vst [vmem:[%s2334_s2 + $0xe8] sm:$0xff] %v1735_v61   ;;  %v1352_v1 = vadd.f32 %v1351_v55, %v1284_v63 }
 0x184   :  { %v672_v2 = vpop.f32.mrb[56].mxu0  ;;  %v800_v3 = vpop.f32.mrb[56].mxu1 }
 0x185   :  { %v1169_v4 = vadd.f32 %v1168_v57, %v672_v2  ;;  %v1253_v5 = vmul.f32 %v672_v2, %v672_v2  ;;  %v1206_v6 = vadd.f32 %v1205_v62, %v800_v3  ;;  %v1285_v7 = vmul.f32 %v800_v3, %v800_v3  ;;  %v674_v8 = vpop.f32.mrb[57].mxu0  ;;  %v802_v9 = vpop.f32.mrb[57].mxu1 }
 0x186   :  { %v675_v10 = vpop.f32.mrb[58].mxu0  ;;  %v803_v11 = vpop.f32.mrb[58].mxu1 }
 0x187   :  { %v1316_v12 = vadd.f32 %v1315_v0, %v1253_v5  ;;  %v1353_v13 = vadd.f32 %v1352_v1, %v1285_v7  ;;  %v1660_v14 = vpack.c.bf16 %v675_v10, %v672_v2  ;;  %v1170_v15 = vadd.f32 %v1169_v4, %v675_v10  ;;  %v677_v16 = vpop.f32.mrb[59].mxu0  ;;  %v805_v17 = vpop.f32.mrb[59].mxu1  ;;  %v1141_v2 = vld [vmem:[%s2335_s3] sm:$0x3]  ;;  %v1521_v7 = vld [vmem:[%s2335_s3 + $0x2] sm:$0x3] }
 0x188   :  { %v1254_v18 = vmul.f32 %v675_v10, %v675_v10  ;;  %v1740_v19 = vpack.c.bf16 %v803_v11, %v800_v3  ;;  %v1207_v20 = vadd.f32 %v1206_v6, %v803_v11  ;;  %v1286_v21 = vmul.f32 %v803_v11, %v803_v11 }
 0x189   :  { %1760 = vst [vmem:[%s2334_s2 + $0x70] sm:$0xff] %v1660_v14  }
 0x18a   :  { %v1317_v22 = vadd.f32 %v1316_v12, %v1254_v18  ;;  %1776 = vst [vmem:[%s2334_s2 + $0xf0] sm:$0xff] %v1740_v19   ;;  %v1354_v23 = vadd.f32 %v1353_v13, %v1286_v21 }
 0x18c   :  { %v680_v24 = vpop.f32.mrb[60].mxu0  ;;  %v808_v25 = vpop.f32.mrb[60].mxu1 }
 0x18d   :  { %v1171_v26 = vadd.f32 %v1170_v15, %v680_v24  ;;  %v1255_v27 = vmul.f32 %v680_v24, %v680_v24  ;;  %v1208_v28 = vadd.f32 %v1207_v20, %v808_v25  ;;  %v1287_v29 = vmul.f32 %v808_v25, %v808_v25  ;;  %v682_v30 = vpop.f32.mrb[61].mxu0  ;;  %v810_v31 = vpop.f32.mrb[61].mxu1 }
 0x18e   :  { %v683_v32 = vpop.f32.mrb[62].mxu0  ;;  %v811_v33 = vpop.f32.mrb[62].mxu1 }
 0x18f   :  { %v1318_v34 = vadd.f32 %v1317_v22, %v1255_v27  ;;  %v1355_v35 = vadd.f32 %v1354_v23, %v1287_v29  ;;  %v1665_v36 = vpack.c.bf16 %v683_v32, %v680_v24  ;;  %v1172_v37 = vadd.f32 %v1171_v26, %v683_v32  ;;  %v685_v38 = vpop.f32.mrb[63].mxu0  ;;  %v813_v39 = vpop.f32.mrb[63].mxu1 }
 0x190   :  { %v1256_v40 = vmul.f32 %v683_v32, %v683_v32  ;;  %v1745_v41 = vpack.c.bf16 %v811_v33, %v808_v25  ;;  %v1209_v42 = vadd.f32 %v1208_v28, %v811_v33  ;;  %v1288_v43 = vmul.f32 %v811_v33, %v811_v33 }
 0x191   :  { %1761 = vst [vmem:[%s2334_s2 + $0x78] sm:$0xff] %v1665_v36   ;;  %v1173_v44 = vrot.slane %v1172_v37, 4 }
 0x192   :  { %v1319_v45 = vadd.f32 %v1318_v34, %v1256_v40  ;;  %1777 = vst [vmem:[%s2334_s2 + $0xf8] sm:$0xff] %v1745_v41   ;;  %v1210_v46 = vrot.slane %v1209_v42, 4  ;;  %v1356_v47 = vadd.f32 %v1355_v35, %v1288_v43 }
 0x193   :  { %v1174_v48 = vadd.f32 %v1173_v44, %v1172_v37 }
 0x194   :  { %v1320_v49 = vrot.slane %v1319_v45, 4  ;;  %v1211_v50 = vadd.f32 %v1210_v46, %v1209_v42  ;;  %v1357_v51 = vrot.slane %v1356_v47, 4 }
 0x195   :  { %v1175_v52 = vrot.slane %v1174_v48, 2 }
 0x196   :  { %v1321_v53 = vadd.f32 %v1320_v49, %v1319_v45  ;;  %v1212_v54 = vrot.slane %v1211_v50, 2  ;;  %v1358_v55 = vadd.f32 %v1357_v51, %v1356_v47 }
 0x197   :  { %v1176_v56 = vadd.f32 %v1175_v52, %v1174_v48 }
 0x198   :  { %v1322_v57 = vrot.slane %v1321_v53, 2  ;;  %v1213_v58 = vadd.f32 %v1212_v54, %v1211_v50  ;;  %v1359_v59 = vrot.slane %v1358_v55, 2 }
 0x199   :  { %v1177_v60 = vrot.slane %v1176_v56, 1 }
 0x19a   :  { %v1323_v61 = vadd.f32 %v1322_v57, %v1321_v53  ;;  %v1214_v62 = vrot.slane %v1213_v58, 1  ;;  %v1360_v63 = vadd.f32 %v1359_v59, %v1358_v55 }
 0x19b   :  { %v1178_v0 = vadd.f32 %v1177_v60, %v1176_v56 }
 0x19c   :  { %v1324_v1 = vrot.slane %v1323_v61, 1  ;;  %v1215_v3 = vadd.f32 %v1214_v62, %v1213_v58  ;;  %v1361_v4 = vrot.slane %v1360_v63, 1 }
 0x19e   :  { %v1325_v5 = vadd.f32 %v1324_v1, %v1323_v61  ;;  %v1219_v6 = vsel %vm1218_vm0, %v1215_v3, %v1178_v0  ;;  %v1362_v8 = vadd.f32 %v1361_v4, %v1360_v63 }
 0x19f   :  { %v1221_v9 = vadd.f32 %v1219_v6, %v1141_v2 }
 0x1a0   :  { %v1365_v10 = vsel %vm1218_vm0, %v1362_v8, %v1325_v5 }
 0x1a1   :  { %1222 = vst [vmem:[%s2335_s3] sm:$0x3] %v1221_v9  ;;  %v1367_v11 = vadd.f32 %v1521_v7, %v1365_v10 }
 0x1a3   :  { %1522 = vst [vmem:[%s2335_s3 + $0x2] sm:$0x3] %v1367_v11 }

// kernel: g_downsample.8
= control target key start
LH: loop header
LB: loop body
LE: loop exit
PB: predicated region body
PF: predicated region fallthrough
CT: control target
= control target key end

     0   :  { %vm996_vm0 = vcmask 1041409   ;;  %s1845_s1 = inlined_call_operand.vmem [shape: bf16[640,128], index: 1, kind: input, shape index: {}]   ;;  %s1846_s0 = inlined_call_operand.vmem [shape: bf16[2,64,640], index: 0, kind: input, shape index: {}]   ;;  %s1847_s3 = inlined_call_operand.vmem [shape: f32[1,2,2,128], index: 3, kind: output, shape index: {1}]   ;;  %s1848_s2 = inlined_call_operand.vmem [shape: bf16[2,64,128], index: 2, kind: output, shape index: {0}]  }
   0x1   :  { %v1413_v0 = vld [vmem:[%s1845_s1 + $0x40] sm:$0xff]   ;;  %v1417_v4 = vld [vmem:[%s1845_s1 + $0x48] sm:$0xff]   ;;  %v1421_v8 = vld [vmem:[%s1845_s1 + $0x50] sm:$0xff]  }
   0x2   :  { %v1414_v1 = vld [vmem:[%s1845_s1 + $0xc0] sm:$0xff]   ;;  %1220 = vmatprep.subr.bf16.mxu0 %v1413_v0  ;;  %v1418_v5 = vld [vmem:[%s1845_s1 + $0xc8] sm:$0xff]   ;;  %v1422_v9 = vld [vmem:[%s1845_s1 + $0xd0] sm:$0xff]  }
   0x3   :  { %v1415_v2 = vld [vmem:[%s1845_s1] sm:$0xff]   ;;  %1284 = vmatprep.subr.bf16.mxu1 %v1414_v1  ;;  %v1419_v6 = vld [vmem:[%s1845_s1 + $0x8] sm:$0xff]   ;;  %v1423_v10 = vld [vmem:[%s1845_s1 + $0x10] sm:$0xff]  }
   0x4   :  { %v1416_v3 = vld [vmem:[%s1845_s1 + $0x80] sm:$0xff]   ;;  %1221 = vmatpush3.bf16.msra.mxu0 %v1415_v2  ;;  %v1420_v7 = vld [vmem:[%s1845_s1 + $0x88] sm:$0xff]   ;;  %v1424_v11 = vld [vmem:[%s1845_s1 + $0x90] sm:$0xff]  }
   0x5   :  { %1285 = vmatpush3.bf16.msra.mxu1 %v1416_v3  ;;  %1222 = vmatprep.subr.bf16.mxu0 %v1417_v4  ;;  %v1425_v12 = vld [vmem:[%s1845_s1 + $0x58] sm:$0xff]   ;;  %v1429_v16 = vld [vmem:[%s1845_s1 + $0x60] sm:$0xff]   ;;  %v1433_v20 = vld [vmem:[%s1845_s1 + $0x68] sm:$0xff]  }
   0x6   :  { %1286 = vmatprep.subr.bf16.mxu1 %v1418_v5  ;;  %v1426_v13 = vld [vmem:[%s1845_s1 + $0xd8] sm:$0xff]   ;;  %v1430_v17 = vld [vmem:[%s1845_s1 + $0xe0] sm:$0xff]   ;;  %v1434_v21 = vld [vmem:[%s1845_s1 + $0xe8] sm:$0xff]  }
   0x7   :  { %v1427_v14 = vld [vmem:[%s1845_s1 + $0x18] sm:$0xff]   ;;  %v1431_v18 = vld [vmem:[%s1845_s1 + $0x20] sm:$0xff]   ;;  %v1435_v22 = vld [vmem:[%s1845_s1 + $0x28] sm:$0xff]  }
   0x8   :  { %1223 = vmatpush3.bf16.msra.mxu0 %v1419_v6  ;;  %v1428_v15 = vld [vmem:[%s1845_s1 + $0x98] sm:$0xff]   ;;  %v1432_v19 = vld [vmem:[%s1845_s1 + $0xa0] sm:$0xff]   ;;  %v1436_v23 = vld [vmem:[%s1845_s1 + $0xa8] sm:$0xff]  }
   0x9   :  { %1287 = vmatpush3.bf16.msra.mxu1 %v1420_v7  ;;  %1224 = vmatprep.subr.bf16.mxu0 %v1421_v8  ;;  %v1437_v24 = vld [vmem:[%s1845_s1 + $0x70] sm:$0xff]   ;;  %v1441_v28 = vld [vmem:[%s1845_s1 + $0x78] sm:$0xff]   ;;  %v1450_v35 = vld [vmem:[%s1846_s0 + $0xc] ss:$20 sps:$4 sm:$0xff]  }
   0xa   :  { %1288 = vmatprep.subr.bf16.mxu1 %v1422_v9  ;;  %v1438_v25 = vld [vmem:[%s1845_s1 + $0xf0] sm:$0xff]   ;;  %v1442_v29 = vld [vmem:[%s1845_s1 + $0xf8] sm:$0xff]   ;;  %v1451_v36 = vld [vmem:[%s1845_s1 + $0x100] sm:$0xff]   ;;  %719 = vmatprep.mubr.bf16.mxu1 %v1450_v35 }
   0xb   :  { %v1439_v26 = vld [vmem:[%s1845_s1 + $0x30] sm:$0xff]   ;;  %v1443_v30 = vld [vmem:[%s1845_s1 + $0x38] sm:$0xff]   ;;  %v1452_v37 = vld [vmem:[%s1846_s0 + $0x2c] ss:$20 sps:$4 sm:$0xff]  }
   0xc   :  { %1225 = vmatpush3.bf16.msra.mxu0 %v1423_v10  ;;  %v1440_v27 = vld [vmem:[%s1845_s1 + $0xb0] sm:$0xff]   ;;  %v1444_v31 = vld [vmem:[%s1845_s1 + $0xb8] sm:$0xff]   ;;  %v1458_v39 = vld [vmem:[%s1845_s1 + $0x108] sm:$0xff]  }
   0xd   :  { %1289 = vmatpush3.bf16.msra.mxu1 %v1424_v11  ;;  %1226 = vmatprep.subr.bf16.mxu0 %v1425_v12  ;;  %v1445_v32 = vld [vmem:[%s1846_s0] ss:$20 sps:$4 sm:$0xff]   ;;  %v1447_v33 = vld [vmem:[%s1846_s0 + $0x4] ss:$20 sps:$4 sm:$0xff]   ;;  %v1448_v34 = vld [vmem:[%s1846_s0 + $0x8] ss:$20 sps:$4 sm:$0xff]  }
   0xe   :  { %1290 = vmatprep.subr.bf16.mxu1 %v1426_v13  ;;  %622 = vmatprep.mubr.bf16.mxu0 %v1447_v33  ;;  %v1454_v38 = vld [vmem:[%s1846_s0 + $0x34] ss:$20 sps:$4 sm:$0xff]   ;;  %v1457_v41 = vld [vmem:[%s1846_s0 + $0x30] ss:$20 sps:$4 sm:$0xff]   ;;  %v1472_v45 = vld [vmem:[%s1845_s1 + $0x118] sm:$0xff]  }
   0xf   :  { %v1456_v40 = vld [vmem:[%s1846_s0 + $0x28] ss:$20 sps:$4 sm:$0xff]   ;;  %v1465_v44 = vld [vmem:[%s1845_s1 + $0x110] sm:$0xff]   ;;  %v1464_v47 = vld [vmem:[%s1846_s0 + $0x58] ss:$20 sps:$4 sm:$0xff]  }
  0x10   :  { %1227 = vmatpush3.bf16.msra.mxu0 %v1427_v14  ;;  %v1459_v42 = vld [vmem:[%s1846_s0 + $0x54] ss:$20 sps:$4 sm:$0xff]   ;;  %v1461_v43 = vld [vmem:[%s1846_s0 + $0x5c] ss:$20 sps:$4 sm:$0xff]   ;;  %v1468_v49 = vld [vmem:[%s1846_s0 + $0x84] ss:$20 sps:$4 sm:$0xff]  }
  0x11   :  { %1291 = vmatpush3.bf16.msra.mxu1 %v1428_v15  ;;  %1228 = vmatprep.subr.bf16.mxu0 %v1429_v16  ;;  %v1463_v46 = vld [vmem:[%s1846_s0 + $0x50] ss:$20 sps:$4 sm:$0xff]   ;;  %v1486_v51 = vld [vmem:[%s1845_s1 + $0x128] sm:$0xff]   ;;  %v1471_v53 = vld [vmem:[%s1846_s0 + $0x80] ss:$20 sps:$4 sm:$0xff]   ;;  %v1509_v16 = vmov 0.0  }
  0x12   :  { %1292 = vmatprep.subr.bf16.mxu1 %v1430_v17  ;;  %v1466_v48 = vld [vmem:[%s1846_s0 + $0x7c] ss:$20 sps:$4 sm:$0xff]   ;;  %v1479_v50 = vld [vmem:[%s1845_s1 + $0x120] sm:$0xff]   ;;  %v1470_v52 = vld [vmem:[%s1846_s0 + $0x78] ss:$20 sps:$4 sm:$0xff]   ;;  %965 = vst [vmem:[%s1847_s3] sm:$0x3] %v1509_v16 }
  0x13   :  { %v1473_v54 = vld [vmem:[%s1846_s0 + $0xa4] ss:$20 sps:$4 sm:$0xff]   ;;  %v1493_v55 = vld [vmem:[%s1845_s1 + $0x130] sm:$0xff]   ;;  %v1475_v56 = vld [vmem:[%s1846_s0 + $0xac] ss:$20 sps:$4 sm:$0xff]  }
  0x14   :  { %1229 = vmatpush3.bf16.msra.mxu0 %v1431_v18  ;;  %v1500_v57 = vld [vmem:[%s1845_s1 + $0x138] sm:$0xff]   ;;  %v1477_v58 = vld [vmem:[%s1846_s0 + $0xa0] ss:$20 sps:$4 sm:$0xff]   ;;  %v1485_v63 = vld [vmem:[%s1846_s0 + $0xd0] ss:$20 sps:$4 sm:$0xff]  }
  0x15   :  { %1293 = vmatpush3.bf16.msra.mxu1 %v1432_v19  ;;  %1230 = vmatprep.subr.bf16.mxu0 %v1433_v20  ;;  %v1478_v59 = vld [vmem:[%s1846_s0 + $0xa8] ss:$20 sps:$4 sm:$0xff]   ;;  %v1480_v60 = vld [vmem:[%s1846_s0 + $0xcc] ss:$20 sps:$4 sm:$0xff]   ;;  %v1491_v2 = vld [vmem:[%s1846_s0 + $0xf0] ss:$20 sps:$4 sm:$0xff]  }
  0x16   :  { %1294 = vmatprep.subr.bf16.mxu1 %v1434_v21  ;;  %v1482_v61 = vld [vmem:[%s1846_s0 + $0xd4] ss:$20 sps:$4 sm:$0xff]   ;;  %v1489_v1 = vld [vmem:[%s1846_s0 + $0xfc] ss:$20 sps:$4 sm:$0xff]   ;;  %v1492_v3 = vld [vmem:[%s1846_s0 + $0xf8] ss:$20 sps:$4 sm:$0xff]  }
  0x17   :  { %v1484_v62 = vld [vmem:[%s1846_s0 + $0xc8] ss:$20 sps:$4 sm:$0xff]   ;;  %v1496_v5 = vld [vmem:[%s1846_s0 + $0x124] ss:$20 sps:$4 sm:$0xff]   ;;  %v1499_v7 = vld [vmem:[%s1846_s0 + $0x120] ss:$20 sps:$4 sm:$0xff]  }
  0x18   :  { %1231 = vmatpush3.bf16.msra.mxu0 %v1435_v22  ;;  %v1487_v0 = vld [vmem:[%s1846_s0 + $0xf4] ss:$20 sps:$4 sm:$0xff]   ;;  %v1494_v4 = vld [vmem:[%s1846_s0 + $0x11c] ss:$20 sps:$4 sm:$0xff]   ;;  %v1498_v6 = vld [vmem:[%s1846_s0 + $0x118] ss:$20 sps:$4 sm:$0xff]  }
  0x19   :  { %1295 = vmatpush3.bf16.msra.mxu1 %v1436_v23  ;;  %1232 = vmatprep.subr.bf16.mxu0 %v1437_v24  ;;  %v1501_v8 = vld [vmem:[%s1846_s0 + $0x10] ss:$20 sps:$4 sm:$0xff]   ;;  %v1503_v10 = vld [vmem:[%s1846_s0 + $0x38] ss:$20 sps:$4 sm:$0xff]   ;;  %v1505_v12 = vld [vmem:[%s1846_s0 + $0x60] ss:$20 sps:$4 sm:$0xff]  }
  0x1a   :  { %1296 = vmatprep.subr.bf16.mxu1 %v1438_v25  ;;  %v1502_v9 = vld [vmem:[%s1846_s0 + $0xb0] ss:$20 sps:$4 sm:$0xff]   ;;  %v1504_v11 = vld [vmem:[%s1846_s0 + $0xd8] ss:$20 sps:$4 sm:$0xff]   ;;  %v1506_v13 = vld [vmem:[%s1846_s0 + $0x100] ss:$20 sps:$4 sm:$0xff]  }
  0x1b   :  { %v1507_v14 = vld [vmem:[%s1846_s0 + $0x88] ss:$20 sps:$4 sm:$0xff]   ;;  %966 = vst [vmem:[%s1847_s3 + $0x2] sm:$0x3] %v1509_v16 }
  0x1c   :  { %1233 = vmatpush3.bf16.msra.mxu0 %v1439_v26  ;;  %v1508_v15 = vld [vmem:[%s1846_s0 + $0x128] ss:$20 sps:$4 sm:$0xff]  }
  0x1d   :  { %1297 = vmatpush3.bf16.msra.mxu1 %v1440_v27  ;;  %1234 = vmatprep.subr.bf16.mxu0 %v1441_v28 }
  0x1e   :  { %1298 = vmatprep.subr.bf16.mxu1 %v1442_v29 }
  0x20   :  { %1235 = vmatpush3.bf16.msra.mxu0 %v1443_v30 }
  0x21   :  { %1299 = vmatpush3.bf16.msra.mxu1 %v1444_v31  ;;  %1364 = vmatprep.subr.bf16.mxu0 %v1451_v36 }
  0x22   :  { %1396 = vmatprep.subr.bf16.mxu1 %v1451_v36 }
  0x23   :  { %623 = vmatmul.mubr.bf16.vlgmr.msra.gmra.mrb[0].mxu0 %v1445_v32 }
  0x24   :  { %720 = vmatmul.mubr.bf16.vlgmr.msra.gmra.mrb[0].mxu1 %v1448_v34  ;;  %1365 = vmatpush3.bf16.msra.mxu0 %v1451_v36 }
  0x25   :  { %1404 = vmatpush3.bf16.msra.mxu1 %v1451_v36  ;;  %630 = vmatprep.mubr.bf16.mxu0 %v1452_v37 }
  0x26   :  { %727 = vmatprep.mubr.bf16.mxu1 %v1454_v38  ;;  %1366 = vmatprep.subr.bf16.mxu0 %v1458_v39 }
  0x27   :  { %1397 = vmatprep.subr.bf16.mxu1 %v1458_v39 }
  0x28   :  { %1367 = vmatpush3.bf16.msra.mxu0 %v1458_v39 }
  0x29   :  { %1405 = vmatpush3.bf16.msra.mxu1 %v1458_v39  ;;  %1368 = vmatprep.subr.bf16.mxu0 %v1465_v44 }
  0x2a   :  { %1398 = vmatprep.subr.bf16.mxu1 %v1465_v44 }
  0x2b   :  { %631 = vmatmul.mubr.bf16.gmra.mrb[4].mxu0 %v1456_v40 }
  0x2c   :  { %728 = vmatmul.mubr.bf16.gmra.mrb[4].mxu1 %v1457_v41  ;;  %638 = vmatprep.mubr.bf16.mxu0 %v1459_v42 }
  0x2d   :  { %735 = vmatprep.mubr.bf16.mxu1 %v1461_v43  ;;  %1369 = vmatpush3.bf16.msra.mxu0 %v1465_v44 }
  0x2e   :  { %1406 = vmatpush3.bf16.msra.mxu1 %v1465_v44  ;;  %1370 = vmatprep.subr.bf16.mxu0 %v1472_v45 }
  0x2f   :  { %1399 = vmatprep.subr.bf16.mxu1 %v1472_v45 }
  0x31   :  { %1371 = vmatpush3.bf16.msra.mxu0 %v1472_v45 }
  0x32   :  { %1407 = vmatpush3.bf16.msra.mxu1 %v1472_v45  ;;  %1372 = vmatprep.subr.bf16.mxu0 %v1479_v50 }
  0x33   :  { %639 = vmatmul.mubr.bf16.gmra.mrb[8].mxu0 %v1463_v46  ;;  %1400 = vmatprep.subr.bf16.mxu1 %v1479_v50 }
  0x34   :  { %736 = vmatmul.mubr.bf16.gmra.mrb[8].mxu1 %v1464_v47  ;;  %646 = vmatprep.mubr.bf16.mxu0 %v1466_v48 }
  0x35   :  { %743 = vmatprep.mubr.bf16.mxu1 %v1468_v49  ;;  %1373 = vmatpush3.bf16.msra.mxu0 %v1479_v50 }
  0x36   :  { %1408 = vmatpush3.bf16.msra.mxu1 %v1479_v50  ;;  %1374 = vmatprep.subr.bf16.mxu0 %v1486_v51 }
  0x37   :  { %1401 = vmatprep.subr.bf16.mxu1 %v1486_v51 }
  0x39   :  { %1375 = vmatpush3.bf16.msra.mxu0 %v1486_v51 }
  0x3a   :  { %1409 = vmatpush3.bf16.msra.mxu1 %v1486_v51  ;;  %1376 = vmatprep.subr.bf16.mxu0 %v1493_v55 }
  0x3b   :  { %647 = vmatmul.mubr.bf16.gmra.mrb[12].mxu0 %v1470_v52  ;;  %1402 = vmatprep.subr.bf16.mxu1 %v1493_v55 }
  0x3c   :  { %744 = vmatmul.mubr.bf16.gmra.mrb[12].mxu1 %v1471_v53  ;;  %654 = vmatprep.mubr.bf16.mxu0 %v1473_v54 }
  0x3d   :  { %751 = vmatprep.mubr.bf16.mxu1 %v1475_v56  ;;  %1377 = vmatpush3.bf16.msra.mxu0 %v1493_v55 }
  0x3e   :  { %1410 = vmatpush3.bf16.msra.mxu1 %v1493_v55  ;;  %1378 = vmatprep.subr.bf16.mxu0 %v1500_v57 }
  0x3f   :  { %1403 = vmatprep.subr.bf16.mxu1 %v1500_v57 }
  0x41   :  { %1379 = vmatpush3.bf16.msra.mxu0 %v1500_v57 }
  0x42   :  { %1411 = vmatpush3.bf16.msra.mxu1 %v1500_v57 }
  0x43   :  { %655 = vmatmul.mubr.bf16.gmra.mrb[16].mxu0 %v1477_v58 }
  0x44   :  { %752 = vmatmul.mubr.bf16.gmra.mrb[16].mxu1 %v1478_v59  ;;  %662 = vmatprep.mubr.bf16.mxu0 %v1480_v60 }
  0x45   :  { %759 = vmatprep.mubr.bf16.mxu1 %v1482_v61 }
  0x4b   :  { %663 = vmatmul.mubr.bf16.gmra.mrb[20].mxu0 %v1484_v62 }
  0x4c   :  { %760 = vmatmul.mubr.bf16.gmra.mrb[20].mxu1 %v1485_v63  ;;  %670 = vmatprep.mubr.bf16.mxu0 %v1487_v0 }
  0x4d   :  { %767 = vmatprep.mubr.bf16.mxu1 %v1489_v1 }
  0x53   :  { %671 = vmatmul.mubr.bf16.gmra.mrb[24].mxu0 %v1491_v2 }
  0x54   :  { %768 = vmatmul.mubr.bf16.gmra.mrb[24].mxu1 %v1492_v3  ;;  %678 = vmatprep.mubr.bf16.mxu0 %v1494_v4 }
  0x55   :  { %775 = vmatprep.mubr.bf16.mxu1 %v1496_v5 }
  0x5b   :  { %679 = vmatmul.mubr.bf16.gmra.mrb[28].mxu0 %v1498_v6 }
  0x5c   :  { %776 = vmatmul.mubr.bf16.gmra.mrb[28].mxu1 %v1499_v7  ;;  %1380 = vmatprep.mubr.bf16.mxu0 %v1501_v8 }
  0x5d   :  { %1388 = vmatprep.mubr.bf16.mxu1 %v1502_v9 }
  0x63   :  { %1381 = vmatmul.mubr.bf16.vlgmr.msra.gmra.mrb[32].mxu0 %v1503_v10 }
  0x64   :  { %1389 = vmatmul.mubr.bf16.vlgmr.msra.gmra.mrb[32].mxu1 %v1504_v11  ;;  %1384 = vmatprep.mubr.bf16.mxu0 %v1505_v12 }
  0x65   :  { %1392 = vmatprep.mubr.bf16.mxu1 %v1506_v13 }
  0x6b   :  { %1385 = vmatmul.mubr.bf16.gmra.mrb[36].mxu0 %v1507_v14 }
  0x6c   :  { %1393 = vmatmul.mubr.bf16.gmra.mrb[36].mxu1 %v1508_v15 }
  0xf6   :  { %v1236_v17 = vpop.f32.mrb[0].mxu0 }
  0xf7   :  { %v1300_v18 = vpop.f32.mrb[0].mxu1  ;;  %v1237_v19 = vpop.f32.mrb[1].mxu0 }
  0xf8   :  { %v1238_v20 = vadd.f32 %v1237_v19, %v1236_v17  ;;  %v1301_v21 = vpop.f32.mrb[1].mxu1  ;;  %v1239_v22 = vpop.f32.mrb[2].mxu0 }
  0xf9   :  { %v1302_v23 = vadd.f32 %v1301_v21, %v1300_v18  ;;  %v1303_v24 = vpop.f32.mrb[2].mxu1  ;;  %v1240_v25 = vpop.f32.mrb[3].mxu0 }
  0xfa   :  { %v1241_v26 = vadd.f32 %v1240_v25, %v1239_v22  ;;  %v1304_v27 = vpop.f32.mrb[3].mxu1 }
  0xfb   :  { %v1305_v28 = vadd.f32 %v1304_v27, %v1303_v24  ;;  %v1776_v29 = vadd.f32 %v1302_v23, %v1238_v20 }
  0xfd   :  { %v1778_v30 = vadd.f32 %v1305_v28, %v1241_v26 }
  0xfe   :  { %v1242_v31 = vpop.f32.mrb[4].mxu0 }
  0xff   :  { %v1306_v32 = vpop.f32.mrb[4].mxu1  ;;  %v1243_v33 = vpop.f32.mrb[5].mxu0 }
 0x100   :  { %v1244_v34 = vadd.f32 %v1243_v33, %v1242_v31  ;;  %v1307_v35 = vpop.f32.mrb[5].mxu1  ;;  %v1245_v36 = vpop.f32.mrb[6].mxu0 }
 0x101   :  { %v1308_v37 = vadd.f32 %v1307_v35, %v1306_v32  ;;  %v1309_v38 = vpop.f32.mrb[6].mxu1  ;;  %v1246_v39 = vpop.f32.mrb[7].mxu0 }
 0x102   :  { %v1247_v40 = vadd.f32 %v1246_v39, %v1245_v36  ;;  %v1310_v41 = vpop.f32.mrb[7].mxu1 }
 0x103   :  { %v1311_v42 = vadd.f32 %v1310_v41, %v1309_v38  ;;  %v1780_v43 = vadd.f32 %v1308_v37, %v1244_v34 }
 0x105   :  { %v1782_v44 = vadd.f32 %v1311_v42, %v1247_v40 }
 0x106   :  { %v1248_v45 = vpop.f32.mrb[8].mxu0 }
 0x107   :  { %v1312_v46 = vpop.f32.mrb[8].mxu1  ;;  %v1249_v47 = vpop.f32.mrb[9].mxu0 }
 0x108   :  { %v1250_v48 = vadd.f32 %v1249_v47, %v1248_v45  ;;  %v1313_v49 = vpop.f32.mrb[9].mxu1  ;;  %v1251_v50 = vpop.f32.mrb[10].mxu0 }
 0x109   :  { %v1314_v51 = vadd.f32 %v1313_v49, %v1312_v46  ;;  %v1315_v52 = vpop.f32.mrb[10].mxu1  ;;  %v1252_v53 = vpop.f32.mrb[11].mxu0 }
 0x10a   :  { %v1253_v54 = vadd.f32 %v1252_v53, %v1251_v50  ;;  %v1316_v55 = vpop.f32.mrb[11].mxu1 }
 0x10b   :  { %v1317_v56 = vadd.f32 %v1316_v55, %v1315_v52  ;;  %v1784_v57 = vadd.f32 %v1314_v51, %v1250_v48 }
 0x10d   :  { %v1786_v58 = vadd.f32 %v1317_v56, %v1253_v54 }
 0x10e   :  { %v1254_v59 = vpop.f32.mrb[12].mxu0 }
 0x10f   :  { %v1318_v60 = vpop.f32.mrb[12].mxu1  ;;  %v1255_v61 = vpop.f32.mrb[13].mxu0 }
 0x110   :  { %v1256_v62 = vadd.f32 %v1255_v61, %v1254_v59  ;;  %v1319_v63 = vpop.f32.mrb[13].mxu1  ;;  %v1257_v0 = vpop.f32.mrb[14].mxu0 }
 0x111   :  { %v1320_v1 = vadd.f32 %v1319_v63, %v1318_v60  ;;  %v1321_v2 = vpop.f32.mrb[14].mxu1  ;;  %v1258_v3 = vpop.f32.mrb[15].mxu0 }
 0x112   :  { %v1259_v4 = vadd.f32 %v1258_v3, %v1257_v0  ;;  %v1322_v5 = vpop.f32.mrb[15].mxu1 }
 0x113   :  { %v1323_v6 = vadd.f32 %v1322_v5, %v1321_v2  ;;  %v1788_v7 = vadd.f32 %v1320_v1, %v1256_v62 }
 0x115   :  { %v1790_v8 = vadd.f32 %v1323_v6, %v1259_v4 }
 0x116   :  { %v1260_v9 = vpop.f32.mrb[16].mxu0 }
 0x117   :  { %v1324_v10 = vpop.f32.mrb[16].mxu1  ;;  %v1261_v11 = vpop.f32.mrb[17].mxu0 }
 0x118   :  { %v1262_v12 = vadd.f32 %v1261_v11, %v1260_v9  ;;  %v1325_v13 = vpop.f32.mrb[17].mxu1  ;;  %v1263_v14 = vpop.f32.mrb[18].mxu0 }
 0x119   :  { %v1326_v15 = vadd.f32 %v1325_v13, %v1324_v10  ;;  %v1327_v16 = vpop.f32.mrb[18].mxu1  ;;  %v1264_v17 = vpop.f32.mrb[19].mxu0 }
 0x11a   :  { %v1265_v18 = vadd.f32 %v1264_v17, %v1263_v14  ;;  %v1328_v19 = vpop.f32.mrb[19].mxu1 }
 0x11b   :  { %v1329_v20 = vadd.f32 %v1328_v19, %v1327_v16  ;;  %v754_v21 = vadd.f32 %v1326_v15, %v1262_v12 }
 0x11d   :  { %v757_v22 = vadd.f32 %v1329_v20, %v1265_v18 }
 0x11e   :  { %v1266_v23 = vpop.f32.mrb[20].mxu0 }
 0x11f   :  { %v1330_v24 = vpop.f32.mrb[20].mxu1  ;;  %v1267_v25 = vpop.f32.mrb[21].mxu0 }
 0x120   :  { %v1268_v26 = vadd.f32 %v1267_v25, %v1266_v23  ;;  %v1331_v27 = vpop.f32.mrb[21].mxu1  ;;  %v1269_v28 = vpop.f32.mrb[22].mxu0 }
 0x121   :  { %v1332_v31 = vadd.f32 %v1331_v27, %v1330_v24  ;;  %v1333_v32 = vpop.f32.mrb[22].mxu1  ;;  %v1270_v33 = vpop.f32.mrb[23].mxu0 }
 0x122   :  { %v1271_v34 = vadd.f32 %v1270_v33, %v1269_v28  ;;  %v1334_v35 = vpop.f32.mrb[23].mxu1 }
 0x123   :  { %v1335_v36 = vadd.f32 %v1334_v35, %v1333_v32  ;;  %v762_v37 = vadd.f32 %v1332_v31, %v1268_v26 }
 0x125   :  { %v765_v38 = vadd.f32 %v1335_v36, %v1271_v34 }
 0x126   :  { %v1272_v39 = vpop.f32.mrb[24].mxu0 }
 0x127   :  { %v1336_v40 = vpop.f32.mrb[24].mxu1  ;;  %v1273_v41 = vpop.f32.mrb[25].mxu0 }
 0x128   :  { %v1274_v42 = vadd.f32 %v1273_v41, %v1272_v39  ;;  %v1337_v45 = vpop.f32.mrb[25].mxu1  ;;  %v1275_v46 = vpop.f32.mrb[26].mxu0 }
 0x129   :  { %v1338_v47 = vadd.f32 %v1337_v45, %v1336_v40  ;;  %v1339_v48 = vpop.f32.mrb[26].mxu1  ;;  %v1276_v49 = vpop.f32.mrb[27].mxu0 }
 0x12a   :  { %v1277_v50 = vadd.f32 %v1276_v49, %v1275_v46  ;;  %v1340_v51 = vpop.f32.mrb[27].mxu1 }
 0x12b   :  { %v1341_v52 = vadd.f32 %v1340_v51, %v1339_v48  ;;  %v1792_v53 = vadd.f32 %v1338_v47, %v1274_v42 }
 0x12d   :  { %v1794_v54 = vadd.f32 %v1341_v52, %v1277_v50 }
 0x12e   :  { %v1278_v55 = vpop.f32.mrb[28].mxu0 }
 0x12f   :  { %v1342_v56 = vpop.f32.mrb[28].mxu1  ;;  %v1279_v59 = vpop.f32.mrb[29].mxu0 }
 0x130   :  { %v1280_v60 = vadd.f32 %v1279_v59, %v1278_v55  ;;  %v1343_v61 = vpop.f32.mrb[29].mxu1  ;;  %v1281_v62 = vpop.f32.mrb[30].mxu0 }
 0x131   :  { %v1344_v63 = vadd.f32 %v1343_v61, %v1342_v56  ;;  %v1345_v0 = vpop.f32.mrb[30].mxu1  ;;  %v1282_v1 = vpop.f32.mrb[31].mxu0 }
 0x132   :  { %v1283_v2 = vadd.f32 %v1282_v1, %v1281_v62  ;;  %v1346_v3 = vpop.f32.mrb[31].mxu1 }
 0x133   :  { %v1347_v4 = vadd.f32 %v1346_v3, %v1345_v0  ;;  %v778_v5 = vadd.f32 %v1344_v63, %v1280_v60 }
 0x135   :  { %v1796_v6 = vadd.f32 %v1347_v4, %v1283_v2 }
 0x136   :  { %v1382_v9 = vpop.f32.mrb[32].mxu0 }
 0x137   :  { %v827_v10 = vadd.f32 %v1382_v9, %v1780_v43  ;;  %v1390_v11 = vpop.f32.mrb[32].mxu1  ;;  %v818_v12 = vpop.f32.mrb[33].mxu0 }
 0x138   :  { %v859_v13 = vadd.f32 %v1390_v11, %v762_v37  ;;  %v819_v14 = vadd.f32 %v818_v12, %v1776_v29  ;;  %v850_v15 = vpop.f32.mrb[33].mxu1  ;;  %v1383_v16 = vpop.f32.mrb[34].mxu0 }
 0x139   :  { %v851_v17 = vadd.f32 %v850_v15, %v754_v21  ;;  %v830_v18 = vadd.f32 %v1383_v16, %v1782_v44  ;;  %v1391_v19 = vpop.f32.mrb[34].mxu1  ;;  %v821_v20 = vpop.f32.mrb[35].mxu0  ;;  %v1005_v35 = vmul.f32 %v827_v10, %v827_v10 }
 0x13a   :  { %v862_v23 = vadd.f32 %v1391_v19, %v765_v38  ;;  %v822_v24 = vadd.f32 %v821_v20, %v1778_v30  ;;  %v853_v25 = vpop.f32.mrb[35].mxu1  ;;  %v1003_v26 = vmul.f32 %v819_v14, %v819_v14  ;;  %v1013_v36 = vmul.f32 %v859_v13, %v859_v13 }
 0x13b   :  { %v1181_v27 = vpack.c.bf16 %v830_v18, %v827_v10  ;;  %v854_v28 = vadd.f32 %v853_v25, %v757_v22  ;;  %v1011_v43 = vmul.f32 %v851_v17, %v851_v17  ;;  %v1006_v45 = vmul.f32 %v830_v18, %v830_v18 }
 0x13c   :  { %v1201_v31 = vpack.c.bf16 %v862_v23, %v859_v13  ;;  %v1176_v32 = vpack.c.bf16 %v822_v24, %v819_v14  ;;  %v968_v33 = vadd.f32 %v822_v24, %v819_v14  ;;  %v1004_v29 = vmul.f32 %v822_v24, %v822_v24 }
 0x13d   :  { %1213 = vst [vmem:[%s1848_s2 + $0x8] sm:$0xff] %v1181_v27   ;;  %v1196_v21 = vpack.c.bf16 %v854_v28, %v851_v17  ;;  %v981_v44 = vadd.f32 %v854_v28, %v851_v17  ;;  %v1012_v34 = vmul.f32 %v854_v28, %v854_v28  ;;  %v1014_v51 = vmul.f32 %v862_v23, %v862_v23 }
 0x13e   :  { %1217 = vst [vmem:[%s1848_s2 + $0x28] sm:$0xff] %v1201_v31   ;;  %1177 = vst [vmem:[%s1848_s2] sm:$0xff] %v1176_v32   ;;  %v969_v30 = vadd.f32 %v968_v33, %v827_v10  ;;  %v1386_v22 = vpop.f32.mrb[36].mxu0  ;;  %v1019_v37 = vadd.f32 %v1004_v29, %v1003_v26 }
 0x13f   :  { %1216 = vst [vmem:[%s1848_s2 + $0x20] sm:$0xff] %v1196_v21   ;;  %v982_v38 = vadd.f32 %v981_v44, %v859_v13  ;;  %v1032_v39 = vadd.f32 %v1012_v34, %v1011_v43  ;;  %v843_v40 = vadd.f32 %v1386_v22, %v1788_v7  ;;  %v1394_v41 = vpop.f32.mrb[36].mxu1  ;;  %v834_v42 = vpop.f32.mrb[37].mxu0 }
 0x140   :  { %v875_v46 = vadd.f32 %v1394_v41, %v778_v5  ;;  %v835_v47 = vadd.f32 %v834_v42, %v1784_v57  ;;  %v970_v48 = vadd.f32 %v969_v30, %v830_v18  ;;  %v866_v49 = vpop.f32.mrb[37].mxu1  ;;  %v1387_v50 = vpop.f32.mrb[38].mxu0  ;;  %v1020_v52 = vadd.f32 %v1019_v37, %v1005_v35 }
 0x141   :  { %v1033_v55 = vadd.f32 %v1032_v39, %v1013_v36  ;;  %v867_v56 = vadd.f32 %v866_v49, %v1792_v53  ;;  %v1395_v59 = vpop.f32.mrb[38].mxu1  ;;  %v837_v60 = vpop.f32.mrb[39].mxu0  ;;  %v983_v63 = vadd.f32 %v982_v38, %v862_v23  ;;  %v846_v3 = vadd.f32 %v1387_v50, %v1790_v8  ;;  %v967_v49 = vld [vmem:[%s1847_s3] sm:$0x3] }
 0x142   :  { %v971_v61 = vadd.f32 %v970_v48, %v835_v47  ;;  %v1007_v62 = vmul.f32 %v835_v47, %v835_v47  ;;  %v869_v7 = vpop.f32.mrb[39].mxu1  ;;  %v1021_v0 = vadd.f32 %v1020_v52, %v1006_v45  ;;  %v878_v4 = vadd.f32 %v1395_v59, %v1796_v6 }
 0x143   :  { %v1015_v1 = vmul.f32 %v867_v56, %v867_v56  ;;  %v1034_v2 = vadd.f32 %v1033_v55, %v1014_v51  ;;  %v984_v57 = vadd.f32 %v983_v63, %v867_v56  ;;  %v838_v5 = vadd.f32 %v837_v60, %v1786_v58 }
 0x144   :  { %v870_v9 = vadd.f32 %v869_v7, %v1794_v54  ;;  %v1022_v10 = vadd.f32 %v1021_v0, %v1007_v62  ;;  %v1191_v11 = vpack.c.bf16 %v846_v3, %v843_v40  ;;  %v1211_v12 = vpack.c.bf16 %v878_v4, %v875_v46 }
 0x145   :  { %v1035_v53 = vadd.f32 %v1034_v2, %v1015_v1  ;;  %v1186_v13 = vpack.c.bf16 %v838_v5, %v835_v47  ;;  %v972_v14 = vadd.f32 %v971_v61, %v838_v5  ;;  %v1008_v15 = vmul.f32 %v838_v5, %v838_v5 }
 0x146   :  { %1215 = vst [vmem:[%s1848_s2 + $0x18] sm:$0xff] %v1191_v11   ;;  %v1206_v16 = vpack.c.bf16 %v870_v9, %v867_v56  ;;  %v985_v8 = vadd.f32 %v984_v57, %v870_v9  ;;  %v1016_v17 = vmul.f32 %v870_v9, %v870_v9  ;;  %v1009_v18 = vmul.f32 %v843_v40, %v843_v40  ;;  %v1155_v56 = vld [vmem:[%s1847_s3 + $0x2] sm:$0x3] }
 0x147   :  { %1219 = vst [vmem:[%s1848_s2 + $0x38] sm:$0xff] %v1211_v12   ;;  %1214 = vst [vmem:[%s1848_s2 + $0x10] sm:$0xff] %v1186_v13   ;;  %v973_v58 = vadd.f32 %v972_v14, %v843_v40  ;;  %v1017_v54 = vmul.f32 %v875_v46, %v875_v46  ;;  %v1023_v6 = vadd.f32 %v1022_v10, %v1008_v15 }
 0x148   :  { %1218 = vst [vmem:[%s1848_s2 + $0x30] sm:$0xff] %v1206_v16   ;;  %v986_v19 = vadd.f32 %v985_v8, %v875_v46  ;;  %v1036_v20 = vadd.f32 %v1035_v53, %v1016_v17  ;;  %v1010_v23 = vmul.f32 %v846_v3, %v846_v3  ;;  %v1018_v25 = vmul.f32 %v878_v4, %v878_v4 }
 0x149   :  { %v974_v24 = vadd.f32 %v973_v58, %v846_v3  ;;  %v1024_v26 = vadd.f32 %v1023_v6, %v1009_v18 }
 0x14a   :  { %v987_v27 = vadd.f32 %v986_v19, %v878_v4  ;;  %v1037_v28 = vadd.f32 %v1036_v20, %v1017_v54 }
 0x14b   :  { %v975_v43 = vrot.slane %v974_v24, 4  ;;  %v1025_v31 = vadd.f32 %v1024_v26, %v1010_v23 }
 0x14c   :  { %v988_v32 = vrot.slane %v987_v27, 4  ;;  %v1038_v33 = vadd.f32 %v1037_v28, %v1018_v25 }
 0x14d   :  { %v976_v29 = vadd.f32 %v975_v43, %v974_v24  ;;  %v1026_v21 = vrot.slane %v1025_v31, 4 }
 0x14e   :  { %v989_v44 = vadd.f32 %v988_v32, %v987_v27  ;;  %v1039_v34 = vrot.slane %v1038_v33, 4 }
 0x14f   :  { %v977_v35 = vrot.slane %v976_v29, 2  ;;  %v1027_v36 = vadd.f32 %v1026_v21, %v1025_v31 }
 0x150   :  { %v990_v30 = vrot.slane %v989_v44, 2  ;;  %v1040_v22 = vadd.f32 %v1039_v34, %v1038_v33 }
 0x151   :  { %v978_v37 = vadd.f32 %v977_v35, %v976_v29  ;;  %v1028_v38 = vrot.slane %v1027_v36, 2 }
 0x152   :  { %v991_v39 = vadd.f32 %v990_v30, %v989_v44  ;;  %v1041_v40 = vrot.slane %v1040_v22, 2 }
 0x153   :  { %v979_v41 = vrot.slane %v978_v37, 1  ;;  %v1029_v42 = vadd.f32 %v1028_v38, %v1027_v36 }
 0x154   :  { %v992_v45 = vrot.slane %v991_v39, 1  ;;  %v1042_v46 = vadd.f32 %v1041_v40, %v1040_v22 }
 0x155   :  { %v980_v47 = vadd.f32 %v979_v41, %v978_v37  ;;  %v1030_v48 = vrot.slane %v1029_v42, 1 }
 0x156   :  { %v993_v50 = vadd.f32 %v992_v45, %v991_v39  ;;  %v1043_v51 = vrot.slane %v1042_v46, 1 }
 0x157   :  { %v1031_v52 = vadd.f32 %v1030_v48, %v1029_v42 }
 0x158   :  { %v997_v55 = vsel %vm996_vm0, %v993_v50, %v980_v47  ;;  %v1044_v59 = vadd.f32 %v1043_v51, %v1042_v46 }
 0x159   :  { %v999_v60 = vadd.f32 %v997_v55, %v967_v49 }
 0x15a   :  { %v1047_v61 = vsel %vm996_vm0, %v1044_v59, %v1031_v52 }
 0x15b   :  { %1000 = vst [vmem:[%s1847_s3] sm:$0x3] %v999_v60  ;;  %v1049_v62 = vadd.f32 %v1155_v56, %v1047_v61 }
 0x15d   :  { %1156 = vst [vmem:[%s1847_s3 + $0x2] sm:$0x3] %v1049_v62 }

// kernel: g_downsample.9
= control target key start
LH: loop header
LB: loop body
LE: loop exit
PB: predicated region body
PF: predicated region fallthrough
CT: control target
= control target key end

     0   :  { %v375_v8 = vmov 1966171168   ;;  %v59_v10 = vlaneseq  ;;  %s457_s1 = inlined_call_operand.vmem [shape: f32[1,2,2,128], index: 1, kind: input, shape index: {}]   ;;  %s458_s0 = inlined_call_operand.vmem [shape: bf16[2,64,128], index: 0, kind: input, shape index: {}]   ;;  %s459_s2 = inlined_call_operand.vmem [shape: bf16[2,64,128], index: 2, kind: output, shape index: {}]  }
   0x1   :  { %v43_v0 = vld [vmem:[%s457_s1] sm:$0x3]  ;;  %v253_v1 = vld [vmem:[%s457_s1 + $0x2] sm:$0x3]  ;;  %v57_v9 = vunpack.c.l.s4 %v375_v8  ;;  %v358_v16 = vld [vmem:[%s458_s0 + $0x8] sm:$0xff]  }
   0x2   :  { %v44_v2 = vmul.f32 0.015625, %v43_v0  ;;  %v47_v3 = vmul.f32 0.015625, %v253_v1  ;;  %v60_v12 = vshrl.u32 %v59_v10, 7  ;;  %v287_v13 = vld [vmem:[%s458_s0] sm:$0xff]   ;;  %v359_v17 = vld [vmem:[%s458_s0 + $0x10] sm:$0xff]   ;;  %v360_v18 = vld [vmem:[%s458_s0 + $0x18] sm:$0xff]   ;;  %v292_v25 = vunpack.c.l.bf16 %v358_v16 }
   0x3   :  { %v58_v11 = vunpack.c.0.s8 %v57_v9  ;;  %v288_v20 = vunpack.c.l.bf16 %v287_v13  ;;  %v289_v21 = vunpack.c.h.bf16 %v287_v13  ;;  %v361_v26 = vld [vmem:[%s458_s0 + $0x20] sm:$0xff]   ;;  %v418_v27 = vld [vmem:[%s458_s0 + $0x28] sm:$0xff]   ;;  %v293_v28 = vunpack.c.h.bf16 %v358_v16  ;;  %v363_v32 = vld [vmem:[%s458_s0 + $0x30] sm:$0xff]  }
   0x4   :  { %v48_v4 = vmul.f32 %v44_v2, %v44_v2  ;;  %v53_v14 = vsub.f32 0.0, %v44_v2  ;;  %v80_v24 = vsub.s32 0, %v60_v12  ;;  %v296_v29 = vunpack.c.l.bf16 %v359_v17  ;;  %v364_v37 = vld [vmem:[%s458_s0 + $0x38] sm:$0xff]  }
   0x5   :  { %v400_v15 = vsub.s32 %v58_v11, %v60_v12  ;;  %v297_v30 = vunpack.c.h.bf16 %v359_v17  ;;  %v300_v31 = vunpack.c.l.bf16 %v360_v18  ;;  %v301_v35 = vunpack.c.h.bf16 %v360_v18 }
   0x6   :  { %v49_v5 = vsub.f32 %v47_v3, %v48_v4  ;;  %v304_v38 = vunpack.c.l.bf16 %v361_v26  ;;  %v305_v39 = vunpack.c.h.bf16 %v361_v26  ;;  %v308_v40 = vunpack.c.l.bf16 %v418_v27 }
   0x7   :  { %v309_v41 = vunpack.c.h.bf16 %v418_v27  ;;  %v312_v44 = vunpack.c.l.bf16 %v363_v32  ;;  %v313_v45 = vunpack.c.h.bf16 %v363_v32  ;;  %v316_v48 = vunpack.c.l.bf16 %v364_v37 }
   0x8   :  { %v50_v6 = vmax.f32 %v49_v5, 0.0  ;;  %v317_v49 = vunpack.c.h.bf16 %v364_v37 }
   0xa   :  { %v51_v7 = vadd.f32 1e-05, %v50_v6 }
   0xc   :  { %373 = vrsqrt.f32 %v51_v7 }
  0x16   :  { %v374_v19 = vpop.eup %373 }
  0x17   :  { %v54_v22 = vmul.f32 %v374_v19, %v53_v14  ;;  %v62_v23 = vrot.slane %v374_v19, %v400_v15 }
  0x19   :  { %v70_v33 = vrot.slane %v62_v23, %v400_v15  ;;  %v111_v34 = vrot.slane %v54_v22, %v400_v15  ;;  %v63_v36 = vcombine.high %v62_v23, %v62_v23 }
  0x1b   :  { %v81_v42 = vrot.slane %v70_v33, %v80_v24  ;;  %v119_v43 = vrot.slane %v111_v34, %v400_v15  ;;  %v77_v46 = vrot.slane %v63_v36, %v400_v15  ;;  %v112_v47 = vcombine.high %v111_v34, %v111_v34 }
  0x1d   :  { %v88_v50 = vmul.f32 %v288_v20, %v81_v42  ;;  %v89_v51 = vmul.f32 %v289_v21, %v81_v42  ;;  %v130_v52 = vrot.slane %v119_v43, %v80_v24  ;;  %v90_v53 = vmul.f32 %v292_v25, %v81_v42 }
  0x1e   :  { %v91_v54 = vmul.f32 %v293_v28, %v81_v42  ;;  %v92_v55 = vmul.f32 %v296_v29, %v81_v42  ;;  %v93_v56 = vmul.f32 %v297_v30, %v81_v42  ;;  %v94_v57 = vmul.f32 %v300_v31, %v81_v42 }
  0x1f   :  { %v137_v58 = vadd.f32 %v130_v52, %v88_v50  ;;  %v138_v59 = vadd.f32 %v130_v52, %v89_v51  ;;  %v139_v60 = vadd.f32 %v130_v52, %v90_v53  ;;  %v95_v61 = vmul.f32 %v301_v35, %v81_v42 }
  0x20   :  { %v140_v62 = vadd.f32 %v130_v52, %v91_v54  ;;  %v141_v63 = vadd.f32 %v130_v52, %v92_v55  ;;  %v142_v0 = vadd.f32 %v130_v52, %v93_v56  ;;  %v143_v1 = vadd.f32 %v130_v52, %v94_v57 }
  0x21   :  { %v153_v2 = vmax.f32 %v137_v58, 0.0  ;;  %v154_v3 = vmax.f32 %v138_v59, 0.0  ;;  %v155_v4 = vmax.f32 %v139_v60, 0.0  ;;  %v144_v5 = vadd.f32 %v130_v52, %v95_v61 }
  0x22   :  { %v156_v6 = vmax.f32 %v140_v62, 0.0  ;;  %v157_v7 = vmax.f32 %v141_v63, 0.0  ;;  %v158_v8 = vmax.f32 %v142_v0, 0.0  ;;  %v159_v9 = vmax.f32 %v143_v1, 0.0 }
  0x23   :  { %v321_v10 = vpack.c.bf16 %v154_v3, %v153_v2  ;;  %v160_v11 = vmax.f32 %v144_v5, 0.0  ;;  %v85_v12 = vrot.slane %v77_v46, %v80_v24  ;;  %v126_v13 = vrot.slane %v112_v47, %v400_v15 }
  0x24   :  { %v326_v14 = vpack.c.bf16 %v156_v6, %v155_v4  ;;  %v331_v16 = vpack.c.bf16 %v158_v8, %v157_v7 }
  0x25   :  { %322 = vst [vmem:[%s459_s2] sm:$0xff] %v321_v10   ;;  %v336_v17 = vpack.c.bf16 %v160_v11, %v159_v9  ;;  %v96_v18 = vmul.f32 %v304_v38, %v85_v12  ;;  %v97_v19 = vmul.f32 %v305_v39, %v85_v12  ;;  %v134_v20 = vrot.slane %v126_v13, %v80_v24 }
  0x26   :  { %365 = vst [vmem:[%s459_s2 + $0x8] sm:$0xff] %v326_v14   ;;  %366 = vst [vmem:[%s459_s2 + $0x10] sm:$0xff] %v331_v16   ;;  %v98_v21 = vmul.f32 %v308_v40, %v85_v12  ;;  %v99_v15 = vmul.f32 %v309_v41, %v85_v12  ;;  %v100_v22 = vmul.f32 %v312_v44, %v85_v12 }
  0x27   :  { %v101_v23 = vmul.f32 %v313_v45, %v85_v12  ;;  %367 = vst [vmem:[%s459_s2 + $0x18] sm:$0xff] %v336_v17   ;;  %v145_v25 = vadd.f32 %v134_v20, %v96_v18  ;;  %v146_v26 = vadd.f32 %v134_v20, %v97_v19  ;;  %v102_v27 = vmul.f32 %v316_v48, %v85_v12 }
  0x28   :  { %v103_v24 = vmul.f32 %v317_v49, %v85_v12  ;;  %v147_v28 = vadd.f32 %v134_v20, %v98_v21  ;;  %v148_v29 = vadd.f32 %v134_v20, %v99_v15  ;;  %v149_v30 = vadd.f32 %v134_v20, %v100_v22 }
  0x29   :  { %v150_v31 = vadd.f32 %v134_v20, %v101_v23  ;;  %v161_v32 = vmax.f32 %v145_v25, 0.0  ;;  %v162_v33 = vmax.f32 %v146_v26, 0.0  ;;  %v151_v34 = vadd.f32 %v134_v20, %v102_v27 }
  0x2a   :  { %v152_v35 = vadd.f32 %v134_v20, %v103_v24  ;;  %v163_v36 = vmax.f32 %v147_v28, 0.0  ;;  %v164_v37 = vmax.f32 %v148_v29, 0.0  ;;  %v165_v38 = vmax.f32 %v149_v30, 0.0 }
  0x2b   :  { %v166_v39 = vmax.f32 %v150_v31, 0.0  ;;  %v341_v40 = vpack.c.bf16 %v162_v33, %v161_v32  ;;  %v167_v41 = vmax.f32 %v151_v34, 0.0 }
  0x2c   :  { %v168_v42 = vmax.f32 %v152_v35, 0.0  ;;  %v346_v43 = vpack.c.bf16 %v164_v37, %v163_v36 }
  0x2d   :  { %v351_v44 = vpack.c.bf16 %v166_v39, %v165_v38  ;;  %368 = vst [vmem:[%s459_s2 + $0x20] sm:$0xff] %v341_v40  }
  0x2e   :  { %v356_v45 = vpack.c.bf16 %v168_v42, %v167_v41  ;;  %369 = vst [vmem:[%s459_s2 + $0x28] sm:$0xff] %v346_v43  }
  0x2f   :  { %370 = vst [vmem:[%s459_s2 + $0x30] sm:$0xff] %v351_v44  }
  0x30   :  { %371 = vst [vmem:[%s459_s2 + $0x38] sm:$0xff] %v356_v45  }

// kernel: g_downsample.11
= control target key start
LH: loop header
LB: loop body
LE: loop exit
PB: predicated region body
PF: predicated region fallthrough
CT: control target
= control target key end

     0   :  { %v133_v8 = vmov 1966171168   ;;  %v39_v10 = vlaneseq  ;;  %s191_s1 = inlined_call_operand.vmem [shape: f32[1,2,2,256], index: 1, kind: input, shape index: {}]   ;;  %s192_s0 = inlined_call_operand.vmem [shape: bf16[2,16,256], index: 0, kind: input, shape index: {}]   ;;  %s193_s2 = inlined_call_operand.vmem [shape: f32[2,16,256], index: 2, kind: output, shape index: {}]  }
   0x1   :  { %v23_v0 = vld [vmem:[%s191_s1] sm:$0xf]  ;;  %v129_v1 = vld [vmem:[%s191_s1 + $0x4] sm:$0xf]  ;;  %v37_v9 = vunpack.c.l.s4 %v133_v8  ;;  %v12_v18 = vld [vmem:[%s192_s0 + $0x8] sm:$0xff] }
   0x2   :  { %v24_v2 = vmul.f32 0.0625, %v23_v0  ;;  %v27_v3 = vmul.f32 0.0625, %v129_v1  ;;  %v40_v12 = vshrl.u32 %v39_v10, 7  ;;  %v11_v15 = vld [vmem:[%s192_s0] sm:$0xff]  ;;  %v13_v24 = vld [vmem:[%s192_s0 + $0x10] sm:$0xff]  ;;  %v14_v25 = vld [vmem:[%s192_s0 + $0x18] sm:$0xff]  ;;  %v17_v26 = vunpack.c.l.bf16 %v12_v18 }
   0x3   :  { %v38_v11 = vunpack.c.0.s8 %v37_v9  ;;  %v15_v20 = vunpack.c.l.bf16 %v11_v15  ;;  %v16_v23 = vunpack.c.h.bf16 %v11_v15  ;;  %v18_v27 = vunpack.c.h.bf16 %v12_v18 }
   0x4   :  { %v28_v4 = vmul.f32 %v24_v2, %v24_v2  ;;  %v33_v13 = vsub.f32 0.0, %v24_v2  ;;  %v46_v16 = vsub.s32 0, %v40_v12  ;;  %v50_v17 = vsub.s32 1, %v40_v12 }
   0x5   :  { %v41_v14 = vsub.s32 %v38_v11, %v40_v12  ;;  %v19_v32 = vunpack.c.l.bf16 %v13_v24  ;;  %v20_v33 = vunpack.c.h.bf16 %v13_v24  ;;  %v21_v34 = vunpack.c.l.bf16 %v14_v25 }
   0x6   :  { %v29_v5 = vsub.f32 %v27_v3, %v28_v4  ;;  %v22_v46 = vunpack.c.h.bf16 %v14_v25 }
   0x8   :  { %v30_v6 = vmax.f32 %v29_v5, 0.0 }
   0xa   :  { %v31_v7 = vadd.f32 1e-05, %v30_v6 }
   0xc   :  { %131 = vrsqrt.f32 %v31_v7 }
  0x16   :  { %v132_v19 = vpop.eup %131 }
  0x17   :  { %v34_v21 = vmul.f32 %v132_v19, %v33_v13  ;;  %v42_v22 = vrot.slane %v132_v19, %v41_v14 }
  0x19   :  { %v47_v28 = vrot.slane %v42_v22, %v46_v16  ;;  %v79_v29 = vrot.slane %v34_v21, %v41_v14  ;;  %v51_v30 = vrot.slane %v42_v22, %v50_v17  ;;  %v43_v31 = vcombine.high %v42_v22, %v42_v22 }
  0x1b   :  { %v64_v35 = vmul.f32 %v47_v28, %v15_v20  ;;  %v84_v36 = vrot.slane %v79_v29, %v46_v16  ;;  %v65_v37 = vmul.f32 %v51_v30, %v16_v23  ;;  %v88_v38 = vrot.slane %v79_v29, %v50_v17 }
  0x1c   :  { %v66_v39 = vmul.f32 %v47_v28, %v17_v26  ;;  %v67_v40 = vmul.f32 %v51_v30, %v18_v27  ;;  %v55_v41 = vrot.slane %v43_v31, %v46_v16  ;;  %v80_v42 = vcombine.high %v79_v29, %v79_v29 }
  0x1d   :  { %v101_v43 = vadd.f32 %v84_v36, %v64_v35  ;;  %v102_v44 = vadd.f32 %v88_v38, %v65_v37  ;;  %v59_v45 = vrot.slane %v43_v31, %v50_v17 }
  0x1e   :  { %v103_v47 = vadd.f32 %v84_v36, %v66_v39  ;;  %v104_v48 = vadd.f32 %v88_v38, %v67_v40  ;;  %v68_v49 = vmul.f32 %v55_v41, %v19_v32  ;;  %v92_v50 = vrot.slane %v80_v42, %v46_v16 }
  0x1f   :  { %v109_v51 = vmax.f32 %v101_v43, 0.0  ;;  %v110_v52 = vmax.f32 %v102_v44, 0.0  ;;  %v69_v53 = vmul.f32 %v59_v45, %v20_v33  ;;  %v96_v54 = vrot.slane %v80_v42, %v50_v17 }
  0x20   :  { %v111_v55 = vmax.f32 %v103_v47, 0.0  ;;  %v112_v56 = vmax.f32 %v104_v48, 0.0  ;;  %v105_v57 = vadd.f32 %v92_v50, %v68_v49  ;;  %v70_v58 = vmul.f32 %v55_v41, %v21_v34 }
  0x21   :  { %117 = vst [vmem:[%s193_s2] sm:$0xff] %v109_v51  ;;  %118 = vst [vmem:[%s193_s2 + $0x8] sm:$0xff] %v110_v52  ;;  %v106_v59 = vadd.f32 %v96_v54, %v69_v53  ;;  %v71_v60 = vmul.f32 %v59_v45, %v22_v46 }
  0x22   :  { %119 = vst [vmem:[%s193_s2 + $0x10] sm:$0xff] %v111_v55  ;;  %120 = vst [vmem:[%s193_s2 + $0x18] sm:$0xff] %v112_v56  ;;  %v113_v61 = vmax.f32 %v105_v57, 0.0  ;;  %v107_v62 = vadd.f32 %v92_v50, %v70_v58 }
  0x23   :  { %v114_v63 = vmax.f32 %v106_v59, 0.0  ;;  %v108_v0 = vadd.f32 %v96_v54, %v71_v60 }
  0x24   :  { %121 = vst [vmem:[%s193_s2 + $0x20] sm:$0xff] %v113_v61  ;;  %v115_v1 = vmax.f32 %v107_v62, 0.0 }
  0x25   :  { %122 = vst [vmem:[%s193_s2 + $0x28] sm:$0xff] %v114_v63  ;;  %v116_v2 = vmax.f32 %v108_v0, 0.0 }
  0x26   :  { %123 = vst [vmem:[%s193_s2 + $0x30] sm:$0xff] %v115_v1 }
  0x27   :  { %124 = vst [vmem:[%s193_s2 + $0x38] sm:$0xff] %v116_v2 }

// kernel: g_downsample.10
= control target key start
LH: loop header
LB: loop body
LE: loop exit
PB: predicated region body
PF: predicated region fallthrough
CT: control target
= control target key end

     0   :  { %vm1343_vm0 = vcmask 1041409   ;;  %vm1345_vm1 = vcmask 1043459   ;;  %vm1347_vm2 = vcmask 1045509   ;;  %vm1349_vm3 = vcmask 1047559   ;;  %s2439_s1 = inlined_call_operand.vmem [shape: bf16[1152,256], index: 1, kind: input, shape index: {}]   ;;  %s2440_s0 = inlined_call_operand.vmem [shape: bf16[2,16,1152], index: 0, kind: input, shape index: {}]   ;;  %s2441_s3 = inlined_call_operand.vmem [shape: f32[1,2,2,256], index: 3, kind: output, shape index: {1}]   ;;  %s2442_s2 = inlined_call_operand.vmem [shape: bf16[2,16,256], index: 2, kind: output, shape index: {0}]  }
   0x1   :  { %v1653_v0 = vld [vmem:[%s2439_s1 + $0x4] ss:$8 sps:$4 sm:$0xff]   ;;  %v1657_v2 = vld [vmem:[%s2439_s1] ss:$8 sps:$4 sm:$0xff]   ;;  %v1659_v4 = vld [vmem:[%s2439_s1 + $0x14] ss:$8 sps:$4 sm:$0xff]  }
   0x2   :  { %v1655_v1 = vld [vmem:[%s2439_s1 + $0x204] ss:$8 sps:$4 sm:$0xff]   ;;  %990 = vmatprep.subr.bf16.mxu1 %v1653_v0  ;;  %v1658_v3 = vld [vmem:[%s2439_s1 + $0x200] ss:$8 sps:$4 sm:$0xff]   ;;  %v1661_v5 = vld [vmem:[%s2439_s1 + $0x214] ss:$8 sps:$4 sm:$0xff]  }
   0x3   :  { %1096 = vmatprep.subr.bf16.mxu0 %v1655_v1  ;;  %991 = vmatpush1.bf16.msra.mxu1 %v1657_v2  ;;  %v1663_v6 = vld [vmem:[%s2439_s1 + $0x10] ss:$8 sps:$4 sm:$0xff]   ;;  %v1665_v8 = vld [vmem:[%s2439_s1 + $0x24] ss:$8 sps:$4 sm:$0xff]   ;;  %v1669_v10 = vld [vmem:[%s2439_s1 + $0x20] ss:$8 sps:$4 sm:$0xff]  }
   0x4   :  { %1097 = vmatpush1.bf16.msra.mxu0 %v1658_v3  ;;  %992 = vmatprep.subr.bf16.mxu1 %v1659_v4  ;;  %v1664_v7 = vld [vmem:[%s2439_s1 + $0x210] ss:$8 sps:$4 sm:$0xff]   ;;  %v1667_v9 = vld [vmem:[%s2439_s1 + $0x224] ss:$8 sps:$4 sm:$0xff]   ;;  %v1670_v11 = vld [vmem:[%s2439_s1 + $0x220] ss:$8 sps:$4 sm:$0xff]  }
   0x5   :  { %1098 = vmatprep.subr.bf16.mxu0 %v1661_v5  ;;  %v1671_v12 = vld [vmem:[%s2439_s1 + $0x34] ss:$8 sps:$4 sm:$0xff]   ;;  %v1675_v14 = vld [vmem:[%s2439_s1 + $0x30] ss:$8 sps:$4 sm:$0xff]   ;;  %v1677_v16 = vld [vmem:[%s2439_s1 + $0x44] ss:$8 sps:$4 sm:$0xff]  }
   0x6   :  { %v1673_v13 = vld [vmem:[%s2439_s1 + $0x234] ss:$8 sps:$4 sm:$0xff]   ;;  %v1676_v15 = vld [vmem:[%s2439_s1 + $0x230] ss:$8 sps:$4 sm:$0xff]   ;;  %v1679_v17 = vld [vmem:[%s2439_s1 + $0x244] ss:$8 sps:$4 sm:$0xff]  }
   0x7   :  { %993 = vmatpush1.bf16.msra.mxu1 %v1663_v6  ;;  %v1681_v18 = vld [vmem:[%s2439_s1 + $0x40] ss:$8 sps:$4 sm:$0xff]   ;;  %v1683_v20 = vld [vmem:[%s2439_s1 + $0x54] ss:$8 sps:$4 sm:$0xff]   ;;  %v1687_v22 = vld [vmem:[%s2439_s1 + $0x50] ss:$8 sps:$4 sm:$0xff]  }
   0x8   :  { %1099 = vmatpush1.bf16.msra.mxu0 %v1664_v7  ;;  %994 = vmatprep.subr.bf16.mxu1 %v1665_v8  ;;  %v1682_v19 = vld [vmem:[%s2439_s1 + $0x240] ss:$8 sps:$4 sm:$0xff]   ;;  %v1685_v21 = vld [vmem:[%s2439_s1 + $0x254] ss:$8 sps:$4 sm:$0xff]   ;;  %v1688_v23 = vld [vmem:[%s2439_s1 + $0x250] ss:$8 sps:$4 sm:$0xff]  }
   0x9   :  { %1100 = vmatprep.subr.bf16.mxu0 %v1667_v9  ;;  %v1689_v24 = vld [vmem:[%s2439_s1 + $0x64] ss:$8 sps:$4 sm:$0xff]   ;;  %v1693_v26 = vld [vmem:[%s2439_s1 + $0x60] ss:$8 sps:$4 sm:$0xff]   ;;  %v1695_v28 = vld [vmem:[%s2439_s1 + $0x74] ss:$8 sps:$4 sm:$0xff]  }
   0xa   :  { %v1691_v25 = vld [vmem:[%s2439_s1 + $0x264] ss:$8 sps:$4 sm:$0xff]   ;;  %v1694_v27 = vld [vmem:[%s2439_s1 + $0x260] ss:$8 sps:$4 sm:$0xff]   ;;  %v1697_v29 = vld [vmem:[%s2439_s1 + $0x274] ss:$8 sps:$4 sm:$0xff]  }
   0xb   :  { %995 = vmatpush1.bf16.msra.mxu1 %v1669_v10  ;;  %v1699_v30 = vld [vmem:[%s2439_s1 + $0x70] ss:$8 sps:$4 sm:$0xff]   ;;  %v1701_v32 = vld [vmem:[%s2439_s1 + $0x84] ss:$8 sps:$4 sm:$0xff]   ;;  %v1705_v34 = vld [vmem:[%s2439_s1 + $0x80] ss:$8 sps:$4 sm:$0xff]  }
   0xc   :  { %1101 = vmatpush1.bf16.msra.mxu0 %v1670_v11  ;;  %996 = vmatprep.subr.bf16.mxu1 %v1671_v12  ;;  %v1700_v31 = vld [vmem:[%s2439_s1 + $0x270] ss:$8 sps:$4 sm:$0xff]   ;;  %v1703_v33 = vld [vmem:[%s2439_s1 + $0x284] ss:$8 sps:$4 sm:$0xff]   ;;  %v1706_v35 = vld [vmem:[%s2439_s1 + $0x280] ss:$8 sps:$4 sm:$0xff]  }
   0xd   :  { %1102 = vmatprep.subr.bf16.mxu0 %v1673_v13  ;;  %v1707_v36 = vld [vmem:[%s2439_s1 + $0x94] ss:$8 sps:$4 sm:$0xff]   ;;  %v1711_v38 = vld [vmem:[%s2439_s1 + $0x90] ss:$8 sps:$4 sm:$0xff]   ;;  %v1713_v40 = vld [vmem:[%s2439_s1 + $0xa4] ss:$8 sps:$4 sm:$0xff]  }
   0xe   :  { %v1709_v37 = vld [vmem:[%s2439_s1 + $0x294] ss:$8 sps:$4 sm:$0xff]   ;;  %v1712_v39 = vld [vmem:[%s2439_s1 + $0x290] ss:$8 sps:$4 sm:$0xff]   ;;  %v1715_v41 = vld [vmem:[%s2439_s1 + $0x2a4] ss:$8 sps:$4 sm:$0xff]  }
   0xf   :  { %997 = vmatpush1.bf16.msra.mxu1 %v1675_v14  ;;  %v1717_v42 = vld [vmem:[%s2439_s1 + $0xa0] ss:$8 sps:$4 sm:$0xff]   ;;  %v1719_v44 = vld [vmem:[%s2439_s1 + $0xb4] ss:$8 sps:$4 sm:$0xff]   ;;  %v1723_v46 = vld [vmem:[%s2439_s1 + $0xb0] ss:$8 sps:$4 sm:$0xff]  }
  0x10   :  { %1103 = vmatpush1.bf16.msra.mxu0 %v1676_v15  ;;  %998 = vmatprep.subr.bf16.mxu1 %v1677_v16  ;;  %v1718_v43 = vld [vmem:[%s2439_s1 + $0x2a0] ss:$8 sps:$4 sm:$0xff]   ;;  %v1721_v45 = vld [vmem:[%s2439_s1 + $0x2b4] ss:$8 sps:$4 sm:$0xff]   ;;  %v1724_v47 = vld [vmem:[%s2439_s1 + $0x2b0] ss:$8 sps:$4 sm:$0xff]  }
  0x11   :  { %1104 = vmatprep.subr.bf16.mxu0 %v1679_v17  ;;  %v1751_v48 = vld [vmem:[%s2440_s0 + $0x4] ss:$36 sps:$4 sm:$0xff]   ;;  %v1757_v51 = vld [vmem:[%s2440_s0 + $0x14] ss:$36 sps:$4 sm:$0xff]  }
  0x12   :  { %v1725_v49 = vld [vmem:[%s2439_s1 + $0xc4] ss:$8 sps:$4 sm:$0xff]   ;;  %1022 = vmatprep.mubr.bf16.mxu1 %v1751_v48  ;;  %v1729_v52 = vld [vmem:[%s2439_s1 + $0xc0] ss:$8 sps:$4 sm:$0xff]   ;;  %v1731_v54 = vld [vmem:[%s2439_s1 + $0xd4] ss:$8 sps:$4 sm:$0xff]   ;;  %1128 = vmatprep.mubr.bf16.mxu0 %v1757_v51 }
  0x13   :  { %999 = vmatpush1.bf16.msra.mxu1 %v1681_v18  ;;  %v1727_v50 = vld [vmem:[%s2439_s1 + $0x2c4] ss:$8 sps:$4 sm:$0xff]   ;;  %v1730_v53 = vld [vmem:[%s2439_s1 + $0x2c0] ss:$8 sps:$4 sm:$0xff]   ;;  %v1733_v55 = vld [vmem:[%s2439_s1 + $0x2d4] ss:$8 sps:$4 sm:$0xff]  }
  0x14   :  { %1105 = vmatpush1.bf16.msra.mxu0 %v1682_v19  ;;  %1000 = vmatprep.subr.bf16.mxu1 %v1683_v20  ;;  %v1735_v56 = vld [vmem:[%s2439_s1 + $0xd0] ss:$8 sps:$4 sm:$0xff]   ;;  %v1737_v58 = vld [vmem:[%s2439_s1 + $0xe4] ss:$8 sps:$4 sm:$0xff]   ;;  %v1741_v60 = vld [vmem:[%s2439_s1 + $0xe0] ss:$8 sps:$4 sm:$0xff]  }
  0x15   :  { %1106 = vmatprep.subr.bf16.mxu0 %v1685_v21  ;;  %v1736_v57 = vld [vmem:[%s2439_s1 + $0x2d0] ss:$8 sps:$4 sm:$0xff]   ;;  %v1739_v59 = vld [vmem:[%s2439_s1 + $0x2e4] ss:$8 sps:$4 sm:$0xff]   ;;  %v1742_v61 = vld [vmem:[%s2439_s1 + $0x2e0] ss:$8 sps:$4 sm:$0xff]  }
  0x16   :  { %v1743_v62 = vld [vmem:[%s2439_s1 + $0xf4] ss:$8 sps:$4 sm:$0xff]   ;;  %v1747_v0 = vld [vmem:[%s2439_s1 + $0xf0] ss:$8 sps:$4 sm:$0xff]   ;;  %v1754_v2 = vld [vmem:[%s2439_s1 + $0x104] ss:$8 sps:$4 sm:$0xff]  }
  0x17   :  { %1001 = vmatpush1.bf16.msra.mxu1 %v1687_v22  ;;  %v1745_v63 = vld [vmem:[%s2439_s1 + $0x2f4] ss:$8 sps:$4 sm:$0xff]   ;;  %v1748_v1 = vld [vmem:[%s2439_s1 + $0x2f0] ss:$8 sps:$4 sm:$0xff]   ;;  %v1760_v3 = vld [vmem:[%s2439_s1 + $0x304] ss:$8 sps:$4 sm:$0xff]  }
  0x18   :  { %1107 = vmatpush1.bf16.msra.mxu0 %v1688_v23  ;;  %1002 = vmatprep.subr.bf16.mxu1 %v1689_v24  ;;  %v1749_v4 = vld [vmem:[%s2440_s0] ss:$36 sps:$4 sm:$0xff]   ;;  %v1755_v6 = vld [vmem:[%s2440_s0 + $0x10] ss:$36 sps:$4 sm:$0xff]  }
  0x19   :  { %1108 = vmatprep.subr.bf16.mxu0 %v1691_v25  ;;  %v1752_v5 = vld [vmem:[%s2439_s1 + $0x100] ss:$8 sps:$4 sm:$0xff]   ;;  %v1763_v8 = vld [vmem:[%s2439_s1 + $0x114] ss:$8 sps:$4 sm:$0xff]   ;;  %v1761_v10 = vld [vmem:[%s2439_s1 + $0x110] ss:$8 sps:$4 sm:$0xff]  }
  0x1a   :  { %v1758_v7 = vld [vmem:[%s2439_s1 + $0x300] ss:$8 sps:$4 sm:$0xff]   ;;  %v1766_v9 = vld [vmem:[%s2439_s1 + $0x314] ss:$8 sps:$4 sm:$0xff]   ;;  %v1764_v11 = vld [vmem:[%s2439_s1 + $0x310] ss:$8 sps:$4 sm:$0xff]  }
  0x1b   :  { %1003 = vmatpush1.bf16.msra.mxu1 %v1693_v26  ;;  %v1769_v12 = vld [vmem:[%s2439_s1 + $0x124] ss:$8 sps:$4 sm:$0xff]   ;;  %v1767_v14 = vld [vmem:[%s2439_s1 + $0x120] ss:$8 sps:$4 sm:$0xff]   ;;  %v1775_v16 = vld [vmem:[%s2439_s1 + $0x134] ss:$8 sps:$4 sm:$0xff]  }
  0x1c   :  { %1109 = vmatpush1.bf16.msra.mxu0 %v1694_v27  ;;  %1004 = vmatprep.subr.bf16.mxu1 %v1695_v28  ;;  %v1772_v13 = vld [vmem:[%s2439_s1 + $0x324] ss:$8 sps:$4 sm:$0xff]   ;;  %v1770_v15 = vld [vmem:[%s2439_s1 + $0x320] ss:$8 sps:$4 sm:$0xff]   ;;  %v1778_v17 = vld [vmem:[%s2439_s1 + $0x334] ss:$8 sps:$4 sm:$0xff]  }
  0x1d   :  { %1110 = vmatprep.subr.bf16.mxu0 %v1697_v29  ;;  %v1773_v18 = vld [vmem:[%s2439_s1 + $0x130] ss:$8 sps:$4 sm:$0xff]   ;;  %v1781_v20 = vld [vmem:[%s2439_s1 + $0x144] ss:$8 sps:$4 sm:$0xff]   ;;  %v1779_v22 = vld [vmem:[%s2439_s1 + $0x140] ss:$8 sps:$4 sm:$0xff]  }
  0x1e   :  { %v1776_v19 = vld [vmem:[%s2439_s1 + $0x330] ss:$8 sps:$4 sm:$0xff]   ;;  %v1784_v21 = vld [vmem:[%s2439_s1 + $0x344] ss:$8 sps:$4 sm:$0xff]   ;;  %v1782_v23 = vld [vmem:[%s2439_s1 + $0x340] ss:$8 sps:$4 sm:$0xff]  }
  0x1f   :  { %1005 = vmatpush1.bf16.msra.mxu1 %v1699_v30  ;;  %v1787_v24 = vld [vmem:[%s2439_s1 + $0x154] ss:$8 sps:$4 sm:$0xff]   ;;  %v1785_v26 = vld [vmem:[%s2439_s1 + $0x150] ss:$8 sps:$4 sm:$0xff]   ;;  %v1793_v28 = vld [vmem:[%s2439_s1 + $0x164] ss:$8 sps:$4 sm:$0xff]  }
  0x20   :  { %1111 = vmatpush1.bf16.msra.mxu0 %v1700_v31  ;;  %1006 = vmatprep.subr.bf16.mxu1 %v1701_v32  ;;  %v1790_v25 = vld [vmem:[%s2439_s1 + $0x354] ss:$8 sps:$4 sm:$0xff]   ;;  %v1788_v27 = vld [vmem:[%s2439_s1 + $0x350] ss:$8 sps:$4 sm:$0xff]   ;;  %v1843_v31 = vld [vmem:[%s2440_s0 + $0x48] ss:$36 sps:$4 sm:$0xff]  }
  0x21   :  { %1112 = vmatprep.subr.bf16.mxu0 %v1703_v33  ;;  %v1839_v29 = vld [vmem:[%s2440_s0 + $0x4c] ss:$36 sps:$4 sm:$0xff]   ;;  %v1841_v30 = vld [vmem:[%s2440_s0 + $0x5c] ss:$36 sps:$4 sm:$0xff]  }
  0x22   :  { %v1796_v32 = vld [vmem:[%s2439_s1 + $0x364] ss:$8 sps:$4 sm:$0xff]   ;;  %v1847_v33 = vld [vmem:[%s2440_s0 + $0x58] ss:$36 sps:$4 sm:$0xff]  }
  0x23   :  { %1007 = vmatpush1.bf16.msra.mxu1 %v1705_v34  ;;  %v1791_v34 = vld [vmem:[%s2439_s1 + $0x160] ss:$8 sps:$4 sm:$0xff]   ;;  %v1809_v48 = vld [vmem:[%s2439_s1 + $0x190] ss:$8 sps:$4 sm:$0xff]   ;;  %v1820_v51 = vld [vmem:[%s2439_s1 + $0x3a4] ss:$8 sps:$4 sm:$0xff]  }
  0x24   :  { %1113 = vmatpush1.bf16.msra.mxu0 %v1706_v35  ;;  %1008 = vmatprep.subr.bf16.mxu1 %v1707_v36  ;;  %v1794_v35 = vld [vmem:[%s2439_s1 + $0x360] ss:$8 sps:$4 sm:$0xff]   ;;  %v1799_v36 = vld [vmem:[%s2439_s1 + $0x174] ss:$8 sps:$4 sm:$0xff]  }
  0x25   :  { %1114 = vmatprep.subr.bf16.mxu0 %v1709_v37  ;;  %v1802_v37 = vld [vmem:[%s2439_s1 + $0x374] ss:$8 sps:$4 sm:$0xff]  }
  0x27   :  { %1009 = vmatpush1.bf16.msra.mxu1 %v1711_v38  ;;  %v1797_v38 = vld [vmem:[%s2439_s1 + $0x170] ss:$8 sps:$4 sm:$0xff]  }
  0x28   :  { %1115 = vmatpush1.bf16.msra.mxu0 %v1712_v39  ;;  %1010 = vmatprep.subr.bf16.mxu1 %v1713_v40  ;;  %v1800_v39 = vld [vmem:[%s2439_s1 + $0x370] ss:$8 sps:$4 sm:$0xff]   ;;  %v1805_v40 = vld [vmem:[%s2439_s1 + $0x184] ss:$8 sps:$4 sm:$0xff]  }
  0x29   :  { %1116 = vmatprep.subr.bf16.mxu0 %v1715_v41  ;;  %v1859_v41 = vld [vmem:[%s2440_s0 + $0xc] ss:$36 sps:$4 sm:$0xff]  }
  0x2b   :  { %1011 = vmatpush1.bf16.msra.mxu1 %v1717_v42  ;;  %v1808_v42 = vld [vmem:[%s2439_s1 + $0x384] ss:$8 sps:$4 sm:$0xff]  }
  0x2c   :  { %1117 = vmatpush1.bf16.msra.mxu0 %v1718_v43  ;;  %1012 = vmatprep.subr.bf16.mxu1 %v1719_v44  ;;  %v1862_v43 = vld [vmem:[%s2440_s0 + $0x1c] ss:$36 sps:$4 sm:$0xff]  }
  0x2d   :  { %1118 = vmatprep.subr.bf16.mxu0 %v1721_v45  ;;  %v1803_v44 = vld [vmem:[%s2439_s1 + $0x180] ss:$8 sps:$4 sm:$0xff]  }
  0x2e   :  { %v1806_v45 = vld [vmem:[%s2439_s1 + $0x380] ss:$8 sps:$4 sm:$0xff]  }
  0x2f   :  { %1013 = vmatpush1.bf16.msra.mxu1 %v1723_v46  ;;  %v1811_v46 = vld [vmem:[%s2439_s1 + $0x194] ss:$8 sps:$4 sm:$0xff]  }
  0x30   :  { %1119 = vmatpush1.bf16.msra.mxu0 %v1724_v47  ;;  %1014 = vmatprep.subr.bf16.mxu1 %v1725_v49  ;;  %v1814_v47 = vld [vmem:[%s2439_s1 + $0x394] ss:$8 sps:$4 sm:$0xff]   ;;  %v1812_v49 = vld [vmem:[%s2439_s1 + $0x390] ss:$8 sps:$4 sm:$0xff]  }
  0x31   :  { %1120 = vmatprep.subr.bf16.mxu0 %v1727_v50  ;;  %v1817_v50 = vld [vmem:[%s2439_s1 + $0x1a4] ss:$8 sps:$4 sm:$0xff]  }
  0x33   :  { %1015 = vmatpush1.bf16.msra.mxu1 %v1729_v52  ;;  %v1815_v52 = vld [vmem:[%s2439_s1 + $0x1a0] ss:$8 sps:$4 sm:$0xff]  }
  0x34   :  { %1121 = vmatpush1.bf16.msra.mxu0 %v1730_v53  ;;  %1016 = vmatprep.subr.bf16.mxu1 %v1731_v54  ;;  %v1818_v53 = vld [vmem:[%s2439_s1 + $0x3a0] ss:$8 sps:$4 sm:$0xff]   ;;  %v1823_v54 = vld [vmem:[%s2439_s1 + $0x1b4] ss:$8 sps:$4 sm:$0xff]  }
  0x35   :  { %1122 = vmatprep.subr.bf16.mxu0 %v1733_v55  ;;  %v1826_v55 = vld [vmem:[%s2439_s1 + $0x3b4] ss:$8 sps:$4 sm:$0xff]  }
  0x37   :  { %1017 = vmatpush1.bf16.msra.mxu1 %v1735_v56  ;;  %v1821_v56 = vld [vmem:[%s2439_s1 + $0x1b0] ss:$8 sps:$4 sm:$0xff]  }
  0x38   :  { %1123 = vmatpush1.bf16.msra.mxu0 %v1736_v57  ;;  %1018 = vmatprep.subr.bf16.mxu1 %v1737_v58  ;;  %v1824_v57 = vld [vmem:[%s2439_s1 + $0x3b0] ss:$8 sps:$4 sm:$0xff]   ;;  %v1829_v58 = vld [vmem:[%s2439_s1 + $0x1c4] ss:$8 sps:$4 sm:$0xff]  }
  0x39   :  { %1124 = vmatprep.subr.bf16.mxu0 %v1739_v59  ;;  %v1832_v59 = vld [vmem:[%s2439_s1 + $0x3c4] ss:$8 sps:$4 sm:$0xff]  }
  0x3b   :  { %1019 = vmatpush1.bf16.msra.mxu1 %v1741_v60  ;;  %v1827_v60 = vld [vmem:[%s2439_s1 + $0x1c0] ss:$8 sps:$4 sm:$0xff]  }
  0x3c   :  { %1125 = vmatpush1.bf16.msra.mxu0 %v1742_v61  ;;  %1020 = vmatprep.subr.bf16.mxu1 %v1743_v62  ;;  %v1830_v61 = vld [vmem:[%s2439_s1 + $0x3c0] ss:$8 sps:$4 sm:$0xff]   ;;  %v1835_v62 = vld [vmem:[%s2439_s1 + $0x1d4] ss:$8 sps:$4 sm:$0xff]  }
  0x3d   :  { %1126 = vmatprep.subr.bf16.mxu0 %v1745_v63  ;;  %v1838_v63 = vld [vmem:[%s2439_s1 + $0x3d4] ss:$8 sps:$4 sm:$0xff]  }
  0x3f   :  { %1021 = vmatpush1.bf16.msra.mxu1 %v1747_v0  ;;  %v1833_v0 = vld [vmem:[%s2439_s1 + $0x1d0] ss:$8 sps:$4 sm:$0xff]  }
  0x40   :  { %1127 = vmatpush1.bf16.msra.mxu0 %v1748_v1  ;;  %1043 = vmatprep.subr.bf16.mxu1 %v1754_v2  ;;  %v1836_v1 = vld [vmem:[%s2439_s1 + $0x3d0] ss:$8 sps:$4 sm:$0xff]   ;;  %v1846_v2 = vld [vmem:[%s2439_s1 + $0x1e4] ss:$8 sps:$4 sm:$0xff]  }
  0x41   :  { %1149 = vmatprep.subr.bf16.mxu0 %v1760_v3  ;;  %v1850_v3 = vld [vmem:[%s2439_s1 + $0x3e4] ss:$8 sps:$4 sm:$0xff]  }
  0x42   :  { %1023 = vmatmul.mubr.bf16.vlgmr.msra.gmra.mrb[0].mxu1 %v1749_v4  ;;  %v1844_v4 = vld [vmem:[%s2439_s1 + $0x1e0] ss:$8 sps:$4 sm:$0xff]  }
  0x43   :  { %1129 = vmatmul.mubr.bf16.vlgmr.msra.gmra.mrb[0].mxu0 %v1755_v6  ;;  %1044 = vmatpush1.bf16.msra.mxu1 %v1752_v5  ;;  %v1848_v5 = vld [vmem:[%s2439_s1 + $0x3e0] ss:$8 sps:$4 sm:$0xff]   ;;  %v1853_v6 = vld [vmem:[%s2439_s1 + $0x1f4] ss:$8 sps:$4 sm:$0xff]  }
  0x44   :  { %1150 = vmatpush1.bf16.msra.mxu0 %v1758_v7  ;;  %1045 = vmatprep.subr.bf16.mxu1 %v1763_v8  ;;  %v1856_v7 = vld [vmem:[%s2439_s1 + $0x3f4] ss:$8 sps:$4 sm:$0xff]   ;;  %v1851_v8 = vld [vmem:[%s2439_s1 + $0x1f0] ss:$8 sps:$4 sm:$0xff]  }
  0x45   :  { %1151 = vmatprep.subr.bf16.mxu0 %v1766_v9  ;;  %1032 = vmatprep.mubr.bf16.mxu1 %v1839_v29  ;;  %v1854_v9 = vld [vmem:[%s2439_s1 + $0x3f0] ss:$8 sps:$4 sm:$0xff]   ;;  %v1889_v29 = vld [vmem:[%s2439_s1 + $0x464] ss:$8 sps:$4 sm:$0xff]  }
  0x46   :  { %1138 = vmatprep.mubr.bf16.mxu0 %v1841_v30  ;;  %v1887_v30 = vld [vmem:[%s2439_s1 + $0x460] ss:$8 sps:$4 sm:$0xff]  }
  0x47   :  { %1046 = vmatpush1.bf16.msra.mxu1 %v1761_v10  ;;  %v1865_v10 = vld [vmem:[%s2439_s1 + $0x404] ss:$8 sps:$4 sm:$0xff]  }
  0x48   :  { %1152 = vmatpush1.bf16.msra.mxu0 %v1764_v11  ;;  %1047 = vmatprep.subr.bf16.mxu1 %v1769_v12  ;;  %v1857_v11 = vld [vmem:[%s2440_s0 + $0x8] ss:$36 sps:$4 sm:$0xff]   ;;  %v1860_v12 = vld [vmem:[%s2440_s0 + $0x18] ss:$36 sps:$4 sm:$0xff]  }
  0x49   :  { %1153 = vmatprep.subr.bf16.mxu0 %v1772_v13  ;;  %v1863_v13 = vld [vmem:[%s2439_s1 + $0x400] ss:$8 sps:$4 sm:$0xff]  }
  0x4a   :  { %1033 = vmatmul.mubr.bf16.gmra.mrb[4].mxu1 %v1843_v31  ;;  %v1892_v31 = vld [vmem:[%s2439_s1 + $0x474] ss:$8 sps:$4 sm:$0xff]  }
  0x4b   :  { %1048 = vmatpush1.bf16.msra.mxu1 %v1767_v14  ;;  %1139 = vmatmul.mubr.bf16.gmra.mrb[4].mxu0 %v1847_v33  ;;  %v1868_v14 = vld [vmem:[%s2439_s1 + $0x414] ss:$8 sps:$4 sm:$0xff]   ;;  %v1893_v33 = vld [vmem:[%s2440_s0 + $0x20] ss:$36 sps:$4 sm:$0xff]  }
  0x4c   :  { %1154 = vmatpush1.bf16.msra.mxu0 %v1770_v15  ;;  %1049 = vmatprep.subr.bf16.mxu1 %v1775_v16  ;;  %v1869_v15 = vld [vmem:[%s2440_s0 + $0x54] ss:$36 sps:$4 sm:$0xff]   ;;  %v1871_v16 = vld [vmem:[%s2440_s0 + $0x64] ss:$36 sps:$4 sm:$0xff]  }
  0x4d   :  { %1155 = vmatprep.subr.bf16.mxu0 %v1778_v17  ;;  %1075 = vmatprep.mubr.bf16.mxu1 %v1859_v41  ;;  %v1866_v17 = vld [vmem:[%s2439_s1 + $0x410] ss:$8 sps:$4 sm:$0xff]  }
  0x4e   :  { %1181 = vmatprep.mubr.bf16.mxu0 %v1862_v43 }
  0x4f   :  { %1050 = vmatpush1.bf16.msra.mxu1 %v1773_v18  ;;  %v1877_v18 = vld [vmem:[%s2439_s1 + $0x424] ss:$8 sps:$4 sm:$0xff]  }
  0x50   :  { %1156 = vmatpush1.bf16.msra.mxu0 %v1776_v19  ;;  %1051 = vmatprep.subr.bf16.mxu1 %v1781_v20  ;;  %v1873_v19 = vld [vmem:[%s2440_s0 + $0x50] ss:$36 sps:$4 sm:$0xff]   ;;  %v1874_v20 = vld [vmem:[%s2440_s0 + $0x60] ss:$36 sps:$4 sm:$0xff]  }
  0x51   :  { %1157 = vmatprep.subr.bf16.mxu0 %v1784_v21  ;;  %v1875_v21 = vld [vmem:[%s2439_s1 + $0x420] ss:$8 sps:$4 sm:$0xff]  }
  0x53   :  { %1052 = vmatpush1.bf16.msra.mxu1 %v1779_v22  ;;  %v1880_v22 = vld [vmem:[%s2439_s1 + $0x434] ss:$8 sps:$4 sm:$0xff]  }
  0x54   :  { %1158 = vmatpush1.bf16.msra.mxu0 %v1782_v23  ;;  %1053 = vmatprep.subr.bf16.mxu1 %v1787_v24  ;;  %v1878_v23 = vld [vmem:[%s2439_s1 + $0x430] ss:$8 sps:$4 sm:$0xff]   ;;  %v1883_v24 = vld [vmem:[%s2439_s1 + $0x444] ss:$8 sps:$4 sm:$0xff]  }
  0x55   :  { %1159 = vmatprep.subr.bf16.mxu0 %v1790_v25  ;;  %v1895_v25 = vmov 0  }
  0x57   :  { %1054 = vmatpush1.bf16.msra.mxu1 %v1785_v26  ;;  %v1881_v26 = vld [vmem:[%s2439_s1 + $0x440] ss:$8 sps:$4 sm:$0xff]  }
  0x58   :  { %1160 = vmatpush1.bf16.msra.mxu0 %v1788_v27  ;;  %1055 = vmatprep.subr.bf16.mxu1 %v1793_v28  ;;  %v1886_v27 = vld [vmem:[%s2439_s1 + $0x454] ss:$8 sps:$4 sm:$0xff]   ;;  %v1884_v28 = vld [vmem:[%s2439_s1 + $0x450] ss:$8 sps:$4 sm:$0xff]  }
  0x59   :  { %1161 = vmatprep.subr.bf16.mxu0 %v1796_v32  ;;  %v1890_v32 = vld [vmem:[%s2439_s1 + $0x470] ss:$8 sps:$4 sm:$0xff]  }
  0x5b   :  { %1056 = vmatpush1.bf16.msra.mxu1 %v1791_v34  ;;  %v1894_v34 = vld [vmem:[%s2440_s0 + $0x68] ss:$36 sps:$4 sm:$0xff]  }
  0x5c   :  { %1162 = vmatpush1.bf16.msra.mxu0 %v1794_v35  ;;  %1057 = vmatprep.subr.bf16.mxu1 %v1799_v36  ;;  %v1896_v35 = vmov 0.0  }
  0x5d   :  { %1163 = vmatprep.subr.bf16.mxu0 %v1802_v37  ;;  %1287 = vst [vmem:[%s2441_s3] sm:$0xf] %v1896_v35  ;;  %1288 = vst [vmem:[%s2441_s3 + $0x4] sm:$0xf] %v1896_v35 }
  0x5f   :  { %1058 = vmatpush1.bf16.msra.mxu1 %v1797_v38 }
  0x60   :  { %1164 = vmatpush1.bf16.msra.mxu0 %v1800_v39  ;;  %1059 = vmatprep.subr.bf16.mxu1 %v1805_v40 }
  0x61   :  { %1165 = vmatprep.subr.bf16.mxu0 %v1808_v42 }
  0x63   :  { %1060 = vmatpush1.bf16.msra.mxu1 %v1803_v44 }
  0x64   :  { %1166 = vmatpush1.bf16.msra.mxu0 %v1806_v45  ;;  %1061 = vmatprep.subr.bf16.mxu1 %v1811_v46 }
  0x65   :  { %1167 = vmatprep.subr.bf16.mxu0 %v1814_v47 }
  0x67   :  { %1062 = vmatpush1.bf16.msra.mxu1 %v1809_v48 }
  0x68   :  { %1168 = vmatpush1.bf16.msra.mxu0 %v1812_v49  ;;  %1063 = vmatprep.subr.bf16.mxu1 %v1817_v50 }
  0x69   :  { %1169 = vmatprep.subr.bf16.mxu0 %v1820_v51 }
  0x6b   :  { %1064 = vmatpush1.bf16.msra.mxu1 %v1815_v52  ;;  %v1897_v52 = vmov 1983009808  }
  0x6c   :  { %1170 = vmatpush1.bf16.msra.mxu0 %v1818_v53  ;;  %1065 = vmatprep.subr.bf16.mxu1 %v1823_v54  ;;  %v2410_v53 = vunpack.c.l.s4 %v1897_v52 }
  0x6d   :  { %1171 = vmatprep.subr.bf16.mxu0 %v1826_v55 }
  0x6f   :  { %1066 = vmatpush1.bf16.msra.mxu1 %v1821_v56 }
  0x70   :  { %1172 = vmatpush1.bf16.msra.mxu0 %v1824_v57  ;;  %1067 = vmatprep.subr.bf16.mxu1 %v1829_v58 }
  0x71   :  { %1173 = vmatprep.subr.bf16.mxu0 %v1832_v59 }
  0x73   :  { %1068 = vmatpush1.bf16.msra.mxu1 %v1827_v60 }
  0x74   :  { %1174 = vmatpush1.bf16.msra.mxu0 %v1830_v61  ;;  %1069 = vmatprep.subr.bf16.mxu1 %v1835_v62 }
  0x75   :  { %1175 = vmatprep.subr.bf16.mxu0 %v1838_v63 }
  0x77   :  { %1070 = vmatpush1.bf16.msra.mxu1 %v1833_v0 }
  0x78   :  { %1176 = vmatpush1.bf16.msra.mxu0 %v1836_v1  ;;  %1071 = vmatprep.subr.bf16.mxu1 %v1846_v2 }
  0x79   :  { %1177 = vmatprep.subr.bf16.mxu0 %v1850_v3  ;;  %v1325_v3 = vunpack.c.0.s8 %v2410_v53 }
  0x7b   :  { %1072 = vmatpush1.bf16.msra.mxu1 %v1844_v4  ;;  %v1326_v4 = vlaneseq }
  0x7c   :  { %1178 = vmatpush1.bf16.msra.mxu0 %v1848_v5  ;;  %1073 = vmatprep.subr.bf16.mxu1 %v1853_v6 }
  0x7d   :  { %1179 = vmatprep.subr.bf16.mxu0 %v1856_v7 }
  0x7f   :  { %1074 = vmatpush1.bf16.msra.mxu1 %v1851_v8 }
  0x80   :  { %1180 = vmatpush1.bf16.msra.mxu0 %v1854_v9  ;;  %1602 = vmatprep.subr.bf16.mxu1 %v1865_v10 }
  0x81   :  { %1202 = vmatprep.subr.bf16.mxu0 %v1865_v10 }
  0x82   :  { %1076 = vmatmul.mubr.bf16.vlgmr.msra.gmra.mrb[0].mxu1 %v1857_v11 }
  0x83   :  { %1182 = vmatmul.mubr.bf16.vlgmr.msra.gmra.mrb[0].mxu0 %v1860_v12  ;;  %1610 = vmatpush1.bf16.msra.mxu1 %v1863_v13 }
  0x84   :  { %1203 = vmatpush1.bf16.msra.mxu0 %v1863_v13  ;;  %1603 = vmatprep.subr.bf16.mxu1 %v1868_v14 }
  0x85   :  { %1204 = vmatprep.subr.bf16.mxu0 %v1868_v14  ;;  %1085 = vmatprep.mubr.bf16.mxu1 %v1869_v15 }
  0x86   :  { %1191 = vmatprep.mubr.bf16.mxu0 %v1871_v16 }
  0x87   :  { %1611 = vmatpush1.bf16.msra.mxu1 %v1866_v17 }
  0x88   :  { %1205 = vmatpush1.bf16.msra.mxu0 %v1866_v17  ;;  %1604 = vmatprep.subr.bf16.mxu1 %v1877_v18 }
  0x89   :  { %1206 = vmatprep.subr.bf16.mxu0 %v1877_v18 }
  0x8a   :  { %1086 = vmatmul.mubr.bf16.gmra.mrb[4].mxu1 %v1873_v19 }
  0x8b   :  { %1192 = vmatmul.mubr.bf16.gmra.mrb[4].mxu0 %v1874_v20  ;;  %1612 = vmatpush1.bf16.msra.mxu1 %v1875_v21 }
  0x8c   :  { %1207 = vmatpush1.bf16.msra.mxu0 %v1875_v21  ;;  %1605 = vmatprep.subr.bf16.mxu1 %v1880_v22 }
  0x8d   :  { %1208 = vmatprep.subr.bf16.mxu0 %v1880_v22  ;;  %1234 = vmatprep.mubr.bf16.mxu0 %v1895_v25 }
  0x8e   :  { %1244 = vmatprep.mubr.bf16.mxu1 %v1895_v25 }
  0x8f   :  { %1613 = vmatpush1.bf16.msra.mxu1 %v1878_v23 }
  0x90   :  { %1209 = vmatpush1.bf16.msra.mxu0 %v1878_v23  ;;  %1606 = vmatprep.subr.bf16.mxu1 %v1883_v24 }
  0x91   :  { %1210 = vmatprep.subr.bf16.mxu0 %v1883_v24 }
  0x93   :  { %1614 = vmatpush1.bf16.msra.mxu1 %v1881_v26 }
  0x94   :  { %1211 = vmatpush1.bf16.msra.mxu0 %v1881_v26  ;;  %1607 = vmatprep.subr.bf16.mxu1 %v1886_v27 }
  0x95   :  { %1212 = vmatprep.subr.bf16.mxu0 %v1886_v27 }
  0x97   :  { %1615 = vmatpush1.bf16.msra.mxu1 %v1884_v28 }
  0x98   :  { %1213 = vmatpush1.bf16.msra.mxu0 %v1884_v28  ;;  %1608 = vmatprep.subr.bf16.mxu1 %v1889_v29 }
  0x99   :  { %1214 = vmatprep.subr.bf16.mxu0 %v1889_v29 }
  0x9b   :  { %1616 = vmatpush1.bf16.msra.mxu1 %v1887_v30 }
  0x9c   :  { %1215 = vmatpush1.bf16.msra.mxu0 %v1887_v30  ;;  %1609 = vmatprep.subr.bf16.mxu1 %v1892_v31 }
  0x9d   :  { %1216 = vmatprep.subr.bf16.mxu0 %v1892_v31 }
  0x9f   :  { %1617 = vmatpush1.bf16.msra.mxu1 %v1890_v32 }
  0xa0   :  { %1217 = vmatpush1.bf16.msra.mxu0 %v1890_v32 }
  0xa2   :  { %1245 = vmatmul.mubr.bf16.vlgmr.msra.gmra.mrb[8].mxu1 %v1894_v34 }
  0xa3   :  { %1235 = vmatmul.mubr.bf16.vlgmr.msra.gmra.mrb[0].mxu0 %v1893_v33 }
 0x155   :  { %v1077_v36 = vpop.f32.mrb[0].mxu1 }
 0x156   :  { %v1079_v37 = vpop.f32.mrb[1].mxu1 }
 0x157   :  { %v1081_v38 = vpop.f32.mrb[2].mxu1 }
 0x158   :  { %v1083_v39 = vpop.f32.mrb[3].mxu1 }
 0x15d   :  { %v1087_v40 = vpop.f32.mrb[4].mxu1 }
 0x15e   :  { %v1193_v41 = vpop.f32.mrb[4].mxu0  ;;  %v1089_v43 = vpop.f32.mrb[5].mxu1 }
 0x15f   :  { %v1622_v42 = vadd.f32 %v1193_v41, %v1087_v40  ;;  %v1195_v44 = vpop.f32.mrb[5].mxu0  ;;  %v1091_v46 = vpop.f32.mrb[6].mxu1 }
 0x160   :  { %v1624_v45 = vadd.f32 %v1195_v44, %v1089_v43  ;;  %v1197_v47 = vpop.f32.mrb[6].mxu0  ;;  %v1093_v49 = vpop.f32.mrb[7].mxu1 }
 0x161   :  { %v1626_v48 = vadd.f32 %v1197_v47, %v1091_v46  ;;  %v1199_v50 = vpop.f32.mrb[7].mxu0 }
 0x162   :  { %v1628_v51 = vadd.f32 %v1199_v50, %v1093_v49 }
 0x175   :  { %v1246_v55 = vpop.f32.mrb[8].mxu1 }
 0x176   :  { %v1236_v54 = vpop.f32.mrb[0].mxu0  ;;  %v1623_v57 = vadd.f32 %v1622_v42, %v1246_v55  ;;  %v1248_v59 = vpop.f32.mrb[9].mxu1 }
 0x177   :  { %v1618_v56 = vadd.f32 %v1236_v54, %v1077_v36  ;;  %v1238_v58 = vpop.f32.mrb[1].mxu0  ;;  %v1625_v61 = vadd.f32 %v1624_v45, %v1248_v59  ;;  %v1250_v63 = vpop.f32.mrb[10].mxu1 }
 0x178   :  { %v1619_v60 = vadd.f32 %v1238_v58, %v1079_v37  ;;  %v1240_v62 = vpop.f32.mrb[2].mxu0  ;;  %v1627_v1 = vadd.f32 %v1626_v48, %v1250_v63  ;;  %v1252_v5 = vpop.f32.mrb[11].mxu1  ;;  %v1360_v7 = vmul.f32 %v1623_v57, %v1623_v57 }
 0x179   :  { %v1620_v0 = vadd.f32 %v1240_v62, %v1081_v38  ;;  %v1242_v2 = vpop.f32.mrb[3].mxu0  ;;  %v1356_v6 = vmul.f32 %v1618_v56, %v1618_v56  ;;  %v1600_v9 = vpack.c.bf16 %v1625_v61, %v1623_v57  ;;  %v1361_v15 = vmul.f32 %v1625_v61, %v1625_v61 }
 0x17a   :  { %v1598_v8 = vpack.c.bf16 %v1619_v60, %v1618_v56  ;;  %v1304_v12 = vadd.f32 %v1627_v1, %v1623_v57  ;;  %v1362_v13 = vmul.f32 %v1627_v1, %v1627_v1  ;;  %v1357_v14 = vmul.f32 %v1619_v60, %v1619_v60 }
 0x17b   :  { %v1290_v10 = vadd.f32 %v1620_v0, %v1618_v56  ;;  %v1358_v11 = vmul.f32 %v1620_v0, %v1620_v0  ;;  %1281 = vst [vmem:[%s2442_s2 + $0x10] sm:$0xff] %v1600_v9  ;;  %v1621_v16 = vadd.f32 %v1242_v2, %v1083_v39  ;;  %v1629_v17 = vadd.f32 %v1628_v51, %v1252_v5 }
 0x17c   :  { %1279 = vst [vmem:[%s2442_s2] sm:$0xff] %v1598_v8  ;;  %v1305_v20 = vrot.slane %v1304_v12, 4  ;;  %v1378_v21 = vadd.f32 %v1362_v13, %v1360_v7  ;;  %v1327_v62 = vshrl.u32 %v1326_v4, 7 }
 0x17d   :  { %v1291_v18 = vrot.slane %v1290_v10, 4  ;;  %v1364_v19 = vadd.f32 %v1358_v11, %v1356_v6  ;;  %v1599_v22 = vpack.c.bf16 %v1621_v16, %v1620_v0  ;;  %v1297_v23 = vadd.f32 %v1621_v16, %v1619_v60 }
 0x17e   :  { %v1359_v24 = vmul.f32 %v1621_v16, %v1621_v16  ;;  %v1601_v25 = vpack.c.bf16 %v1629_v17, %v1627_v1  ;;  %v1306_v28 = vadd.f32 %v1305_v20, %v1304_v12  ;;  %v1379_v29 = vrot.slane %v1378_v21, 4 }
 0x17f   :  { %v1292_v26 = vadd.f32 %v1291_v18, %v1290_v10  ;;  %v1365_v27 = vrot.slane %v1364_v19, 4  ;;  %1280 = vst [vmem:[%s2442_s2 + $0x8] sm:$0xff] %v1599_v22  ;;  %v1298_v30 = vrot.slane %v1297_v23, 4  ;;  %v1311_v32 = vadd.f32 %v1629_v17, %v1625_v61 }
 0x180   :  { %v1371_v31 = vadd.f32 %v1359_v24, %v1357_v14  ;;  %1282 = vst [vmem:[%s2442_s2 + $0x18] sm:$0xff] %v1601_v25  ;;  %v1363_v33 = vmul.f32 %v1629_v17, %v1629_v17  ;;  %v1307_v36 = vrot.slane %v1306_v28, 2  ;;  %v1380_v37 = vadd.f32 %v1379_v29, %v1378_v21 }
 0x181   :  { %v1293_v34 = vrot.slane %v1292_v26, 2  ;;  %v1366_v35 = vadd.f32 %v1365_v27, %v1364_v19  ;;  %v1299_v38 = vadd.f32 %v1298_v30, %v1297_v23  ;;  %v1312_v40 = vrot.slane %v1311_v32, 4  ;;  %v1596_v30 = vld [vmem:[%s2441_s3 + $0x4] sm:$0xf] }
 0x182   :  { %v1372_v39 = vrot.slane %v1371_v31, 4  ;;  %v1385_v41 = vadd.f32 %v1363_v33, %v1361_v15  ;;  %v1308_v44 = vadd.f32 %v1307_v36, %v1306_v28  ;;  %v1381_v45 = vrot.slane %v1380_v37, 2 }
 0x183   :  { %v1294_v42 = vadd.f32 %v1293_v34, %v1292_v26  ;;  %v1367_v43 = vrot.slane %v1366_v35, 2  ;;  %v1300_v46 = vrot.slane %v1299_v38, 2  ;;  %v1313_v48 = vadd.f32 %v1312_v40, %v1311_v32 }
 0x184   :  { %v1373_v47 = vadd.f32 %v1372_v39, %v1371_v31  ;;  %v1386_v49 = vrot.slane %v1385_v41, 4  ;;  %v1309_v52 = vrot.slane %v1308_v44, 1  ;;  %v1382_v54 = vadd.f32 %v1381_v45, %v1380_v37 }
 0x185   :  { %v1295_v50 = vrot.slane %v1294_v42, 1  ;;  %v1368_v51 = vadd.f32 %v1367_v43, %v1366_v35  ;;  %v1301_v55 = vadd.f32 %v1300_v46, %v1299_v38  ;;  %v1314_v57 = vrot.slane %v1313_v48, 2 }
 0x186   :  { %v1374_v56 = vrot.slane %v1373_v47, 2  ;;  %v1387_v58 = vadd.f32 %v1386_v49, %v1385_v41  ;;  %v1383_v61 = vrot.slane %v1382_v54, 1  ;;  %v1310_v6 = vadd.f32 %v1309_v52, %v1308_v44 }
 0x187   :  { %v1296_v59 = vadd.f32 %v1295_v50, %v1294_v42  ;;  %v1369_v60 = vrot.slane %v1368_v51, 1  ;;  %v1302_v63 = vrot.slane %v1301_v55, 1  ;;  %v1315_v1 = vadd.f32 %v1314_v57, %v1313_v48 }
 0x188   :  { %v1375_v0 = vadd.f32 %v1374_v56, %v1373_v47  ;;  %v1388_v2 = vrot.slane %v1387_v58, 2  ;;  %v1384_v11 = vadd.f32 %v1383_v61, %v1382_v54  ;;  %v1328_v12 = vsub.s32 %v1325_v3, %v1327_v62  ;;  %v1289_v3 = vld [vmem:[%s2441_s3] sm:$0xf] }
 0x189   :  { %v1370_v5 = vadd.f32 %v1369_v60, %v1368_v51  ;;  %v1303_v7 = vadd.f32 %v1302_v63, %v1301_v55  ;;  %v1316_v9 = vrot.slane %v1315_v1, 1 }
 0x18a   :  { %v1376_v8 = vrot.slane %v1375_v0, 1  ;;  %v1389_v10 = vadd.f32 %v1388_v2, %v1387_v58 }
 0x18b   :  { %v1322_v13 = vcombine.low %v1296_v59, %v1303_v7  ;;  %v1317_v15 = vadd.f32 %v1316_v9, %v1315_v1 }
 0x18c   :  { %v1377_v14 = vadd.f32 %v1376_v8, %v1375_v0  ;;  %v1390_v16 = vrot.slane %v1389_v10, 1 }
 0x18d   :  { %v1330_v4 = vcombine.low %v1310_v6, %v1317_v15  ;;  %v1329_v21 = vrot.slane %v1322_v13, %v1328_v12 }
 0x18e   :  { %v1396_v17 = vcombine.low %v1370_v5, %v1377_v14  ;;  %v1391_v18 = vadd.f32 %v1390_v16, %v1389_v10 }
 0x18f   :  { %v1337_v19 = vrot.slane %v1330_v4, %v1328_v12 }
 0x190   :  { %v1404_v20 = vcombine.low %v1384_v11, %v1391_v18  ;;  %v1403_v24 = vrot.slane %v1396_v17, %v1328_v12 }
 0x191   :  { %v1342_v22 = vrot.slane %v1337_v19, 7 }
 0x192   :  { %v1411_v23 = vrot.slane %v1404_v20, %v1328_v12 }
 0x193   :  { %v1344_v25 = vsel %vm1343_vm0, %v1342_v22, %v1329_v21 }
 0x194   :  { %v1414_v53 = vrot.slane %v1411_v23, 7  ;;  %v1346_v26 = vsel %vm1345_vm1, %v1342_v22, %v1344_v25 }
 0x195   :  { %v1348_v27 = vsel %vm1347_vm2, %v1342_v22, %v1346_v26 }
 0x196   :  { %v1415_v28 = vsel %vm1343_vm0, %v1414_v53, %v1403_v24  ;;  %v1350_v29 = vsel %vm1349_vm3, %v1342_v22, %v1348_v27 }
 0x197   :  { %v1416_v31 = vsel %vm1345_vm1, %v1414_v53, %v1415_v28  ;;  %v1352_v32 = vadd.f32 %v1350_v29, %v1289_v3 }
 0x198   :  { %v1417_v33 = vsel %vm1347_vm2, %v1414_v53, %v1416_v31 }
 0x199   :  { %v1418_v34 = vsel %vm1349_vm3, %v1414_v53, %v1417_v33  ;;  %1353 = vst [vmem:[%s2441_s3] sm:$0xf] %v1352_v32 }
 0x19a   :  { %v1420_v35 = vadd.f32 %v1596_v30, %v1418_v34 }
 0x19c   :  { %1597 = vst [vmem:[%s2441_s3 + $0x4] sm:$0xf] %v1420_v35 }

</bundles_post_ra>
